<compile_context>
chip_gen: v5e
topology: v5e:2x2
jax: 0.10.0
libtpu: 0.0.40
codegen_flags: <defaults>
</compile_context>

<pallas_src>
import functools
import math

import jax
import jax.numpy as jnp
from jax.experimental import pallas as pl
from jax.experimental.pallas import tpu as pltpu


# 48 MiB: fits v7x's 64 MiB physical VMEM with headroom, plenty on v5e/v6e.
_VMEM_LIMIT_BYTES = 48 * 1024 * 1024


def _compiler_params(*dimension_semantics):
    return pltpu.CompilerParams(
        dimension_semantics=dimension_semantics,
        vmem_limit_bytes=_VMEM_LIMIT_BYTES,
    )


def _pick_row_tile(n):
    """Row-tile: big lane-aligned tiles first, else split small n into >=2 tiles."""
    for t in (512, 256, 128):
        if n % t == 0:
            return t
    if n >= 32 and n % 16 == 0:
        return n // 2          # >=2 parallel grid points for v7x's two TCs
    return n


def _pick_col_tile(n):
    """Column-tile for wide outputs (large vocab): bound VMEM live set."""
    if n <= 1024:
        return n
    for t in (1024, 512, 256):
        if n % t == 0:
            return t
    return n


def _layer_norm_f32(x, gamma, beta, eps=1e-5):
    # torch.nn.LayerNorm: biased variance, eps inside rsqrt, f32 math.
    mean = jnp.mean(x, axis=-1, keepdims=True)
    var = jnp.mean(jnp.square(x - mean), axis=-1, keepdims=True)
    return (x - mean) * jax.lax.rsqrt(var + eps) * gamma + beta


# ---------------------------------------------------------------------------
# Kernel 1: row/column-tiled linear   y = x @ W + b   (bf16 MXU, f32 accumulate)
# Used for the fused QKV / KV / Q projections and the final vocab projection.
# ---------------------------------------------------------------------------
def _linear_kernel(x_ref, w_ref, b_ref, o_ref):
    x = x_ref[...].astype(jnp.bfloat16)
    y = jnp.dot(x, w_ref[...], preferred_element_type=jnp.float32) + b_ref[...]
    o_ref[...] = y.astype(o_ref.dtype)


def linear(x2d, w_bf16, b, *, out_dtype=jnp.float32):
    m, kdim = x2d.shape
    n = w_bf16.shape[1]
    tm = _pick_row_tile(m)
    tn = _pick_col_tile(n)
    return pl.pallas_call(
        _linear_kernel,
        out_shape=jax.ShapeDtypeStruct((m, n), out_dtype),
        grid_spec=pltpu.PrefetchScalarGridSpec(
            num_scalar_prefetch=0,
            grid=(m // tm, n // tn),
            in_specs=[
                pl.BlockSpec((tm, kdim), lambda i, j: (i, 0)),
                pl.BlockSpec((kdim, tn), lambda i, j: (0, j)),   # weight column block
                pl.BlockSpec((1, tn), lambda i, j: (0, j)),
            ],
            out_specs=pl.BlockSpec((tm, tn), lambda i, j: (i, j)),
        ),
        compiler_params=_compiler_params("parallel", "parallel"),
    )(x2d, w_bf16, b)


# ---------------------------------------------------------------------------
# Kernel 2: fused attention block over a (batch, query-tile) grid:
#   scores -> mask bias (pad + in-kernel causal iota) -> softmax ->
#   P@V -> combine_heads+W_o (per-head MXU matmuls) -> +bias -> residual -> LN.
# Output block is (tq, d_model): lane-dense, no HBM round-trip of the context.
# ---------------------------------------------------------------------------
def _attention_kernel(causal, q_ref, k_ref, v_ref, qm_ref, km_ref, x_ref,
                      wo_ref, bo_ref, g_ref, beta_ref, o_ref):
    q = q_ref[...]                                   # (H, tq, dk) bf16, pre-scaled
    k = k_ref[...]                                   # (H, Sk, dk) bf16
    v = v_ref[...]                                   # (H, Sk, dk) bf16
    num_heads, tq, _ = q.shape
    sk = k.shape[1]

    # Batched-head scores on the MXU, f32 accumulation.
    scores = jnp.einsum("hqd,hkd->hqk", q, k, preferred_element_type=jnp.float32)

    # Additive mask bias (tq, sk) built from tiny per-key / per-query masks.
    bias = jnp.where(km_ref[...] == 0.0, jnp.float32(-1e9), jnp.float32(0.0))   # (1, sk)
    bias = bias + jnp.where(qm_ref[...] == 0.0, jnp.float32(-1e9), jnp.float32(0.0))  # (tq,1)
    if causal:
        q0 = pl.program_id(1) * tq
        rows = jax.lax.broadcasted_iota(jnp.int32, (tq, sk), 0) + q0
        cols = jax.lax.broadcasted_iota(jnp.int32, (tq, sk), 1)
        bias = bias + jnp.where(cols > rows, jnp.float32(-1e9), jnp.float32(0.0))
    scores = scores + bias[None]

    # Numerically stable softmax in f32; reciprocal hits the EUP slot.
    m = jnp.max(scores, axis=-1, keepdims=True)
    e = jnp.exp(scores - m)
    probs = e * pl.reciprocal(jnp.sum(e, axis=-1, keepdims=True), approx=True)

    ctx = jnp.einsum("hqk,hkd->hqd", probs.astype(jnp.bfloat16), v,
                     preferred_element_type=jnp.float32)
    ctx = ctx.astype(jnp.bfloat16)

    # combine_heads + W_o, fused: out[q,e] = sum_h ctx[h] @ wo_r[h]
    # (static per-head loop; avoids any minor-dim reshape/transpose in-kernel).
    attn = jnp.dot(ctx[0], wo_ref[0], preferred_element_type=jnp.float32)
    for hh in range(1, num_heads):
        attn = attn + jnp.dot(ctx[hh], wo_ref[hh], preferred_element_type=jnp.float32)
    attn = attn + bo_ref[...]

    xres = x_ref[...].astype(jnp.float32)            # residual stream (bf16 -> f32)
    o_ref[...] = _layer_norm_f32(xres + attn, g_ref[...], beta_ref[...]).astype(o_ref.dtype)


def attention_block(q, k, v, qmask, kmask, causal, x_res, wo_r, bo, ln_w, ln_b):
    b, h, sq, dk = q.shape
    sk = k.shape[2]
    d = h * dk
    tq = _pick_row_tile(sq)
    kernel = functools.partial(_attention_kernel, bool(causal))
    return pl.pallas_call(
        kernel,
        out_shape=jax.ShapeDtypeStruct((b, sq, d), jnp.bfloat16),
        grid_spec=pltpu.PrefetchScalarGridSpec(
            num_scalar_prefetch=0,
            grid=(b, sq // tq),
            in_specs=[
                pl.BlockSpec((None, h, tq, dk), lambda bi, qi: (bi, 0, qi, 0)),  # Q tile
                pl.BlockSpec((None, h, sk, dk), lambda bi, qi: (bi, 0, 0, 0)),   # full K
                pl.BlockSpec((None, h, sk, dk), lambda bi, qi: (bi, 0, 0, 0)),   # full V
                pl.BlockSpec((None, tq, 1), lambda bi, qi: (bi, qi, 0)),         # query pad mask
                pl.BlockSpec((None, 1, sk), lambda bi, qi: (bi, 0, 0)),          # key pad mask
                pl.BlockSpec((None, tq, d), lambda bi, qi: (bi, qi, 0)),         # residual
                pl.BlockSpec((h, dk, d), lambda bi, qi: (0, 0, 0)),              # W_o (head-split)
                pl.BlockSpec((1, d), lambda bi, qi: (0, 0)),
                pl.BlockSpec((1, d), lambda bi, qi: (0, 0)),
                pl.BlockSpec((1, d), lambda bi, qi: (0, 0)),
            ],
            out_specs=pl.BlockSpec((None, tq, d), lambda bi, qi: (bi, qi, 0)),
        ),
        compiler_params=_compiler_params("parallel", "parallel"),
    )(q, k, v, qmask, kmask, x_res, wo_r, bo, ln_w, ln_b)


# ---------------------------------------------------------------------------
# Kernel 3: position-wise FFN + residual + LayerNorm (row-tiled, bf16 in/out)
# ---------------------------------------------------------------------------
def _ffn_kernel(x_ref, w1_ref, b1_ref, w2_ref, b2_ref, g_ref, beta_ref, o_ref):
    x_bf = x_ref[...]                                              # bf16
    hid = jnp.dot(x_bf, w1_ref[...], preferred_element_type=jnp.float32) + b1_ref[...]
    hid = jnp.maximum(hid, 0.0)                                    # ReLU in f32
    f = jnp.dot(hid.astype(jnp.bfloat16), w2_ref[...],
                preferred_element_type=jnp.float32) + b2_ref[...]
    x = x_bf.astype(jnp.float32)
    o_ref[...] = _layer_norm_f32(x + f, g_ref[...], beta_ref[...]).astype(o_ref.dtype)


def ffn_block(x, p):
    bsz, s, d = x.shape
    x2 = x.reshape(bsz * s, d)
    m = x2.shape[0]
    dff = p["w1"].shape[1]
    tm = _pick_row_tile(m)
    y = pl.pallas_call(
        _ffn_kernel,
        out_shape=jax.ShapeDtypeStruct((m, d), jnp.bfloat16),
        grid_spec=pltpu.PrefetchScalarGridSpec(
            num_scalar_prefetch=0,
            grid=(m // tm,),
            in_specs=[
                pl.BlockSpec((tm, d), lambda i: (i, 0)),
                pl.BlockSpec((d, dff), lambda i: (0, 0)),
                pl.BlockSpec((1, dff), lambda i: (0, 0)),
                pl.BlockSpec((dff, d), lambda i: (0, 0)),
                pl.BlockSpec((1, d), lambda i: (0, 0)),
                pl.BlockSpec((1, d), lambda i: (0, 0)),
                pl.BlockSpec((1, d), lambda i: (0, 0)),
            ],
            out_specs=pl.BlockSpec((tm, d), lambda i: (i, 0)),
        ),
        compiler_params=_compiler_params("parallel"),
    )(x2, p["w1"], p["b1"], p["w2"], p["b2"], p["ln_w"], p["ln_b"])
    return y.reshape(bsz, s, d)


# ---------------------------------------------------------------------------
# Model composition (matches the PyTorch modules, eval mode)
# ---------------------------------------------------------------------------
def mha_block(x_q, x_kv, qmask, kmask, causal, p, num_heads):
    """MultiHeadAttention + residual + LayerNorm (post-norm), fused kernels."""
    bsz, sq, d = x_q.shape
    sk = x_kv.shape[1]
    dk = d // num_heads

    xq2 = x_q.reshape(bsz * sq, d)
    if x_q is x_kv:
        # Self-attention: one fused QKV projection (activation read once).
        qkv = linear(xq2, p["wqkv"], p["bqkv"], out_dtype=jnp.bfloat16)
        q2, k2, v2 = qkv[:, :d], qkv[:, d:2 * d], qkv[:, 2 * d:]
    else:
        # Cross-attention: Q from decoder stream, fused KV from encoder output.
        xkv2 = x_kv.reshape(bsz * sk, d)
        q2 = linear(xq2, p["wq"], p["bq"], out_dtype=jnp.bfloat16)
        kv = linear(xkv2, p["wkv"], p["bkv"], out_dtype=jnp.bfloat16)
        k2, v2 = kv[:, :d], kv[:, d:]

    # Head split is a pure layout move -> XLA wrapper (no kernel touches it).
    def split(t, s):
        return t.reshape(bsz, s, num_heads, dk).transpose(0, 2, 1, 3)

    return attention_block(split(q2, sq), split(k2, sk), split(v2, sk),
                           qmask, kmask, causal, x_q,
                           p["wo_r"], p["bo"], p["ln_w"], p["ln_b"])


def encoder_layer(x, qmask, kmask, p, num_heads):
    y = mha_block(x, x, qmask, kmask, False, p["attn"], num_heads)       # norm1
    return ffn_block(y, p["ffn"])                                        # norm2


def decoder_layer(x, enc_out, src_kmask, tgt_qmask, ones_q, ones_k, p, num_heads):
    y = mha_block(x, x, tgt_qmask, ones_k, True, p["self_attn"], num_heads)      # norm1
    y = mha_block(y, enc_out, ones_q, src_kmask, False, p["cross_attn"], num_heads)  # norm2
    return ffn_block(y, p["ffn"])                                                 # norm3


def sinusoidal_positional_encoding(max_seq_length, d_model):
    pos = jnp.arange(max_seq_length, dtype=jnp.float32)[:, None]
    div = jnp.exp(jnp.arange(0, d_model, 2, dtype=jnp.float32)
                  * (-math.log(10000.0) / d_model))
    pe = jnp.zeros((max_seq_length, d_model), jnp.float32)
    pe = pe.at[:, 0::2].set(jnp.sin(pos * div))
    pe = pe.at[:, 1::2].set(jnp.cos(pos * div))
    return pe


def transformer_forward(src, tgt, p, *, num_heads):
    bsz, s_src = src.shape
    s_tgt = tgt.shape[1]
    d_model = p["enc_emb"].shape[1]

    # Pad masks are tiny (B, S) f32 arrays; causal mask is built in-kernel.
    # PyTorch semantics: src_mask masks KEYS by src padding; tgt_mask masks
    # QUERIES by tgt padding AND applies the causal no-peek mask.
    src_kmask = (src != 0).astype(jnp.float32)[:, None, :]      # (B, 1, Ss)
    tgt_qmask = (tgt != 0).astype(jnp.float32)[:, :, None]      # (B, St, 1)
    ones_src_q = jnp.ones((bsz, s_src, 1), jnp.float32)
    ones_tgt_q = jnp.ones((bsz, s_tgt, 1), jnp.float32)
    ones_tgt_k = jnp.ones((bsz, 1, s_tgt), jnp.float32)

    # --- embeddings + positional encoding (dropout == identity in eval) ------
    # TODO(synk): the token-id gather (nn.Embedding) stays in XLA; a
    # data-dependent gather has no rectangular BlockSpec equivalent.
    pe = p["pe"]
    enc_x = (jnp.take(p["enc_emb"], src, axis=0) + pe[None, :s_src, :]).astype(jnp.bfloat16)
    dec_x = (jnp.take(p["dec_emb"], tgt, axis=0) + pe[None, :s_tgt, :]).astype(jnp.bfloat16)

    for lp in p["encoder_layers"]:
        enc_x = encoder_layer(enc_x, ones_src_q, src_kmask, lp, num_heads)

    for lp in p["decoder_layers"]:
        dec_x = decoder_layer(dec_x, enc_x, src_kmask, tgt_qmask,
                              ones_tgt_q, ones_tgt_k, lp, num_heads)

    logits = linear(dec_x.reshape(bsz * s_tgt, d_model),
                    p["fc_w"], p["fc_b"], out_dtype=jnp.float32)
    return logits.reshape(bsz, s_tgt, -1)


# ---------------------------------------------------------------------------
# Parameters: f32 reference params -> one-time bf16 "fast" params
# (QKV / KV concat, 1/sqrt(d_k) folded into wq/bq, W_o pre-split per head).
# ---------------------------------------------------------------------------
def init_params(key, *, src_vocab, tgt_vocab, d_model, num_layers, d_ff,
                max_seq_length):
    keys = iter(jax.random.split(key, 8 + 16 * num_layers))

    def dense(n_in, n_out):
        return 0.02 * jax.random.normal(next(keys), (n_in, n_out), jnp.float32)

    def attn_params():
        return {
            "wq": dense(d_model, d_model), "bq": jnp.zeros((1, d_model), jnp.float32),
            "wk": dense(d_model, d_model), "bk": jnp.full((1, d_model), 0.01, jnp.float32),
            "wv": dense(d_model, d_model), "bv": jnp.full((1, d_model), -0.01, jnp.float32),
            "wo": dense(d_model, d_model), "bo": jnp.zeros((1, d_model), jnp.float32),
            "ln_w": jnp.ones((1, d_model), jnp.float32),
            "ln_b": jnp.zeros((1, d_model), jnp.float32),
        }

    def ffn_params():
        return {
            "w1": dense(d_model, d_ff), "b1": jnp.full((1, d_ff), 0.02, jnp.float32),
            "w2": dense(d_ff, d_model), "b2": jnp.zeros((1, d_model), jnp.float32),
            "ln_w": jnp.ones((1, d_model), jnp.float32),
            "ln_b": jnp.zeros((1, d_model), jnp.float32),
        }

    return {
        "enc_emb": 0.02 * jax.random.normal(next(keys), (src_vocab, d_model), jnp.float32),
        "dec_emb": 0.02 * jax.random.normal(next(keys), (tgt_vocab, d_model), jnp.float32),
        "pe": sinusoidal_positional_encoding(max_seq_length, d_model),
        "encoder_layers": [
            {"attn": attn_params(), "ffn": ffn_params()} for _ in range(num_layers)
        ],
        "decoder_layers": [
            {"self_attn": attn_params(), "cross_attn": attn_params(), "ffn": ffn_params()}
            for _ in range(num_layers)
        ],
        "fc_w": dense(d_model, tgt_vocab),
        "fc_b": jnp.zeros((1, tgt_vocab), jnp.float32),
    }


def prepare_params(params, *, num_heads):
    """One-time weight prep: bf16 cast, QKV/KV concat, scale fold, W_o head split."""
    d = params["enc_emb"].shape[1]
    dk = d // num_heads
    scale = 1.0 / math.sqrt(dk)

    def prep_attn(a):
        wq = (a["wq"] * scale).astype(jnp.bfloat16)          # 1/sqrt(d_k) folded in
        bq = (a["bq"] * scale).astype(jnp.float32)
        wk = a["wk"].astype(jnp.bfloat16)
        wv = a["wv"].astype(jnp.bfloat16)
        return {
            "wqkv": jnp.concatenate([wq, wk, wv], axis=1),
            "bqkv": jnp.concatenate([bq, a["bk"], a["bv"]], axis=1),
            "wq": wq, "bq": bq,
            "wkv": jnp.concatenate([wk, wv], axis=1),
            "bkv": jnp.concatenate([a["bk"], a["bv"]], axis=1),
            "wo_r": a["wo"].astype(jnp.bfloat16).reshape(num_heads, dk, d),
            "bo": a["bo"], "ln_w": a["ln_w"], "ln_b": a["ln_b"],
        }

    def prep_ffn(f):
        return {"w1": f["w1"].astype(jnp.bfloat16), "b1": f["b1"],
                "w2": f["w2"].astype(jnp.bfloat16), "b2": f["b2"],
                "ln_w": f["ln_w"], "ln_b": f["ln_b"]}

    return {
        "enc_emb": params["enc_emb"], "dec_emb": params["dec_emb"], "pe": params["pe"],
        "fc_w": params["fc_w"].astype(jnp.bfloat16), "fc_b": params["fc_b"],
        "encoder_layers": [
            {"attn": prep_attn(lp["attn"]), "ffn": prep_ffn(lp["ffn"])}
            for lp in params["encoder_layers"]],
        "decoder_layers": [
            {"self_attn": prep_attn(lp["self_attn"]),
             "cross_attn": prep_attn(lp["cross_attn"]),
             "ffn": prep_ffn(lp["ffn"])}
            for lp in params["decoder_layers"]],
    }


if __name__ == "__main__":
    SRC_VOCAB = TGT_VOCAB = 128            # lane-dense final projection
    D_MODEL, NUM_HEADS, NUM_LAYERS, D_FF = 128, 4, 2, 256
    MAX_SEQ_LEN, BATCH, S_SRC, S_TGT = 32, 2, 16, 16

    root = jax.random.PRNGKey(0)
    k_params, k_src, k_tgt = jax.random.split(root, 3)
    params = init_params(k_params, src_vocab=SRC_VOCAB, tgt_vocab=TGT_VOCAB,
                         d_model=D_MODEL, num_layers=NUM_LAYERS, d_ff=D_FF,
                         max_seq_length=MAX_SEQ_LEN)
    fast_params = prepare_params(params, num_heads=NUM_HEADS)   # bf16 cast once

    src = jax.random.randint(k_src, (BATCH, S_SRC), 1, SRC_VOCAB, dtype=jnp.int32)
    tgt = jax.random.randint(k_tgt, (BATCH, S_TGT), 1, TGT_VOCAB, dtype=jnp.int32)
    src = src.at[:, -2:].set(0)    # padding -> exercises the src (key) mask
    tgt = tgt.at[:, -2:].set(0)    # padding -> exercises the tgt (query) mask

    fwd = jax.jit(functools.partial(transformer_forward, num_heads=NUM_HEADS))
    logits = jax.block_until_ready(fwd(src, tgt, fast_params))

    assert logits.shape == (BATCH, S_TGT, TGT_VOCAB), logits.shape
    assert bool(jnp.all(jnp.isfinite(logits)))
    print("KERNEL_OK")
</pallas_src>

<mosaic_0001>
module attributes {stable_mosaic.version = 11 : i64} {
  func.func @_linear_kernel(%arg0: i32, %arg1: i32, %arg2: memref<16x128xbf16, #tpu.memory_space<vmem>>, %arg3: memref<128x384xbf16, #tpu.memory_space<vmem>>, %arg4: memref<1x384xf32, #tpu.memory_space<vmem>>, %arg5: memref<16x384xbf16, #tpu.memory_space<vmem>>) attributes {dimension_semantics = [#tpu.dimension_semantics<parallel>, #tpu.dimension_semantics<parallel>], iteration_bounds = array<i64: 2, 1>, scalar_prefetch = 0 : i64, scratch_operands = 0 : i64, tpu.core_type = #tpu.core_type<tc>, window_params = [{transform_indices = @transform_0, window_bounds = array<i64: 16, 128>}, {transform_indices = @transform_1, window_bounds = array<i64: 128, 384>}, {transform_indices = @transform_2, window_bounds = array<i64: 1, 384>}, {transform_indices = @transform_3, window_bounds = array<i64: 16, 384>}]} {
    %c0 = arith.constant 0 : index
    %c0_0 = arith.constant 0 : index
    %0 = vector.load %arg2[%c0, %c0_0] : memref<16x128xbf16, #tpu.memory_space<vmem>>, vector<16x128xbf16>
    %c0_1 = arith.constant 0 : index
    %c0_2 = arith.constant 0 : index
    %1 = vector.load %arg3[%c0_1, %c0_2] : memref<128x384xbf16, #tpu.memory_space<vmem>>, vector<128x384xbf16>
    %cst = arith.constant dense<0.000000e+00> : vector<16x384xf32>
    %2 = tpu.matmul %0, %1, %cst {dimension_numbers = #tpu.dot_dimension_numbers<[1], [0], [0], [1], [0, 0, 1, 1], [], []>} : vector<16x128xbf16>, vector<128x384xbf16>, vector<16x384xf32> -> vector<16x384xf32>
    %c0_3 = arith.constant 0 : index
    %c0_4 = arith.constant 0 : index
    %3 = vector.load %arg4[%c0_3, %c0_4] : memref<1x384xf32, #tpu.memory_space<vmem>>, vector<1x384xf32>
    %4 = vector.broadcast %3 : vector<1x384xf32> to vector<16x384xf32>
    %5 = arith.addf %2, %4 : vector<16x384xf32>
    %6 = arith.truncf %5 : vector<16x384xf32> to vector<16x384xbf16>
    %c0_5 = arith.constant 0 : index
    %c0_6 = arith.constant 0 : index
    %7 = vector.load %arg5[%c0_5, %c0_6] : memref<16x384xbf16, #tpu.memory_space<vmem>>, vector<16x384xbf16>
    tpu.vector_store %arg5[%c0_5, %c0_6], %6 {strides = array<i32>} : memref<16x384xbf16, #tpu.memory_space<vmem>>, vector<16x384xbf16>,
    return
  }
  func.func @transform_0(%arg0: i32, %arg1: i32) -> (i32, i32) {
    %c0_i32 = arith.constant 0 : i32
    %c0_i32_0 = arith.constant 0 : i32
    return %arg0, %c0_i32 : i32, i32
  }
  func.func @transform_1(%arg0: i32, %arg1: i32) -> (i32, i32) {
    %c0_i32 = arith.constant 0 : i32
    %c0_i32_0 = arith.constant 0 : i32
    return %c0_i32, %arg1 : i32, i32
  }
  func.func @transform_2(%arg0: i32, %arg1: i32) -> (i32, i32) {
    %c0_i32 = arith.constant 0 : i32
    %c0_i32_0 = arith.constant 0 : i32
    return %c0_i32, %arg1 : i32, i32
  }
  func.func @transform_3(%arg0: i32, %arg1: i32) -> (i32, i32) {
    %c0_i32 = arith.constant 0 : i32
    return %arg0, %arg1 : i32, i32
  }
}

module attributes {stable_mosaic.version = 11 : i64} {
  func.func @_linear_kernel(%arg0: i32, %arg1: i32, %arg2: memref<16x128xbf16, #tpu.memory_space<vmem>>, %arg3: memref<128x128xbf16, #tpu.memory_space<vmem>>, %arg4: memref<1x128xf32, #tpu.memory_space<vmem>>, %arg5: memref<16x128xbf16, #tpu.memory_space<vmem>>) attributes {dimension_semantics = [#tpu.dimension_semantics<parallel>, #tpu.dimension_semantics<parallel>], iteration_bounds = array<i64: 2, 1>, scalar_prefetch = 0 : i64, scratch_operands = 0 : i64, tpu.core_type = #tpu.core_type<tc>, window_params = [{transform_indices = @transform_0, window_bounds = array<i64: 16, 128>}, {transform_indices = @transform_1, window_bounds = array<i64: 128, 128>}, {transform_indices = @transform_2, window_bounds = array<i64: 1, 128>}, {transform_indices = @transform_3, window_bounds = array<i64: 16, 128>}]} {
    %c0 = arith.constant 0 : index
    %c0_0 = arith.constant 0 : index
    %0 = vector.load %arg2[%c0, %c0_0] : memref<16x128xbf16, #tpu.memory_space<vmem>>, vector<16x128xbf16>
    %c0_1 = arith.constant 0 : index
    %c0_2 = arith.constant 0 : index
    %1 = vector.load %arg3[%c0_1, %c0_2] : memref<128x128xbf16, #tpu.memory_space<vmem>>, vector<128x128xbf16>
    %cst = arith.constant dense<0.000000e+00> : vector<16x128xf32>
    %2 = tpu.matmul %0, %1, %cst {dimension_numbers = #tpu.dot_dimension_numbers<[1], [0], [0], [1], [0, 0, 1, 1], [], []>} : vector<16x128xbf16>, vector<128x128xbf16>, vector<16x128xf32> -> vector<16x128xf32>
    %c0_3 = arith.constant 0 : index
    %c0_4 = arith.constant 0 : index
    %3 = vector.load %arg4[%c0_3, %c0_4] : memref<1x128xf32, #tpu.memory_space<vmem>>, vector<1x128xf32>
    %4 = vector.broadcast %3 : vector<1x128xf32> to vector<16x128xf32>
    %5 = arith.addf %2, %4 : vector<16x128xf32>
    %6 = arith.truncf %5 : vector<16x128xf32> to vector<16x128xbf16>
    %c0_5 = arith.constant 0 : index
    %c0_6 = arith.constant 0 : index
    %7 = vector.load %arg5[%c0_5, %c0_6] : memref<16x128xbf16, #tpu.memory_space<vmem>>, vector<16x128xbf16>
    tpu.vector_store %arg5[%c0_5, %c0_6], %6 {strides = array<i32>} : memref<16x128xbf16, #tpu.memory_space<vmem>>, vector<16x128xbf16>,
    return
  }
  func.func @transform_0(%arg0: i32, %arg1: i32) -> (i32, i32) {
    %c0_i32 = arith.constant 0 : i32
    %c0_i32_0 = arith.constant 0 : i32
    return %arg0, %c0_i32 : i32, i32
  }
  func.func @transform_1(%arg0: i32, %arg1: i32) -> (i32, i32) {
    %c0_i32 = arith.constant 0 : i32
    %c0_i32_0 = arith.constant 0 : i32
    return %c0_i32, %arg1 : i32, i32
  }
  func.func @transform_2(%arg0: i32, %arg1: i32) -> (i32, i32) {
    %c0_i32 = arith.constant 0 : i32
    %c0_i32_0 = arith.constant 0 : i32
    return %c0_i32, %arg1 : i32, i32
  }
  func.func @transform_3(%arg0: i32, %arg1: i32) -> (i32, i32) {
    %c0_i32 = arith.constant 0 : i32
    return %arg0, %arg1 : i32, i32
  }
}

module attributes {stable_mosaic.version = 11 : i64} {
  func.func @_attention_kernel(%arg0: i32, %arg1: i32, %arg2: memref<1x4x16x32xbf16, #tpu.memory_space<vmem>>, %arg3: memref<1x4x16x32xbf16, #tpu.memory_space<vmem>>, %arg4: memref<1x4x16x32xbf16, #tpu.memory_space<vmem>>, %arg5: memref<1x16x1xf32, #tpu.memory_space<vmem>>, %arg6: memref<1x1x16xf32, #tpu.memory_space<vmem>>, %arg7: memref<1x16x128xbf16, #tpu.memory_space<vmem>>, %arg8: memref<4x32x128xbf16, #tpu.memory_space<vmem>>, %arg9: memref<1x128xf32, #tpu.memory_space<vmem>>, %arg10: memref<1x128xf32, #tpu.memory_space<vmem>>, %arg11: memref<1x128xf32, #tpu.memory_space<vmem>>, %arg12: memref<1x16x128xbf16, #tpu.memory_space<vmem>>) attributes {dimension_semantics = [#tpu.dimension_semantics<parallel>, #tpu.dimension_semantics<parallel>], iteration_bounds = array<i64: 2, 1>, scalar_prefetch = 0 : i64, scratch_operands = 0 : i64, tpu.core_type = #tpu.core_type<tc>, window_params = [{transform_indices = @transform_0, window_bounds = array<i64: 1, 4, 16, 32>}, {transform_indices = @transform_1, window_bounds = array<i64: 1, 4, 16, 32>}, {transform_indices = @transform_2, window_bounds = array<i64: 1, 4, 16, 32>}, {transform_indices = @transform_3, window_bounds = array<i64: 1, 16, 1>}, {transform_indices = @transform_4, window_bounds = array<i64: 1, 1, 16>}, {transform_indices = @transform_5, window_bounds = array<i64: 1, 16, 128>}, {pipeline_mode = #tpu.pipeline_mode<synchronous>, transform_indices = @transform_6, window_bounds = array<i64: 4, 32, 128>}, {pipeline_mode = #tpu.pipeline_mode<synchronous>, transform_indices = @transform_7, window_bounds = array<i64: 1, 128>}, {pipeline_mode = #tpu.pipeline_mode<synchronous>, transform_indices = @transform_8, window_bounds = array<i64: 1, 128>}, {pipeline_mode = #tpu.pipeline_mode<synchronous>, transform_indices = @transform_9, window_bounds = array<i64: 1, 128>}, {transform_indices = @transform_10, window_bounds = array<i64: 1, 16, 128>}]} {
    %c0 = arith.constant 0 : index
    %c0_0 = arith.constant 0 : index
    %c0_1 = arith.constant 0 : index
    %c0_2 = arith.constant 0 : index
    %0 = vector.load %arg2[%c0, %c0_0, %c0_1, %c0_2] : memref<1x4x16x32xbf16, #tpu.memory_space<vmem>>, vector<1x4x16x32xbf16>
    %1 = vector.shape_cast %0 : vector<1x4x16x32xbf16> to vector<4x16x32xbf16>
    %c0_3 = arith.constant 0 : index
    %c0_4 = arith.constant 0 : index
    %c0_5 = arith.constant 0 : index
    %c0_6 = arith.constant 0 : index
    %2 = vector.load %arg3[%c0_3, %c0_4, %c0_5, %c0_6] : memref<1x4x16x32xbf16, #tpu.memory_space<vmem>>, vector<1x4x16x32xbf16>
    %3 = vector.shape_cast %2 : vector<1x4x16x32xbf16> to vector<4x16x32xbf16>
    %c0_7 = arith.constant 0 : index
    %c0_8 = arith.constant 0 : index
    %c0_9 = arith.constant 0 : index
    %c0_10 = arith.constant 0 : index
    %4 = vector.load %arg4[%c0_7, %c0_8, %c0_9, %c0_10] : memref<1x4x16x32xbf16, #tpu.memory_space<vmem>>, vector<1x4x16x32xbf16>
    %5 = vector.shape_cast %4 : vector<1x4x16x32xbf16> to vector<4x16x32xbf16>
    "tpu.trace_start"() <{level = 10 : i32, message = "hqd,hkd->hqk"}> : () -> ()
    %cst = arith.constant dense<0.000000e+00> : vector<4x16x16xf32>
    %6 = tpu.matmul %1, %3, %cst {dimension_numbers = #tpu.dot_dimension_numbers<[2], [2], [1], [1], [0, 0, 0, 1, 1, 1], [0], [0]>} : vector<4x16x32xbf16>, vector<4x16x32xbf16>, vector<4x16x16xf32> -> vector<4x16x16xf32>
    "tpu.trace_stop"() : () -> ()
    %c0_11 = arith.constant 0 : index
    %c0_12 = arith.constant 0 : index
    %c0_13 = arith.constant 0 : index
    %7 = vector.load %arg6[%c0_11, %c0_12, %c0_13] : memref<1x1x16xf32, #tpu.memory_space<vmem>>, vector<1x1x16xf32>
    %8 = vector.shape_cast %7 : vector<1x1x16xf32> to vector<1x16xf32>
    %cst_14 = arith.constant 0.000000e+00 : f32
    %9 = vector.broadcast %cst_14 : f32 to vector<1x16xf32>
    %10 = arith.cmpf oeq, %8, %9 : vector<1x16xf32>
    %cst_15 = arith.constant -1.000000e+09 : f32
    %cst_16 = arith.constant 0.000000e+00 : f32
    %11 = vector.broadcast %cst_15 : f32 to vector<1x16xf32>
    %12 = vector.broadcast %cst_16 : f32 to vector<1x16xf32>
    %13 = arith.select %10, %11, %12 : vector<1x16xi1>, vector<1x16xf32>
    %c0_17 = arith.constant 0 : index
    %c0_18 = arith.constant 0 : index
    %c0_19 = arith.constant 0 : index
    %14 = vector.load %arg5[%c0_17, %c0_18, %c0_19] : memref<1x16x1xf32, #tpu.memory_space<vmem>>, vector<1x16x1xf32>
    %15 = vector.shape_cast %14 : vector<1x16x1xf32> to vector<16x1xf32>
    %cst_20 = arith.constant 0.000000e+00 : f32
    %16 = vector.broadcast %cst_20 : f32 to vector<16x1xf32>
    %17 = arith.cmpf oeq, %15, %16 : vector<16x1xf32>
    %cst_21 = arith.constant -1.000000e+09 : f32
    %cst_22 = arith.constant 0.000000e+00 : f32
    %18 = vector.broadcast %cst_21 : f32 to vector<16x1xf32>
    %19 = vector.broadcast %cst_22 : f32 to vector<16x1xf32>
    %20 = arith.select %17, %18, %19 : vector<16x1xi1>, vector<16x1xf32>
    %21 = vector.broadcast %13 : vector<1x16xf32> to vector<16x16xf32>
    %22 = vector.broadcast %20 : vector<16x1xf32> to vector<16x16xf32>
    %23 = arith.addf %21, %22 : vector<16x16xf32>
    %c16_i32 = arith.constant 16 : i32
    %24 = arith.muli %arg1, %c16_i32 : i32
    %25 = tpu.iota {dimensions = array<i32: 0>} : vector<16x16xi32>
    %26 = vector.broadcast %24 : i32 to vector<16x16xi32>
    %27 = arith.addi %25, %26 : vector<16x16xi32>
    %28 = tpu.iota {dimensions = array<i32: 1>} : vector<16x16xi32>
    %29 = arith.cmpi sgt, %28, %27 : vector<16x16xi32>
    %cst_23 = arith.constant -1.000000e+09 : f32
    %cst_24 = arith.constant 0.000000e+00 : f32
    %30 = vector.broadcast %cst_23 : f32 to vector<16x16xf32>
    %31 = vector.broadcast %cst_24 : f32 to vector<16x16xf32>
    %32 = arith.select %29, %30, %31 : vector<16x16xi1>, vector<16x16xf32>
    %33 = arith.addf %23, %32 : vector<16x16xf32>
    %34 = vector.shape_cast %33 : vector<16x16xf32> to vector<1x16x16xf32>
    %35 = vector.broadcast %34 : vector<1x16x16xf32> to vector<4x16x16xf32>
    %36 = arith.addf %6, %35 : vector<4x16x16xf32>
    %cst_25 = arith.constant dense<0xFF800000> : vector<4x16xf32>
    %37 = vector.multi_reduction <maximumf>, %36, %cst_25 [2] : vector<4x16x16xf32> to vector<4x16xf32>
    %38 = vector.shape_cast %37 : vector<4x16xf32> to vector<4x16x1xf32>
    %39 = vector.broadcast %38 : vector<4x16x1xf32> to vector<4x16x16xf32>
    %40 = arith.subf %36, %39 : vector<4x16x16xf32>
    %41 = math.exp %40 : vector<4x16x16xf32>
    %cst_26 = arith.constant dense<0.000000e+00> : vector<4x16xf32>
    %42 = vector.multi_reduction <add>, %41, %cst_26 [2] : vector<4x16x16xf32> to vector<4x16xf32>
    %43 = vector.shape_cast %42 : vector<4x16xf32> to vector<4x16x1xf32>
    %44 = tpu.reciprocal %43 {approx = true} : vector<4x16x1xf32> -> vector<4x16x1xf32>
    %45 = vector.broadcast %44 : vector<4x16x1xf32> to vector<4x16x16xf32>
    %46 = arith.mulf %41, %45 : vector<4x16x16xf32>
    %47 = arith.truncf %46 : vector<4x16x16xf32> to vector<4x16x16xbf16>
    "tpu.trace_start"() <{level = 10 : i32, message = "hqk,hkd->hqd"}> : () -> ()
    %cst_27 = arith.constant dense<0.000000e+00> : vector<4x16x32xf32>
    %48 = tpu.matmul %47, %5, %cst_27 {dimension_numbers = #tpu.dot_dimension_numbers<[2], [1], [1], [2], [0, 0, 0, 1, 1, 2], [0], [0]>} : vector<4x16x16xbf16>, vector<4x16x32xbf16>, vector<4x16x32xf32> -> vector<4x16x32xf32>
    "tpu.trace_stop"() : () -> ()
    %49 = arith.truncf %48 : vector<4x16x32xf32> to vector<4x16x32xbf16>
    %50 = vector.extract_strided_slice %49 {offsets = [0, 0, 0], sizes = [1, 16, 32], strides = [1, 1, 1]} : vector<4x16x32xbf16> to vector<1x16x32xbf16>
    %51 = vector.shape_cast %50 : vector<1x16x32xbf16> to vector<16x32xbf16>
    %c0_28 = arith.constant 0 : index
    %c0_29 = arith.constant 0 : index
    %c0_30 = arith.constant 0 : index
    %52 = vector.load %arg8[%c0_28, %c0_29, %c0_30] : memref<4x32x128xbf16, #tpu.memory_space<vmem>>, vector<1x32x128xbf16>
    %53 = vector.shape_cast %52 : vector<1x32x128xbf16> to vector<32x128xbf16>
    %cst_31 = arith.constant dense<0.000000e+00> : vector<16x128xf32>
    %54 = tpu.matmul %51, %53, %cst_31 {dimension_numbers = #tpu.dot_dimension_numbers<[1], [0], [0], [1], [0, 0, 1, 1], [], []>} : vector<16x32xbf16>, vector<32x128xbf16>, vector<16x128xf32> -> vector<16x128xf32>
    %55 = vector.extract_strided_slice %49 {offsets = [1, 0, 0], sizes = [1, 16, 32], strides = [1, 1, 1]} : vector<4x16x32xbf16> to vector<1x16x32xbf16>
    %56 = vector.shape_cast %55 : vector<1x16x32xbf16> to vector<16x32xbf16>
    %c1 = arith.constant 1 : index
    %c0_32 = arith.constant 0 : index
    %c0_33 = arith.constant 0 : index
    %57 = vector.load %arg8[%c1, %c0_32, %c0_33] : memref<4x32x128xbf16, #tpu.memory_space<vmem>>, vector<1x32x128xbf16>
    %58 = vector.shape_cast %57 : vector<1x32x128xbf16> to vector<32x128xbf16>
    %cst_34 = arith.constant dense<0.000000e+00> : vector<16x128xf32>
    %59 = tpu.matmul %56, %58, %cst_34 {dimension_numbers = #tpu.dot_dimension_numbers<[1], [0], [0], [1], [0, 0, 1, 1], [], []>} : vector<16x32xbf16>, vector<32x128xbf16>, vector<16x128xf32> -> vector<16x128xf32>
    %60 = arith.addf %54, %59 : vector<16x128xf32>
    %61 = vector.extract_strided_slice %49 {offsets = [2, 0, 0], sizes = [1, 16, 32], strides = [1, 1, 1]} : vector<4x16x32xbf16> to vector<1x16x32xbf16>
    %62 = vector.shape_cast %61 : vector<1x16x32xbf16> to vector<16x32xbf16>
    %c2 = arith.constant 2 : index
    %c0_35 = arith.constant 0 : index
    %c0_36 = arith.constant 0 : index
    %63 = vector.load %arg8[%c2, %c0_35, %c0_36] : memref<4x32x128xbf16, #tpu.memory_space<vmem>>, vector<1x32x128xbf16>
    %64 = vector.shape_cast %63 : vector<1x32x128xbf16> to vector<32x128xbf16>
    %cst_37 = arith.constant dense<0.000000e+00> : vector<16x128xf32>
    %65 = tpu.matmul %62, %64, %cst_37 {dimension_numbers = #tpu.dot_dimension_numbers<[1], [0], [0], [1], [0, 0, 1, 1], [], []>} : vector<16x32xbf16>, vector<32x128xbf16>, vector<16x128xf32> -> vector<16x128xf32>
    %66 = arith.addf %60, %65 : vector<16x128xf32>
    %67 = vector.extract_strided_slice %49 {offsets = [3, 0, 0], sizes = [1, 16, 32], strides = [1, 1, 1]} : vector<4x16x32xbf16> to vector<1x16x32xbf16>
    %68 = vector.shape_cast %67 : vector<1x16x32xbf16> to vector<16x32xbf16>
    %c3 = arith.constant 3 : index
    %c0_38 = arith.constant 0 : index
    %c0_39 = arith.constant 0 : index
    %69 = vector.load %arg8[%c3, %c0_38, %c0_39] : memref<4x32x128xbf16, #tpu.memory_space<vmem>>, vector<1x32x128xbf16>
    %70 = vector.shape_cast %69 : vector<1x32x128xbf16> to vector<32x128xbf16>
    %cst_40 = arith.constant dense<0.000000e+00> : vector<16x128xf32>
    %71 = tpu.matmul %68, %70, %cst_40 {dimension_numbers = #tpu.dot_dimension_numbers<[1], [0], [0], [1], [0, 0, 1, 1], [], []>} : vector<16x32xbf16>, vector<32x128xbf16>, vector<16x128xf32> -> vector<16x128xf32>
    %72 = arith.addf %66, %71 : vector<16x128xf32>
    %c0_41 = arith.constant 0 : index
    %c0_42 = arith.constant 0 : index
    %73 = vector.load %arg9[%c0_41, %c0_42] : memref<1x128xf32, #tpu.memory_space<vmem>>, vector<1x128xf32>
    %74 = vector.broadcast %73 : vector<1x128xf32> to vector<16x128xf32>
    %75 = arith.addf %72, %74 : vector<16x128xf32>
    %c0_43 = arith.constant 0 : index
    %c0_44 = arith.constant 0 : index
    %c0_45 = arith.constant 0 : index
    %76 = vector.load %arg7[%c0_43, %c0_44, %c0_45] : memref<1x16x128xbf16, #tpu.memory_space<vmem>>, vector<1x16x128xbf16>
    %77 = vector.shape_cast %76 : vector<1x16x128xbf16> to vector<16x128xbf16>
    %78 = arith.extf %77 : vector<16x128xbf16> to vector<16x128xf32>
    %79 = arith.addf %78, %75 : vector<16x128xf32>
    %c0_46 = arith.constant 0 : index
    %c0_47 = arith.constant 0 : index
    %80 = vector.load %arg10[%c0_46, %c0_47] : memref<1x128xf32, #tpu.memory_space<vmem>>, vector<1x128xf32>
    %c0_48 = arith.constant 0 : index
    %c0_49 = arith.constant 0 : index
    %81 = vector.load %arg11[%c0_48, %c0_49] : memref<1x128xf32, #tpu.memory_space<vmem>>, vector<1x128xf32>
    %cst_50 = arith.constant dense<0.000000e+00> : vector<16xf32>
    %82 = vector.multi_reduction <add>, %79, %cst_50 [1] : vector<16x128xf32> to vector<16xf32>
    %83 = vector.shape_cast %82 : vector<16xf32> to vector<16x1xf32>
    %cst_51 = arith.constant 1.280000e+02 : f32
    %84 = vector.broadcast %cst_51 : f32 to vector<16x1xf32>
    %85 = arith.divf %83, %84 : vector<16x1xf32>
    %86 = vector.broadcast %85 : vector<16x1xf32> to vector<16x128xf32>
    %87 = arith.subf %79, %86 : vector<16x128xf32>
    %88 = arith.mulf %87, %87 : vector<16x128xf32>
    %cst_52 = arith.constant dense<0.000000e+00> : vector<16xf32>
    %89 = vector.multi_reduction <add>, %88, %cst_52 [1] : vector<16x128xf32> to vector<16xf32>
    %90 = vector.shape_cast %89 : vector<16xf32> to vector<16x1xf32>
    %cst_53 = arith.constant 1.280000e+02 : f32
    %91 = vector.broadcast %cst_53 : f32 to vector<16x1xf32>
    %92 = arith.divf %90, %91 : vector<16x1xf32>
    %93 = vector.broadcast %85 : vector<16x1xf32> to vector<16x128xf32>
    %94 = arith.subf %79, %93 : vector<16x128xf32>
    %cst_54 = arith.constant 9.99999974E-6 : f32
    %95 = vector.broadcast %cst_54 : f32 to vector<16x1xf32>
    %96 = arith.addf %92, %95 : vector<16x1xf32>
    %97 = math.rsqrt %96 : vector<16x1xf32>
    %98 = vector.broadcast %97 : vector<16x1xf32> to vector<16x128xf32>
    %99 = arith.mulf %94, %98 : vector<16x128xf32>
    %100 = vector.broadcast %80 : vector<1x128xf32> to vector<16x128xf32>
    %101 = arith.mulf %99, %100 : vector<16x128xf32>
    %102 = vector.broadcast %81 : vector<1x128xf32> to vector<16x128xf32>
    %103 = arith.addf %101, %102 : vector<16x128xf32>
    %104 = arith.truncf %103 : vector<16x128xf32> to vector<16x128xbf16>
    %c0_55 = arith.constant 0 : index
    %c0_56 = arith.constant 0 : index
    %c0_57 = arith.constant 0 : index
    %105 = vector.load %arg12[%c0_55, %c0_56, %c0_57] : memref<1x16x128xbf16, #tpu.memory_space<vmem>>, vector<1x16x128xbf16>
    %106 = vector.shape_cast %105 : vector<1x16x128xbf16> to vector<16x128xbf16>
    %107 = vector.shape_cast %104 : vector<16x128xbf16> to vector<1x16x128xbf16>
    tpu.vector_store %arg12[%c0_55, %c0_56, %c0_57], %107 {strides = array<i32>} : memref<1x16x128xbf16, #tpu.memory_space<vmem>>, vector<1x16x128xbf16>,
    return
  }
  func.func @transform_0(%arg0: i32, %arg1: i32) -> (i32, i32, i32, i32) {
    %c0_i32 = arith.constant 0 : i32
    %c0_i32_0 = arith.constant 0 : i32
    %c0_i32_1 = arith.constant 0 : i32
    return %arg0, %c0_i32, %arg1, %c0_i32_0 : i32, i32, i32, i32
  }
  func.func @transform_1(%arg0: i32, %arg1: i32) -> (i32, i32, i32, i32) {
    %c0_i32 = arith.constant 0 : i32
    %c0_i32_0 = arith.constant 0 : i32
    %c0_i32_1 = arith.constant 0 : i32
    %c0_i32_2 = arith.constant 0 : i32
    return %arg0, %c0_i32, %c0_i32_0, %c0_i32_1 : i32, i32, i32, i32
  }
  func.func @transform_2(%arg0: i32, %arg1: i32) -> (i32, i32, i32, i32) {
    %c0_i32 = arith.constant 0 : i32
    %c0_i32_0 = arith.constant 0 : i32
    %c0_i32_1 = arith.constant 0 : i32
    %c0_i32_2 = arith.constant 0 : i32
    return %arg0, %c0_i32, %c0_i32_0, %c0_i32_1 : i32, i32, i32, i32
  }
  func.func @transform_3(%arg0: i32, %arg1: i32) -> (i32, i32, i32) {
    %c0_i32 = arith.constant 0 : i32
    %c0_i32_0 = arith.constant 0 : i32
    return %arg0, %arg1, %c0_i32 : i32, i32, i32
  }
  func.func @transform_4(%arg0: i32, %arg1: i32) -> (i32, i32, i32) {
    %c0_i32 = arith.constant 0 : i32
    %c0_i32_0 = arith.constant 0 : i32
    %c0_i32_1 = arith.constant 0 : i32
    return %arg0, %c0_i32, %c0_i32_0 : i32, i32, i32
  }
  func.func @transform_5(%arg0: i32, %arg1: i32) -> (i32, i32, i32) {
    %c0_i32 = arith.constant 0 : i32
    %c0_i32_0 = arith.constant 0 : i32
    return %arg0, %arg1, %c0_i32 : i32, i32, i32
  }
  func.func @transform_6(%arg0: i32, %arg1: i32) -> (i32, i32, i32) {
    %c0_i32 = arith.constant 0 : i32
    %c0_i32_0 = arith.constant 0 : i32
    %c0_i32_1 = arith.constant 0 : i32
    %c0_i32_2 = arith.constant 0 : i32
    return %c0_i32, %c0_i32_0, %c0_i32_1 : i32, i32, i32
  }
  func.func @transform_7(%arg0: i32, %arg1: i32) -> (i32, i32) {
    %c0_i32 = arith.constant 0 : i32
    %c0_i32_0 = arith.constant 0 : i32
    %c0_i32_1 = arith.constant 0 : i32
    return %c0_i32, %c0_i32_0 : i32, i32
  }
  func.func @transform_8(%arg0: i32, %arg1: i32) -> (i32, i32) {
    %c0_i32 = arith.constant 0 : i32
    %c0_i32_0 = arith.constant 0 : i32
    %c0_i32_1 = arith.constant 0 : i32
    return %c0_i32, %c0_i32_0 : i32, i32
  }
  func.func @transform_9(%arg0: i32, %arg1: i32) -> (i32, i32) {
    %c0_i32 = arith.constant 0 : i32
    %c0_i32_0 = arith.constant 0 : i32
    %c0_i32_1 = arith.constant 0 : i32
    return %c0_i32, %c0_i32_0 : i32, i32
  }
  func.func @transform_10(%arg0: i32, %arg1: i32) -> (i32, i32, i32) {
    %c0_i32 = arith.constant 0 : i32
    %c0_i32_0 = arith.constant 0 : i32
    return %arg0, %arg1, %c0_i32 : i32, i32, i32
  }
}

module attributes {stable_mosaic.version = 11 : i64} {
  func.func @_attention_kernel(%arg0: i32, %arg1: i32, %arg2: memref<1x4x16x32xbf16, #tpu.memory_space<vmem>>, %arg3: memref<1x4x16x32xbf16, #tpu.memory_space<vmem>>, %arg4: memref<1x4x16x32xbf16, #tpu.memory_space<vmem>>, %arg5: memref<1x16x1xf32, #tpu.memory_space<vmem>>, %arg6: memref<1x1x16xf32, #tpu.memory_space<vmem>>, %arg7: memref<1x16x128xbf16, #tpu.memory_space<vmem>>, %arg8: memref<4x32x128xbf16, #tpu.memory_space<vmem>>, %arg9: memref<1x128xf32, #tpu.memory_space<vmem>>, %arg10: memref<1x128xf32, #tpu.memory_space<vmem>>, %arg11: memref<1x128xf32, #tpu.memory_space<vmem>>, %arg12: memref<1x16x128xbf16, #tpu.memory_space<vmem>>) attributes {dimension_semantics = [#tpu.dimension_semantics<parallel>, #tpu.dimension_semantics<parallel>], iteration_bounds = array<i64: 2, 1>, scalar_prefetch = 0 : i64, scratch_operands = 0 : i64, tpu.core_type = #tpu.core_type<tc>, window_params = [{transform_indices = @transform_0, window_bounds = array<i64: 1, 4, 16, 32>}, {transform_indices = @transform_1, window_bounds = array<i64: 1, 4, 16, 32>}, {transform_indices = @transform_2, window_bounds = array<i64: 1, 4, 16, 32>}, {transform_indices = @transform_3, window_bounds = array<i64: 1, 16, 1>}, {transform_indices = @transform_4, window_bounds = array<i64: 1, 1, 16>}, {transform_indices = @transform_5, window_bounds = array<i64: 1, 16, 128>}, {pipeline_mode = #tpu.pipeline_mode<synchronous>, transform_indices = @transform_6, window_bounds = array<i64: 4, 32, 128>}, {pipeline_mode = #tpu.pipeline_mode<synchronous>, transform_indices = @transform_7, window_bounds = array<i64: 1, 128>}, {pipeline_mode = #tpu.pipeline_mode<synchronous>, transform_indices = @transform_8, window_bounds = array<i64: 1, 128>}, {pipeline_mode = #tpu.pipeline_mode<synchronous>, transform_indices = @transform_9, window_bounds = array<i64: 1, 128>}, {transform_indices = @transform_10, window_bounds = array<i64: 1, 16, 128>}]} {
    %c0 = arith.constant 0 : index
    %c0_0 = arith.constant 0 : index
    %c0_1 = arith.constant 0 : index
    %c0_2 = arith.constant 0 : index
    %0 = vector.load %arg2[%c0, %c0_0, %c0_1, %c0_2] : memref<1x4x16x32xbf16, #tpu.memory_space<vmem>>, vector<1x4x16x32xbf16>
    %1 = vector.shape_cast %0 : vector<1x4x16x32xbf16> to vector<4x16x32xbf16>
    %c0_3 = arith.constant 0 : index
    %c0_4 = arith.constant 0 : index
    %c0_5 = arith.constant 0 : index
    %c0_6 = arith.constant 0 : index
    %2 = vector.load %arg3[%c0_3, %c0_4, %c0_5, %c0_6] : memref<1x4x16x32xbf16, #tpu.memory_space<vmem>>, vector<1x4x16x32xbf16>
    %3 = vector.shape_cast %2 : vector<1x4x16x32xbf16> to vector<4x16x32xbf16>
    %c0_7 = arith.constant 0 : index
    %c0_8 = arith.constant 0 : index
    %c0_9 = arith.constant 0 : index
    %c0_10 = arith.constant 0 : index
    %4 = vector.load %arg4[%c0_7, %c0_8, %c0_9, %c0_10] : memref<1x4x16x32xbf16, #tpu.memory_space<vmem>>, vector<1x4x16x32xbf16>
    %5 = vector.shape_cast %4 : vector<1x4x16x32xbf16> to vector<4x16x32xbf16>
    "tpu.trace_start"() <{level = 10 : i32, message = "hqd,hkd->hqk"}> : () -> ()
    %cst = arith.constant dense<0.000000e+00> : vector<4x16x16xf32>
    %6 = tpu.matmul %1, %3, %cst {dimension_numbers = #tpu.dot_dimension_numbers<[2], [2], [1], [1], [0, 0, 0, 1, 1, 1], [0], [0]>} : vector<4x16x32xbf16>, vector<4x16x32xbf16>, vector<4x16x16xf32> -> vector<4x16x16xf32>
    "tpu.trace_stop"() : () -> ()
    %c0_11 = arith.constant 0 : index
    %c0_12 = arith.constant 0 : index
    %c0_13 = arith.constant 0 : index
    %7 = vector.load %arg6[%c0_11, %c0_12, %c0_13] : memref<1x1x16xf32, #tpu.memory_space<vmem>>, vector<1x1x16xf32>
    %8 = vector.shape_cast %7 : vector<1x1x16xf32> to vector<1x16xf32>
    %cst_14 = arith.constant 0.000000e+00 : f32
    %9 = vector.broadcast %cst_14 : f32 to vector<1x16xf32>
    %10 = arith.cmpf oeq, %8, %9 : vector<1x16xf32>
    %cst_15 = arith.constant -1.000000e+09 : f32
    %cst_16 = arith.constant 0.000000e+00 : f32
    %11 = vector.broadcast %cst_15 : f32 to vector<1x16xf32>
    %12 = vector.broadcast %cst_16 : f32 to vector<1x16xf32>
    %13 = arith.select %10, %11, %12 : vector<1x16xi1>, vector<1x16xf32>
    %c0_17 = arith.constant 0 : index
    %c0_18 = arith.constant 0 : index
    %c0_19 = arith.constant 0 : index
    %14 = vector.load %arg5[%c0_17, %c0_18, %c0_19] : memref<1x16x1xf32, #tpu.memory_space<vmem>>, vector<1x16x1xf32>
    %15 = vector.shape_cast %14 : vector<1x16x1xf32> to vector<16x1xf32>
    %cst_20 = arith.constant 0.000000e+00 : f32
    %16 = vector.broadcast %cst_20 : f32 to vector<16x1xf32>
    %17 = arith.cmpf oeq, %15, %16 : vector<16x1xf32>
    %cst_21 = arith.constant -1.000000e+09 : f32
    %cst_22 = arith.constant 0.000000e+00 : f32
    %18 = vector.broadcast %cst_21 : f32 to vector<16x1xf32>
    %19 = vector.broadcast %cst_22 : f32 to vector<16x1xf32>
    %20 = arith.select %17, %18, %19 : vector<16x1xi1>, vector<16x1xf32>
    %21 = vector.broadcast %13 : vector<1x16xf32> to vector<16x16xf32>
    %22 = vector.broadcast %20 : vector<16x1xf32> to vector<16x16xf32>
    %23 = arith.addf %21, %22 : vector<16x16xf32>
    %24 = vector.shape_cast %23 : vector<16x16xf32> to vector<1x16x16xf32>
    %25 = vector.broadcast %24 : vector<1x16x16xf32> to vector<4x16x16xf32>
    %26 = arith.addf %6, %25 : vector<4x16x16xf32>
    %cst_23 = arith.constant dense<0xFF800000> : vector<4x16xf32>
    %27 = vector.multi_reduction <maximumf>, %26, %cst_23 [2] : vector<4x16x16xf32> to vector<4x16xf32>
    %28 = vector.shape_cast %27 : vector<4x16xf32> to vector<4x16x1xf32>
    %29 = vector.broadcast %28 : vector<4x16x1xf32> to vector<4x16x16xf32>
    %30 = arith.subf %26, %29 : vector<4x16x16xf32>
    %31 = math.exp %30 : vector<4x16x16xf32>
    %cst_24 = arith.constant dense<0.000000e+00> : vector<4x16xf32>
    %32 = vector.multi_reduction <add>, %31, %cst_24 [2] : vector<4x16x16xf32> to vector<4x16xf32>
    %33 = vector.shape_cast %32 : vector<4x16xf32> to vector<4x16x1xf32>
    %34 = tpu.reciprocal %33 {approx = true} : vector<4x16x1xf32> -> vector<4x16x1xf32>
    %35 = vector.broadcast %34 : vector<4x16x1xf32> to vector<4x16x16xf32>
    %36 = arith.mulf %31, %35 : vector<4x16x16xf32>
    %37 = arith.truncf %36 : vector<4x16x16xf32> to vector<4x16x16xbf16>
    "tpu.trace_start"() <{level = 10 : i32, message = "hqk,hkd->hqd"}> : () -> ()
    %cst_25 = arith.constant dense<0.000000e+00> : vector<4x16x32xf32>
    %38 = tpu.matmul %37, %5, %cst_25 {dimension_numbers = #tpu.dot_dimension_numbers<[2], [1], [1], [2], [0, 0, 0, 1, 1, 2], [0], [0]>} : vector<4x16x16xbf16>, vector<4x16x32xbf16>, vector<4x16x32xf32> -> vector<4x16x32xf32>
    "tpu.trace_stop"() : () -> ()
    %39 = arith.truncf %38 : vector<4x16x32xf32> to vector<4x16x32xbf16>
    %40 = vector.extract_strided_slice %39 {offsets = [0, 0, 0], sizes = [1, 16, 32], strides = [1, 1, 1]} : vector<4x16x32xbf16> to vector<1x16x32xbf16>
    %41 = vector.shape_cast %40 : vector<1x16x32xbf16> to vector<16x32xbf16>
    %c0_26 = arith.constant 0 : index
    %c0_27 = arith.constant 0 : index
    %c0_28 = arith.constant 0 : index
    %42 = vector.load %arg8[%c0_26, %c0_27, %c0_28] : memref<4x32x128xbf16, #tpu.memory_space<vmem>>, vector<1x32x128xbf16>
    %43 = vector.shape_cast %42 : vector<1x32x128xbf16> to vector<32x128xbf16>
    %cst_29 = arith.constant dense<0.000000e+00> : vector<16x128xf32>
    %44 = tpu.matmul %41, %43, %cst_29 {dimension_numbers = #tpu.dot_dimension_numbers<[1], [0], [0], [1], [0, 0, 1, 1], [], []>} : vector<16x32xbf16>, vector<32x128xbf16>, vector<16x128xf32> -> vector<16x128xf32>
    %45 = vector.extract_strided_slice %39 {offsets = [1, 0, 0], sizes = [1, 16, 32], strides = [1, 1, 1]} : vector<4x16x32xbf16> to vector<1x16x32xbf16>
    %46 = vector.shape_cast %45 : vector<1x16x32xbf16> to vector<16x32xbf16>
    %c1 = arith.constant 1 : index
    %c0_30 = arith.constant 0 : index
    %c0_31 = arith.constant 0 : index
    %47 = vector.load %arg8[%c1, %c0_30, %c0_31] : memref<4x32x128xbf16, #tpu.memory_space<vmem>>, vector<1x32x128xbf16>
    %48 = vector.shape_cast %47 : vector<1x32x128xbf16> to vector<32x128xbf16>
    %cst_32 = arith.constant dense<0.000000e+00> : vector<16x128xf32>
    %49 = tpu.matmul %46, %48, %cst_32 {dimension_numbers = #tpu.dot_dimension_numbers<[1], [0], [0], [1], [0, 0, 1, 1], [], []>} : vector<16x32xbf16>, vector<32x128xbf16>, vector<16x128xf32> -> vector<16x128xf32>
    %50 = arith.addf %44, %49 : vector<16x128xf32>
    %51 = vector.extract_strided_slice %39 {offsets = [2, 0, 0], sizes = [1, 16, 32], strides = [1, 1, 1]} : vector<4x16x32xbf16> to vector<1x16x32xbf16>
    %52 = vector.shape_cast %51 : vector<1x16x32xbf16> to vector<16x32xbf16>
    %c2 = arith.constant 2 : index
    %c0_33 = arith.constant 0 : index
    %c0_34 = arith.constant 0 : index
    %53 = vector.load %arg8[%c2, %c0_33, %c0_34] : memref<4x32x128xbf16, #tpu.memory_space<vmem>>, vector<1x32x128xbf16>
    %54 = vector.shape_cast %53 : vector<1x32x128xbf16> to vector<32x128xbf16>
    %cst_35 = arith.constant dense<0.000000e+00> : vector<16x128xf32>
    %55 = tpu.matmul %52, %54, %cst_35 {dimension_numbers = #tpu.dot_dimension_numbers<[1], [0], [0], [1], [0, 0, 1, 1], [], []>} : vector<16x32xbf16>, vector<32x128xbf16>, vector<16x128xf32> -> vector<16x128xf32>
    %56 = arith.addf %50, %55 : vector<16x128xf32>
    %57 = vector.extract_strided_slice %39 {offsets = [3, 0, 0], sizes = [1, 16, 32], strides = [1, 1, 1]} : vector<4x16x32xbf16> to vector<1x16x32xbf16>
    %58 = vector.shape_cast %57 : vector<1x16x32xbf16> to vector<16x32xbf16>
    %c3 = arith.constant 3 : index
    %c0_36 = arith.constant 0 : index
    %c0_37 = arith.constant 0 : index
    %59 = vector.load %arg8[%c3, %c0_36, %c0_37] : memref<4x32x128xbf16, #tpu.memory_space<vmem>>, vector<1x32x128xbf16>
    %60 = vector.shape_cast %59 : vector<1x32x128xbf16> to vector<32x128xbf16>
    %cst_38 = arith.constant dense<0.000000e+00> : vector<16x128xf32>
    %61 = tpu.matmul %58, %60, %cst_38 {dimension_numbers = #tpu.dot_dimension_numbers<[1], [0], [0], [1], [0, 0, 1, 1], [], []>} : vector<16x32xbf16>, vector<32x128xbf16>, vector<16x128xf32> -> vector<16x128xf32>
    %62 = arith.addf %56, %61 : vector<16x128xf32>
    %c0_39 = arith.constant 0 : index
    %c0_40 = arith.constant 0 : index
    %63 = vector.load %arg9[%c0_39, %c0_40] : memref<1x128xf32, #tpu.memory_space<vmem>>, vector<1x128xf32>
    %64 = vector.broadcast %63 : vector<1x128xf32> to vector<16x128xf32>
    %65 = arith.addf %62, %64 : vector<16x128xf32>
    %c0_41 = arith.constant 0 : index
    %c0_42 = arith.constant 0 : index
    %c0_43 = arith.constant 0 : index
    %66 = vector.load %arg7[%c0_41, %c0_42, %c0_43] : memref<1x16x128xbf16, #tpu.memory_space<vmem>>, vector<1x16x128xbf16>
    %67 = vector.shape_cast %66 : vector<1x16x128xbf16> to vector<16x128xbf16>
    %68 = arith.extf %67 : vector<16x128xbf16> to vector<16x128xf32>
    %69 = arith.addf %68, %65 : vector<16x128xf32>
    %c0_44 = arith.constant 0 : index
    %c0_45 = arith.constant 0 : index
    %70 = vector.load %arg10[%c0_44, %c0_45] : memref<1x128xf32, #tpu.memory_space<vmem>>, vector<1x128xf32>
    %c0_46 = arith.constant 0 : index
    %c0_47 = arith.constant 0 : index
    %71 = vector.load %arg11[%c0_46, %c0_47] : memref<1x128xf32, #tpu.memory_space<vmem>>, vector<1x128xf32>
    %cst_48 = arith.constant dense<0.000000e+00> : vector<16xf32>
    %72 = vector.multi_reduction <add>, %69, %cst_48 [1] : vector<16x128xf32> to vector<16xf32>
    %73 = vector.shape_cast %72 : vector<16xf32> to vector<16x1xf32>
    %cst_49 = arith.constant 1.280000e+02 : f32
    %74 = vector.broadcast %cst_49 : f32 to vector<16x1xf32>
    %75 = arith.divf %73, %74 : vector<16x1xf32>
    %76 = vector.broadcast %75 : vector<16x1xf32> to vector<16x128xf32>
    %77 = arith.subf %69, %76 : vector<16x128xf32>
    %78 = arith.mulf %77, %77 : vector<16x128xf32>
    %cst_50 = arith.constant dense<0.000000e+00> : vector<16xf32>
    %79 = vector.multi_reduction <add>, %78, %cst_50 [1] : vector<16x128xf32> to vector<16xf32>
    %80 = vector.shape_cast %79 : vector<16xf32> to vector<16x1xf32>
    %cst_51 = arith.constant 1.280000e+02 : f32
    %81 = vector.broadcast %cst_51 : f32 to vector<16x1xf32>
    %82 = arith.divf %80, %81 : vector<16x1xf32>
    %83 = vector.broadcast %75 : vector<16x1xf32> to vector<16x128xf32>
    %84 = arith.subf %69, %83 : vector<16x128xf32>
    %cst_52 = arith.constant 9.99999974E-6 : f32
    %85 = vector.broadcast %cst_52 : f32 to vector<16x1xf32>
    %86 = arith.addf %82, %85 : vector<16x1xf32>
    %87 = math.rsqrt %86 : vector<16x1xf32>
    %88 = vector.broadcast %87 : vector<16x1xf32> to vector<16x128xf32>
    %89 = arith.mulf %84, %88 : vector<16x128xf32>
    %90 = vector.broadcast %70 : vector<1x128xf32> to vector<16x128xf32>
    %91 = arith.mulf %89, %90 : vector<16x128xf32>
    %92 = vector.broadcast %71 : vector<1x128xf32> to vector<16x128xf32>
    %93 = arith.addf %91, %92 : vector<16x128xf32>
    %94 = arith.truncf %93 : vector<16x128xf32> to vector<16x128xbf16>
    %c0_53 = arith.constant 0 : index
    %c0_54 = arith.constant 0 : index
    %c0_55 = arith.constant 0 : index
    %95 = vector.load %arg12[%c0_53, %c0_54, %c0_55] : memref<1x16x128xbf16, #tpu.memory_space<vmem>>, vector<1x16x128xbf16>
    %96 = vector.shape_cast %95 : vector<1x16x128xbf16> to vector<16x128xbf16>
    %97 = vector.shape_cast %94 : vector<16x128xbf16> to vector<1x16x128xbf16>
    tpu.vector_store %arg12[%c0_53, %c0_54, %c0_55], %97 {strides = array<i32>} : memref<1x16x128xbf16, #tpu.memory_space<vmem>>, vector<1x16x128xbf16>,
    return
  }
  func.func @transform_0(%arg0: i32, %arg1: i32) -> (i32, i32, i32, i32) {
    %c0_i32 = arith.constant 0 : i32
    %c0_i32_0 = arith.constant 0 : i32
    %c0_i32_1 = arith.constant 0 : i32
    return %arg0, %c0_i32, %arg1, %c0_i32_0 : i32, i32, i32, i32
  }
  func.func @transform_1(%arg0: i32, %arg1: i32) -> (i32, i32, i32, i32) {
    %c0_i32 = arith.constant 0 : i32
    %c0_i32_0 = arith.constant 0 : i32
    %c0_i32_1 = arith.constant 0 : i32
    %c0_i32_2 = arith.constant 0 : i32
    return %arg0, %c0_i32, %c0_i32_0, %c0_i32_1 : i32, i32, i32, i32
  }
  func.func @transform_2(%arg0: i32, %arg1: i32) -> (i32, i32, i32, i32) {
    %c0_i32 = arith.constant 0 : i32
    %c0_i32_0 = arith.constant 0 : i32
    %c0_i32_1 = arith.constant 0 : i32
    %c0_i32_2 = arith.constant 0 : i32
    return %arg0, %c0_i32, %c0_i32_0, %c0_i32_1 : i32, i32, i32, i32
  }
  func.func @transform_3(%arg0: i32, %arg1: i32) -> (i32, i32, i32) {
    %c0_i32 = arith.constant 0 : i32
    %c0_i32_0 = arith.constant 0 : i32
    return %arg0, %arg1, %c0_i32 : i32, i32, i32
  }
  func.func @transform_4(%arg0: i32, %arg1: i32) -> (i32, i32, i32) {
    %c0_i32 = arith.constant 0 : i32
    %c0_i32_0 = arith.constant 0 : i32
    %c0_i32_1 = arith.constant 0 : i32
    return %arg0, %c0_i32, %c0_i32_0 : i32, i32, i32
  }
  func.func @transform_5(%arg0: i32, %arg1: i32) -> (i32, i32, i32) {
    %c0_i32 = arith.constant 0 : i32
    %c0_i32_0 = arith.constant 0 : i32
    return %arg0, %arg1, %c0_i32 : i32, i32, i32
  }
  func.func @transform_6(%arg0: i32, %arg1: i32) -> (i32, i32, i32) {
    %c0_i32 = arith.constant 0 : i32
    %c0_i32_0 = arith.constant 0 : i32
    %c0_i32_1 = arith.constant 0 : i32
    %c0_i32_2 = arith.constant 0 : i32
    return %c0_i32, %c0_i32_0, %c0_i32_1 : i32, i32, i32
  }
  func.func @transform_7(%arg0: i32, %arg1: i32) -> (i32, i32) {
    %c0_i32 = arith.constant 0 : i32
    %c0_i32_0 = arith.constant 0 : i32
    %c0_i32_1 = arith.constant 0 : i32
    return %c0_i32, %c0_i32_0 : i32, i32
  }
  func.func @transform_8(%arg0: i32, %arg1: i32) -> (i32, i32) {
    %c0_i32 = arith.constant 0 : i32
    %c0_i32_0 = arith.constant 0 : i32
    %c0_i32_1 = arith.constant 0 : i32
    return %c0_i32, %c0_i32_0 : i32, i32
  }
  func.func @transform_9(%arg0: i32, %arg1: i32) -> (i32, i32) {
    %c0_i32 = arith.constant 0 : i32
    %c0_i32_0 = arith.constant 0 : i32
    %c0_i32_1 = arith.constant 0 : i32
    return %c0_i32, %c0_i32_0 : i32, i32
  }
  func.func @transform_10(%arg0: i32, %arg1: i32) -> (i32, i32, i32) {
    %c0_i32 = arith.constant 0 : i32
    %c0_i32_0 = arith.constant 0 : i32
    return %arg0, %arg1, %c0_i32 : i32, i32, i32
  }
}

module attributes {stable_mosaic.version = 11 : i64} {
  func.func @_ffn_kernel(%arg0: i32, %arg1: memref<16x128xbf16, #tpu.memory_space<vmem>>, %arg2: memref<128x256xbf16, #tpu.memory_space<vmem>>, %arg3: memref<1x256xf32, #tpu.memory_space<vmem>>, %arg4: memref<256x128xbf16, #tpu.memory_space<vmem>>, %arg5: memref<1x128xf32, #tpu.memory_space<vmem>>, %arg6: memref<1x128xf32, #tpu.memory_space<vmem>>, %arg7: memref<1x128xf32, #tpu.memory_space<vmem>>, %arg8: memref<16x128xbf16, #tpu.memory_space<vmem>>) attributes {dimension_semantics = [#tpu.dimension_semantics<parallel>], iteration_bounds = array<i64: 2>, scalar_prefetch = 0 : i64, scratch_operands = 0 : i64, tpu.core_type = #tpu.core_type<tc>, window_params = [{transform_indices = @transform_0, window_bounds = array<i64: 16, 128>}, {pipeline_mode = #tpu.pipeline_mode<synchronous>, transform_indices = @transform_1, window_bounds = array<i64: 128, 256>}, {pipeline_mode = #tpu.pipeline_mode<synchronous>, transform_indices = @transform_2, window_bounds = array<i64: 1, 256>}, {pipeline_mode = #tpu.pipeline_mode<synchronous>, transform_indices = @transform_3, window_bounds = array<i64: 256, 128>}, {pipeline_mode = #tpu.pipeline_mode<synchronous>, transform_indices = @transform_4, window_bounds = array<i64: 1, 128>}, {pipeline_mode = #tpu.pipeline_mode<synchronous>, transform_indices = @transform_5, window_bounds = array<i64: 1, 128>}, {pipeline_mode = #tpu.pipeline_mode<synchronous>, transform_indices = @transform_6, window_bounds = array<i64: 1, 128>}, {transform_indices = @transform_7, window_bounds = array<i64: 16, 128>}]} {
    %c0 = arith.constant 0 : index
    %c0_0 = arith.constant 0 : index
    %0 = vector.load %arg1[%c0, %c0_0] : memref<16x128xbf16, #tpu.memory_space<vmem>>, vector<16x128xbf16>
    %c0_1 = arith.constant 0 : index
    %c0_2 = arith.constant 0 : index
    %1 = vector.load %arg2[%c0_1, %c0_2] : memref<128x256xbf16, #tpu.memory_space<vmem>>, vector<128x256xbf16>
    %cst = arith.constant dense<0.000000e+00> : vector<16x256xf32>
    %2 = tpu.matmul %0, %1, %cst {dimension_numbers = #tpu.dot_dimension_numbers<[1], [0], [0], [1], [0, 0, 1, 1], [], []>} : vector<16x128xbf16>, vector<128x256xbf16>, vector<16x256xf32> -> vector<16x256xf32>
    %c0_3 = arith.constant 0 : index
    %c0_4 = arith.constant 0 : index
    %3 = vector.load %arg3[%c0_3, %c0_4] : memref<1x256xf32, #tpu.memory_space<vmem>>, vector<1x256xf32>
    %4 = vector.broadcast %3 : vector<1x256xf32> to vector<16x256xf32>
    %5 = arith.addf %2, %4 : vector<16x256xf32>
    %cst_5 = arith.constant 0.000000e+00 : f32
    %6 = vector.broadcast %cst_5 : f32 to vector<16x256xf32>
    %7 = arith.maximumf %5, %6 : vector<16x256xf32>
    %8 = arith.truncf %7 : vector<16x256xf32> to vector<16x256xbf16>
    %c0_6 = arith.constant 0 : index
    %c0_7 = arith.constant 0 : index
    %9 = vector.load %arg4[%c0_6, %c0_7] : memref<256x128xbf16, #tpu.memory_space<vmem>>, vector<256x128xbf16>
    %cst_8 = arith.constant dense<0.000000e+00> : vector<16x128xf32>
    %10 = tpu.matmul %8, %9, %cst_8 {dimension_numbers = #tpu.dot_dimension_numbers<[1], [0], [0], [1], [0, 0, 1, 1], [], []>} : vector<16x256xbf16>, vector<256x128xbf16>, vector<16x128xf32> -> vector<16x128xf32>
    %c0_9 = arith.constant 0 : index
    %c0_10 = arith.constant 0 : index
    %11 = vector.load %arg5[%c0_9, %c0_10] : memref<1x128xf32, #tpu.memory_space<vmem>>, vector<1x128xf32>
    %12 = vector.broadcast %11 : vector<1x128xf32> to vector<16x128xf32>
    %13 = arith.addf %10, %12 : vector<16x128xf32>
    %14 = arith.extf %0 : vector<16x128xbf16> to vector<16x128xf32>
    %15 = arith.addf %14, %13 : vector<16x128xf32>
    %c0_11 = arith.constant 0 : index
    %c0_12 = arith.constant 0 : index
    %16 = vector.load %arg6[%c0_11, %c0_12] : memref<1x128xf32, #tpu.memory_space<vmem>>, vector<1x128xf32>
    %c0_13 = arith.constant 0 : index
    %c0_14 = arith.constant 0 : index
    %17 = vector.load %arg7[%c0_13, %c0_14] : memref<1x128xf32, #tpu.memory_space<vmem>>, vector<1x128xf32>
    %cst_15 = arith.constant dense<0.000000e+00> : vector<16xf32>
    %18 = vector.multi_reduction <add>, %15, %cst_15 [1] : vector<16x128xf32> to vector<16xf32>
    %19 = vector.shape_cast %18 : vector<16xf32> to vector<16x1xf32>
    %cst_16 = arith.constant 1.280000e+02 : f32
    %20 = vector.broadcast %cst_16 : f32 to vector<16x1xf32>
    %21 = arith.divf %19, %20 : vector<16x1xf32>
    %22 = vector.broadcast %21 : vector<16x1xf32> to vector<16x128xf32>
    %23 = arith.subf %15, %22 : vector<16x128xf32>
    %24 = arith.mulf %23, %23 : vector<16x128xf32>
    %cst_17 = arith.constant dense<0.000000e+00> : vector<16xf32>
    %25 = vector.multi_reduction <add>, %24, %cst_17 [1] : vector<16x128xf32> to vector<16xf32>
    %26 = vector.shape_cast %25 : vector<16xf32> to vector<16x1xf32>
    %cst_18 = arith.constant 1.280000e+02 : f32
    %27 = vector.broadcast %cst_18 : f32 to vector<16x1xf32>
    %28 = arith.divf %26, %27 : vector<16x1xf32>
    %29 = vector.broadcast %21 : vector<16x1xf32> to vector<16x128xf32>
    %30 = arith.subf %15, %29 : vector<16x128xf32>
    %cst_19 = arith.constant 9.99999974E-6 : f32
    %31 = vector.broadcast %cst_19 : f32 to vector<16x1xf32>
    %32 = arith.addf %28, %31 : vector<16x1xf32>
    %33 = math.rsqrt %32 : vector<16x1xf32>
    %34 = vector.broadcast %33 : vector<16x1xf32> to vector<16x128xf32>
    %35 = arith.mulf %30, %34 : vector<16x128xf32>
    %36 = vector.broadcast %16 : vector<1x128xf32> to vector<16x128xf32>
    %37 = arith.mulf %35, %36 : vector<16x128xf32>
    %38 = vector.broadcast %17 : vector<1x128xf32> to vector<16x128xf32>
    %39 = arith.addf %37, %38 : vector<16x128xf32>
    %40 = arith.truncf %39 : vector<16x128xf32> to vector<16x128xbf16>
    %c0_20 = arith.constant 0 : index
    %c0_21 = arith.constant 0 : index
    %41 = vector.load %arg8[%c0_20, %c0_21] : memref<16x128xbf16, #tpu.memory_space<vmem>>, vector<16x128xbf16>
    tpu.vector_store %arg8[%c0_20, %c0_21], %40 {strides = array<i32>} : memref<16x128xbf16, #tpu.memory_space<vmem>>, vector<16x128xbf16>,
    return
  }
  func.func @transform_0(%arg0: i32) -> (i32, i32) {
    %c0_i32 = arith.constant 0 : i32
    %c0_i32_0 = arith.constant 0 : i32
    return %arg0, %c0_i32 : i32, i32
  }
  func.func @transform_1(%arg0: i32) -> (i32, i32) {
    %c0_i32 = arith.constant 0 : i32
    %c0_i32_0 = arith.constant 0 : i32
    %c0_i32_1 = arith.constant 0 : i32
    return %c0_i32, %c0_i32_0 : i32, i32
  }
  func.func @transform_2(%arg0: i32) -> (i32, i32) {
    %c0_i32 = arith.constant 0 : i32
    %c0_i32_0 = arith.constant 0 : i32
    %c0_i32_1 = arith.constant 0 : i32
    return %c0_i32, %c0_i32_0 : i32, i32
  }
  func.func @transform_3(%arg0: i32) -> (i32, i32) {
    %c0_i32 = arith.constant 0 : i32
    %c0_i32_0 = arith.constant 0 : i32
    %c0_i32_1 = arith.constant 0 : i32
    return %c0_i32, %c0_i32_0 : i32, i32
  }
  func.func @transform_4(%arg0: i32) -> (i32, i32) {
    %c0_i32 = arith.constant 0 : i32
    %c0_i32_0 = arith.constant 0 : i32
    %c0_i32_1 = arith.constant 0 : i32
    return %c0_i32, %c0_i32_0 : i32, i32
  }
  func.func @transform_5(%arg0: i32) -> (i32, i32) {
    %c0_i32 = arith.constant 0 : i32
    %c0_i32_0 = arith.constant 0 : i32
    %c0_i32_1 = arith.constant 0 : i32
    return %c0_i32, %c0_i32_0 : i32, i32
  }
  func.func @transform_6(%arg0: i32) -> (i32, i32) {
    %c0_i32 = arith.constant 0 : i32
    %c0_i32_0 = arith.constant 0 : i32
    %c0_i32_1 = arith.constant 0 : i32
    return %c0_i32, %c0_i32_0 : i32, i32
  }
  func.func @transform_7(%arg0: i32) -> (i32, i32) {
    %c0_i32 = arith.constant 0 : i32
    %c0_i32_0 = arith.constant 0 : i32
    return %arg0, %c0_i32 : i32, i32
  }
}

module attributes {stable_mosaic.version = 11 : i64} {
  func.func @_linear_kernel(%arg0: i32, %arg1: i32, %arg2: memref<16x128xbf16, #tpu.memory_space<vmem>>, %arg3: memref<128x256xbf16, #tpu.memory_space<vmem>>, %arg4: memref<1x256xf32, #tpu.memory_space<vmem>>, %arg5: memref<16x256xbf16, #tpu.memory_space<vmem>>) attributes {dimension_semantics = [#tpu.dimension_semantics<parallel>, #tpu.dimension_semantics<parallel>], iteration_bounds = array<i64: 2, 1>, scalar_prefetch = 0 : i64, scratch_operands = 0 : i64, tpu.core_type = #tpu.core_type<tc>, window_params = [{transform_indices = @transform_0, window_bounds = array<i64: 16, 128>}, {transform_indices = @transform_1, window_bounds = array<i64: 128, 256>}, {transform_indices = @transform_2, window_bounds = array<i64: 1, 256>}, {transform_indices = @transform_3, window_bounds = array<i64: 16, 256>}]} {
    %c0 = arith.constant 0 : index
    %c0_0 = arith.constant 0 : index
    %0 = vector.load %arg2[%c0, %c0_0] : memref<16x128xbf16, #tpu.memory_space<vmem>>, vector<16x128xbf16>
    %c0_1 = arith.constant 0 : index
    %c0_2 = arith.constant 0 : index
    %1 = vector.load %arg3[%c0_1, %c0_2] : memref<128x256xbf16, #tpu.memory_space<vmem>>, vector<128x256xbf16>
    %cst = arith.constant dense<0.000000e+00> : vector<16x256xf32>
    %2 = tpu.matmul %0, %1, %cst {dimension_numbers = #tpu.dot_dimension_numbers<[1], [0], [0], [1], [0, 0, 1, 1], [], []>} : vector<16x128xbf16>, vector<128x256xbf16>, vector<16x256xf32> -> vector<16x256xf32>
    %c0_3 = arith.constant 0 : index
    %c0_4 = arith.constant 0 : index
    %3 = vector.load %arg4[%c0_3, %c0_4] : memref<1x256xf32, #tpu.memory_space<vmem>>, vector<1x256xf32>
    %4 = vector.broadcast %3 : vector<1x256xf32> to vector<16x256xf32>
    %5 = arith.addf %2, %4 : vector<16x256xf32>
    %6 = arith.truncf %5 : vector<16x256xf32> to vector<16x256xbf16>
    %c0_5 = arith.constant 0 : index
    %c0_6 = arith.constant 0 : index
    %7 = vector.load %arg5[%c0_5, %c0_6] : memref<16x256xbf16, #tpu.memory_space<vmem>>, vector<16x256xbf16>
    tpu.vector_store %arg5[%c0_5, %c0_6], %6 {strides = array<i32>} : memref<16x256xbf16, #tpu.memory_space<vmem>>, vector<16x256xbf16>,
    return
  }
  func.func @transform_0(%arg0: i32, %arg1: i32) -> (i32, i32) {
    %c0_i32 = arith.constant 0 : i32
    %c0_i32_0 = arith.constant 0 : i32
    return %arg0, %c0_i32 : i32, i32
  }
  func.func @transform_1(%arg0: i32, %arg1: i32) -> (i32, i32) {
    %c0_i32 = arith.constant 0 : i32
    %c0_i32_0 = arith.constant 0 : i32
    return %c0_i32, %arg1 : i32, i32
  }
  func.func @transform_2(%arg0: i32, %arg1: i32) -> (i32, i32) {
    %c0_i32 = arith.constant 0 : i32
    %c0_i32_0 = arith.constant 0 : i32
    return %c0_i32, %arg1 : i32, i32
  }
  func.func @transform_3(%arg0: i32, %arg1: i32) -> (i32, i32) {
    %c0_i32 = arith.constant 0 : i32
    return %arg0, %arg1 : i32, i32
  }
}

module attributes {stable_mosaic.version = 11 : i64} {
  func.func @_linear_kernel(%arg0: i32, %arg1: i32, %arg2: memref<16x128xbf16, #tpu.memory_space<vmem>>, %arg3: memref<128x128xbf16, #tpu.memory_space<vmem>>, %arg4: memref<1x128xf32, #tpu.memory_space<vmem>>, %arg5: memref<16x128xf32, #tpu.memory_space<vmem>>) attributes {dimension_semantics = [#tpu.dimension_semantics<parallel>, #tpu.dimension_semantics<parallel>], iteration_bounds = array<i64: 2, 1>, scalar_prefetch = 0 : i64, scratch_operands = 0 : i64, tpu.core_type = #tpu.core_type<tc>, window_params = [{transform_indices = @transform_0, window_bounds = array<i64: 16, 128>}, {transform_indices = @transform_1, window_bounds = array<i64: 128, 128>}, {transform_indices = @transform_2, window_bounds = array<i64: 1, 128>}, {transform_indices = @transform_3, window_bounds = array<i64: 16, 128>}]} {
    %c0 = arith.constant 0 : index
    %c0_0 = arith.constant 0 : index
    %0 = vector.load %arg2[%c0, %c0_0] : memref<16x128xbf16, #tpu.memory_space<vmem>>, vector<16x128xbf16>
    %c0_1 = arith.constant 0 : index
    %c0_2 = arith.constant 0 : index
    %1 = vector.load %arg3[%c0_1, %c0_2] : memref<128x128xbf16, #tpu.memory_space<vmem>>, vector<128x128xbf16>
    %cst = arith.constant dense<0.000000e+00> : vector<16x128xf32>
    %2 = tpu.matmul %0, %1, %cst {dimension_numbers = #tpu.dot_dimension_numbers<[1], [0], [0], [1], [0, 0, 1, 1], [], []>} : vector<16x128xbf16>, vector<128x128xbf16>, vector<16x128xf32> -> vector<16x128xf32>
    %c0_3 = arith.constant 0 : index
    %c0_4 = arith.constant 0 : index
    %3 = vector.load %arg4[%c0_3, %c0_4] : memref<1x128xf32, #tpu.memory_space<vmem>>, vector<1x128xf32>
    %4 = vector.broadcast %3 : vector<1x128xf32> to vector<16x128xf32>
    %5 = arith.addf %2, %4 : vector<16x128xf32>
    %c0_5 = arith.constant 0 : index
    %c0_6 = arith.constant 0 : index
    %6 = vector.load %arg5[%c0_5, %c0_6] : memref<16x128xf32, #tpu.memory_space<vmem>>, vector<16x128xf32>
    tpu.vector_store %arg5[%c0_5, %c0_6], %5 {strides = array<i32>} : memref<16x128xf32, #tpu.memory_space<vmem>>, vector<16x128xf32>,
    return
  }
  func.func @transform_0(%arg0: i32, %arg1: i32) -> (i32, i32) {
    %c0_i32 = arith.constant 0 : i32
    %c0_i32_0 = arith.constant 0 : i32
    return %arg0, %c0_i32 : i32, i32
  }
  func.func @transform_1(%arg0: i32, %arg1: i32) -> (i32, i32) {
    %c0_i32 = arith.constant 0 : i32
    %c0_i32_0 = arith.constant 0 : i32
    return %c0_i32, %arg1 : i32, i32
  }
  func.func @transform_2(%arg0: i32, %arg1: i32) -> (i32, i32) {
    %c0_i32 = arith.constant 0 : i32
    %c0_i32_0 = arith.constant 0 : i32
    return %c0_i32, %arg1 : i32, i32
  }
  func.func @transform_3(%arg0: i32, %arg1: i32) -> (i32, i32) {
    %c0_i32 = arith.constant 0 : i32
    return %arg0, %arg1 : i32, i32
  }
}

</mosaic_0001>

<bundles_post_ra>
// kernel: transformer_forward.27
= control target key start
LH: loop header
LB: loop body
LE: loop exit
PB: predicated region body
PF: predicated region fallthrough
CT: control target
= control target key end

     0   :  { %s553_s12 = smov 0   ;;  %s555_s13 = smov 0   ;;  %s613_s0 = inlined_call_operand.vmem [shape: bf16[32,128], index: 0, kind: input, shape index: {}]   ;;  %s614_s1 = inlined_call_operand.vmem [shape: bf16[128,128], index: 1, kind: input, shape index: {}]   ;;  %s615_s2 = inlined_call_operand.vmem [shape: f32[1,128], index: 2, kind: input, shape index: {}]   ;;  %s616_s3 = inlined_call_operand.vmem [shape: bf16[32,128], index: 3, kind: output, shape index: {}]  }
   0x1   :  { %s557_s14 = smov 0  }
   0x2 LB: > { %s25_s15 = sadd.s32 1, %s527_s13  ;;  %p427_p0 = scmp.ge.s32.totalorder %s531_s14, 1  ;;  %s531_s14 = sphi %s557_s14, %s13_s14   ;;  %s527_s13 = sphi %s555_s13, %s618_s13   ;;  %s523_s12 = sphi %s553_s12, %s617_s12  }
   0x3   : > { %p27_p1 = scmp.ge.s32.totalorder %s25_s15, 2  ;;  %p169_p2 = scmp.lt.s32.totalorder %s531_s14, 3 }
   0x5   : > { %s620_s15 = smov (%p27_p1, %s25_s15), 0  ;;  %p170_p3 = pnand %p427_p0, %p169_p2 }
   0x6   : > { %s428_s24 = sshll.u32 (!%p170_p3), %s523_s12, 1 }
   0x7   : > { %173 = sbr.rel (%p170_p3) target bundleno = 183 (0xb7), region = 32  ;;  %p204_p4 = scmp.lt.s32.totalorder (!%p170_p3), %s428_s24, 3 }
   0xc   : > { %v478_v0 = vld [vmem:[%s614_s1 + $0x38] sm:$0xff]  ;;  %v477_v1 = vld [vmem:[%s614_s1 + $0x30] sm:$0xff]  ;;  %v476_v2 = vld [vmem:[%s614_s1 + $0x28] sm:$0xff]  ;;  %s622_s24 = smov (!%p204_p4, %s428_s24), 3 }
   0xd   : > { %301 = vmatpush.bf16.msra.mxu0 %v478_v0  ;;  %v475_v3 = vld [vmem:[%s614_s1 + $0x20] sm:$0xff]  ;;  %v474_v4 = vld [vmem:[%s614_s1 + $0x18] sm:$0xff]  ;;  %v473_v5 = vld [vmem:[%s614_s1 + $0x10] sm:$0xff]  ;;  %s429_s4 = sshll.u32 %s622_s24, 2 }
   0xe   : > { %v472_v6 = vld [vmem:[%s614_s1 + $0x8] sm:$0xff]  ;;  %v471_v7 = vld [vmem:[%s614_s1] sm:$0xff]  ;;  %s207_s9 = scalar_lea.vmem %s613_s0, %s429_s4  ;;  %s223_s17 = scalar_lea.vmem %s616_s3, %s429_s4 }
   0xf   : > { %v470_v8 = vld [vmem:[%s207_s9] sm:$0xff] }
  0x10   : > { %v508_v10 = vld [vmem:[%s615_s2] ss:$0 sm:$0xff] }
  0x11   : > { %302 = vmatpush.bf16.msra.mxu0 %v477_v1 }
  0x15   : > { %303 = vmatpush.bf16.msra.mxu0 %v476_v2 }
  0x19   : > { %304 = vmatpush.bf16.msra.mxu0 %v475_v3 }
  0x1d   : > { %305 = vmatpush.bf16.msra.mxu0 %v474_v4 }
  0x21   : > { %306 = vmatpush.bf16.msra.mxu0 %v473_v5 }
  0x25   : > { %307 = vmatpush.bf16.msra.mxu0 %v472_v6 }
  0x29   : > { %308 = vmatpush.bf16.msra.mxu0 %v471_v7 }
  0x2c   : > { %309 = vmatmul.bf16.vlgmr.msra.gmra.mxu0 %v470_v8 }
  0xa9   : > { %v310_v9 = vpop.f32.mrf.mxu0 }
  0xaa   : > { %v311_v12 = vadd.f32 %v508_v10, %v310_v9 }
  0xb1   : > { %v312_v11 = vpop.f32.mrf.mxu0 }
  0xb2   : > { %v313_v13 = vadd.f32 %v508_v10, %v312_v11 }
  0xb4   : > { %v482_v14 = vpack.c.bf16 %v313_v13, %v311_v12 }
  0xb6   : > { %483 = vst [vmem:[%s223_s17] sm:$0xff] %v482_v14  }
  0xb7 PF: > { %s13_s14 = sadd.s32 1, %s531_s14   ;;  %s617_s12 = smov %s527_s13 }
  0xb8   : > { %p10_p5 = scmp.ge.s32.totalorder %s13_s14, 4   ;;  %s618_s13 = smov %s620_s15 }
  0xba   :  { %12 = sbr.rel (!%p10_p5) target bundleno = 2 (0x2), region = 68 }

// kernel: transformer_forward.25
= control target key start
LH: loop header
LB: loop body
LE: loop exit
PB: predicated region body
PF: predicated region fallthrough
CT: control target
= control target key end

     0   :  { %s784_s12 = smov 0   ;;  %s786_s13 = smov 0   ;;  %s971_s0 = inlined_call_operand.vmem [shape: bf16[32,128], index: 0, kind: input, shape index: {}]   ;;  %s972_s1 = inlined_call_operand.vmem [shape: bf16[128,384], index: 1, kind: input, shape index: {}]   ;;  %s973_s2 = inlined_call_operand.vmem [shape: f32[1,384], index: 2, kind: input, shape index: {}]   ;;  %s974_s3 = inlined_call_operand.vmem [shape: bf16[32,384], index: 3, kind: output, shape index: {}]  }
   0x1   :  { %s788_s14 = smov 0  }
   0x2 LB: > { %s25_s15 = sadd.s32 1, %s758_s13  ;;  %p583_p0 = scmp.ge.s32.totalorder %s762_s14, 1  ;;  %s762_s14 = sphi %s788_s14, %s13_s14   ;;  %s758_s13 = sphi %s786_s13, %s976_s13   ;;  %s754_s12 = sphi %s784_s12, %s975_s12  }
   0x3   : > { %p27_p1 = scmp.ge.s32.totalorder %s25_s15, 2  ;;  %p173_p2 = scmp.lt.s32.totalorder %s762_s14, 3 }
   0x5   : > { %s978_s15 = smov (%p27_p1, %s25_s15), 0  ;;  %p174_p3 = pnand %p583_p0, %p173_p2 }
   0x6   : > { %s584_s11 = sshll.u32 (!%p174_p3), %s754_s12, 1 }
   0x7   : > { %177 = sbr.rel (%p174_p3) target bundleno = 192 (0xc0), region = 32  ;;  %p212_p4 = scmp.lt.s32.totalorder (!%p174_p3), %s584_s11, 3 }
   0xc   : > { %v678_v0 = vld [vmem:[%s972_s1 + $0xa8] sm:$0xf]  ;;  %v713_v1 = vld [vmem:[%s972_s1 + $0xb0] sm:$0xf0]  ;;  %v712_v2 = vld [vmem:[%s972_s1 + $0xac] sm:$0xf] }
   0xd   : > { %v679_v3 = vor.u32 %v713_v1, %v678_v0  ;;  %v680_v4 = vld [vmem:[%s972_s1 + $0xb4] sm:$0xf0]  ;;  %v686_v5 = vld [vmem:[%s972_s1 + $0xb0] sm:$0xf]  ;;  %v714_v6 = vld [vmem:[%s972_s1 + $0xb8] sm:$0xf0] }
   0xe   : > { %v683_v7 = vor.u32 %v712_v2, %v680_v4  ;;  %v687_v8 = vor.u32 %v714_v6, %v686_v5  ;;  %v666_v9 = vld [vmem:[%s972_s1 + $0x90] sm:$0xf]  ;;  %v710_v10 = vld [vmem:[%s972_s1 + $0x98] sm:$0xf0]  ;;  %v709_v11 = vld [vmem:[%s972_s1 + $0x94] sm:$0xf] }
   0xf   : > { %416 = vmatpush.bf16.msra.mxu0 %v679_v3  ;;  %v667_v12 = vor.u32 %v710_v10, %v666_v9  ;;  %v668_v13 = vld [vmem:[%s972_s1 + $0x9c] sm:$0xf0]  ;;  %v674_v14 = vld [vmem:[%s972_s1 + $0x98] sm:$0xf]  ;;  %v711_v15 = vld [vmem:[%s972_s1 + $0xa0] sm:$0xf0] }
  0x10   : > { %430 = vmatpush.bf16.msra.mxu1 %v683_v7  ;;  %444 = vmatpush.bf16.msra.mxu2 %v687_v8  ;;  %v671_v16 = vor.u32 %v709_v11, %v668_v13  ;;  %v675_v17 = vor.u32 %v711_v15, %v674_v14  ;;  %v654_v18 = vld [vmem:[%s972_s1 + $0x78] sm:$0xf]  ;;  %v707_v19 = vld [vmem:[%s972_s1 + $0x80] sm:$0xf0]  ;;  %v706_v20 = vld [vmem:[%s972_s1 + $0x7c] sm:$0xf] }
  0x11   : > { %v656_v21 = vld [vmem:[%s972_s1 + $0x84] sm:$0xf0]  ;;  %v662_v22 = vld [vmem:[%s972_s1 + $0x80] sm:$0xf]  ;;  %v708_v23 = vld [vmem:[%s972_s1 + $0x88] sm:$0xf0]  ;;  %v655_v24 = vor.u32 %v707_v19, %v654_v18 }
  0x12   : > { %v659_v25 = vor.u32 %v706_v20, %v656_v21  ;;  %v663_v26 = vor.u32 %v708_v23, %v662_v22  ;;  %v642_v27 = vld [vmem:[%s972_s1 + $0x60] sm:$0xf]  ;;  %v704_v28 = vld [vmem:[%s972_s1 + $0x68] sm:$0xf0]  ;;  %v703_v29 = vld [vmem:[%s972_s1 + $0x64] sm:$0xf] }
  0x13   : > { %417 = vmatpush.bf16.msra.mxu0 %v667_v12  ;;  %v644_v30 = vld [vmem:[%s972_s1 + $0x6c] sm:$0xf0]  ;;  %v650_v31 = vld [vmem:[%s972_s1 + $0x68] sm:$0xf]  ;;  %v705_v32 = vld [vmem:[%s972_s1 + $0x70] sm:$0xf0]  ;;  %v643_v33 = vor.u32 %v704_v28, %v642_v27 }
  0x14   : > { %431 = vmatpush.bf16.msra.mxu1 %v671_v16  ;;  %445 = vmatpush.bf16.msra.mxu2 %v675_v17  ;;  %v647_v34 = vor.u32 %v703_v29, %v644_v30  ;;  %v651_v35 = vor.u32 %v705_v32, %v650_v31  ;;  %v630_v36 = vld [vmem:[%s972_s1 + $0x48] sm:$0xf]  ;;  %v701_v37 = vld [vmem:[%s972_s1 + $0x50] sm:$0xf0]  ;;  %v700_v38 = vld [vmem:[%s972_s1 + $0x4c] sm:$0xf] }
  0x15   : > { %v632_v39 = vld [vmem:[%s972_s1 + $0x54] sm:$0xf0]  ;;  %v638_v40 = vld [vmem:[%s972_s1 + $0x50] sm:$0xf]  ;;  %v702_v41 = vld [vmem:[%s972_s1 + $0x58] sm:$0xf0]  ;;  %v631_v42 = vor.u32 %v701_v37, %v630_v36 }
  0x16   : > { %v618_v43 = vld [vmem:[%s972_s1 + $0x30] sm:$0xf]  ;;  %v698_v44 = vld [vmem:[%s972_s1 + $0x38] sm:$0xf0]  ;;  %v635_v45 = vor.u32 %v700_v38, %v632_v39  ;;  %v639_v46 = vor.u32 %v702_v41, %v638_v40  ;;  %v697_v47 = vld [vmem:[%s972_s1 + $0x34] sm:$0xf] }
  0x17   : > { %418 = vmatpush.bf16.msra.mxu0 %v655_v24  ;;  %v620_v48 = vld [vmem:[%s972_s1 + $0x3c] sm:$0xf0]  ;;  %v626_v49 = vld [vmem:[%s972_s1 + $0x38] sm:$0xf]  ;;  %v699_v50 = vld [vmem:[%s972_s1 + $0x40] sm:$0xf0]  ;;  %v619_v51 = vor.u32 %v698_v44, %v618_v43 }
  0x18   : > { %432 = vmatpush.bf16.msra.mxu1 %v659_v25  ;;  %446 = vmatpush.bf16.msra.mxu2 %v663_v26  ;;  %v606_v52 = vld [vmem:[%s972_s1 + $0x18] sm:$0xf]  ;;  %v623_v53 = vor.u32 %v697_v47, %v620_v48  ;;  %v627_v54 = vor.u32 %v699_v50, %v626_v49  ;;  %v695_v55 = vld [vmem:[%s972_s1 + $0x20] sm:$0xf0]  ;;  %v694_v56 = vld [vmem:[%s972_s1 + $0x1c] sm:$0xf] }
  0x19   : > { %s980_s11 = smov (!%p212_p4, %s584_s11), 3  ;;  %v608_v57 = vld [vmem:[%s972_s1 + $0x24] sm:$0xf0]  ;;  %v614_v58 = vld [vmem:[%s972_s1 + $0x20] sm:$0xf]  ;;  %v607_v60 = vor.u32 %v695_v55, %v606_v52 }
  0x1a   : > { %v696_v59 = vld [vmem:[%s972_s1 + $0x28] sm:$0xf0]  ;;  %v594_v61 = vld [vmem:[%s972_s1] sm:$0xf]  ;;  %v611_v62 = vor.u32 %v694_v56, %v608_v57  ;;  %v691_v1 = vld [vmem:[%s972_s1 + $0x4] sm:$0xf] }
  0x1b   : > { %419 = vmatpush.bf16.msra.mxu0 %v643_v33  ;;  %v615_v63 = vor.u32 %v696_v59, %v614_v58  ;;  %v692_v0 = vld [vmem:[%s972_s1 + $0x8] sm:$0xf0]  ;;  %s585_s10 = sshll.u32 %s980_s11, 2  ;;  %v596_v2 = vld [vmem:[%s972_s1 + $0xc] sm:$0xf0]  ;;  %s715_s26 = smul.u32 12, %s980_s11 }
  0x1c   : > { %433 = vmatpush.bf16.msra.mxu1 %v647_v34  ;;  %447 = vmatpush.bf16.msra.mxu2 %v651_v35  ;;  %v602_v3 = vld [vmem:[%s972_s1 + $0x8] sm:$0xf]  ;;  %v693_v4 = vld [vmem:[%s972_s1 + $0x10] sm:$0xf0]  ;;  %v595_v5 = vor.u32 %v692_v0, %v594_v61  ;;  %s215_s23 = scalar_lea.vmem %s971_s0, %s585_s10  ;;  %v599_v6 = vor.u32 %v691_v1, %v596_v2  ;;  %v274_v9 = vld [vmem:[%s973_s2] sm:$0x7] }
  0x1d   : > { %v603_v7 = vor.u32 %v693_v4, %v602_v3  ;;  %v690_v8 = vld [vmem:[%s215_s23] sm:$0xff]  ;;  %v276_v10 = vperm.slane %v274_v9, 0  ;;  %v277_v11 = vperm.slane %v274_v9, 1  ;;  %s237_s29 = scalar_lea.vmem %s974_s3, %s715_s26  ;;  %v278_v17 = vperm.slane %v274_v9, 2 }
  0x1f   : > { %420 = vmatpush.bf16.msra.mxu0 %v631_v42 }
  0x20   : > { %434 = vmatpush.bf16.msra.mxu1 %v635_v45  ;;  %448 = vmatpush.bf16.msra.mxu2 %v639_v46 }
  0x23   : > { %421 = vmatpush.bf16.msra.mxu0 %v619_v51 }
  0x24   : > { %435 = vmatpush.bf16.msra.mxu1 %v623_v53  ;;  %449 = vmatpush.bf16.msra.mxu2 %v627_v54 }
  0x27   : > { %422 = vmatpush.bf16.msra.mxu0 %v607_v60 }
  0x28   : > { %436 = vmatpush.bf16.msra.mxu1 %v611_v62  ;;  %450 = vmatpush.bf16.msra.mxu2 %v615_v63 }
  0x2b   : > { %423 = vmatpush.bf16.msra.mxu0 %v595_v5 }
  0x2c   : > { %437 = vmatpush.bf16.msra.mxu1 %v599_v6  ;;  %451 = vmatpush.bf16.msra.mxu2 %v603_v7 }
  0x2e   : > { %424 = vmatmul.bf16.vlgmr.msra.gmra.mxu0 %v690_v8 }
  0x2f   : > { %438 = vmatmul.bf16.vlgmr.msra.gmra.mxu1 %v690_v8  ;;  %452 = vmatmul.bf16.vlgmr.msra.gmra.mxu2 %v690_v8 }
  0xab   : > { %v425_v12 = vpop.f32.mrf.mxu0 }
  0xac   : > { %v426_v13 = vadd.f32 %v425_v12, %v276_v10  ;;  %v439_v14 = vpop.f32.mrf.mxu1 }
  0xad   : > { %v440_v15 = vadd.f32 %v439_v14, %v277_v11 }
  0xaf   : > { %v458_v16 = vpack.c.bf16 %v440_v15, %v426_v13 }
  0xb1   : > { %462 = vst [vmem:[%s237_s29] sm:$0xff] %v458_v16 }
  0xb2   : > { %v453_v18 = vpop.f32.mrf.mxu2 }
  0xb3   : > { %v454_v19 = vadd.f32 %v453_v18, %v278_v17  ;;  %v427_v20 = vpop.f32.mrf.mxu0 }
  0xb4   : > { %v428_v21 = vadd.f32 %v427_v20, %v276_v10  ;;  %v441_v22 = vpop.f32.mrf.mxu1 }
  0xb5   : > { %v459_v23 = vpack.c.bf16 %v454_v19, %v454_v19  ;;  %v442_v24 = vadd.f32 %v441_v22, %v277_v11 }
  0xb7   : > { %463 = vst [vmem:[%s237_s29 + $0x8] sm:$0xf] %v459_v23  ;;  %v460_v25 = vpack.c.bf16 %v442_v24, %v428_v21 }
  0xb9   : > { %464 = vst [vmem:[%s237_s29 + $0xc] sm:$0xff] %v460_v25 }
  0xba   : > { %v455_v26 = vpop.f32.mrf.mxu2 }
  0xbb   : > { %v456_v27 = vadd.f32 %v455_v26, %v278_v17 }
  0xbd   : > { %v461_v28 = vpack.c.bf16 %v456_v27, %v456_v27 }
  0xbf   : > { %465 = vst [vmem:[%s237_s29 + $0x14] sm:$0xf] %v461_v28 }
  0xc0 PF: > { %s13_s14 = sadd.s32 1, %s762_s14   ;;  %s975_s12 = smov %s758_s13 }
  0xc1   : > { %p10_p5 = scmp.ge.s32.totalorder %s13_s14, 4   ;;  %s976_s13 = smov %s978_s15 }
  0xc3   :  { %12 = sbr.rel (!%p10_p5) target bundleno = 2 (0x2), region = 68 }

// kernel: transformer_forward.26
= control target key start
LH: loop header
LB: loop body
LE: loop exit
PB: predicated region body
PF: predicated region fallthrough
CT: control target
= control target key end

     0   :  { %s1626_s13 = smov 0   ;;  %s1628_s14 = smov 0   ;;  %s1770_s0 = inlined_call_operand.vmem [shape: bf16[2,4,16,32], index: 0, kind: input, shape index: {}]   ;;  %s1771_s1 = inlined_call_operand.vmem [shape: bf16[2,4,16,32], index: 1, kind: input, shape index: {}]   ;;  %s1772_s2 = inlined_call_operand.vmem [shape: bf16[2,4,16,32], index: 2, kind: input, shape index: {}]   ;;  %s1773_s3 = inlined_call_operand.vmem [shape: f32[2,16,1], index: 3, kind: input, shape index: {}]   ;;  %s1774_s4 = inlined_call_operand.vmem [shape: f32[2,1,16], index: 4, kind: input, shape index: {}]   ;;  %s1775_s5 = inlined_call_operand.vmem [shape: bf16[2,16,128], index: 5, kind: input, shape index: {}]   ;;  %s1776_s6 = inlined_call_operand.vmem [shape: bf16[4,32,128], index: 6, kind: input, shape index: {}]   ;;  %s1777_s7 = inlined_call_operand.vmem [shape: f32[1,128], index: 7, kind: input, shape index: {}]   ;;  %s1778_s8 = inlined_call_operand.vmem [shape: f32[1,128], index: 8, kind: input, shape index: {}]   ;;  %s1779_s9 = inlined_call_operand.vmem [shape: f32[1,128], index: 9, kind: input, shape index: {}]   ;;  %s1780_s10 = inlined_call_operand.vmem [shape: bf16[2,16,128], index: 10, kind: output, shape index: {}]  }
   0x1   :  { %s1630_s15 = smov 0  }
   0x2 LB: > { %s32_s16 = sadd.s32 1, %s1562_s14  ;;  %p1321_p0 = scmp.ge.s32.totalorder %s1566_s15, 1  ;;  %s1566_s15 = sphi %s1630_s15, %s20_s15   ;;  %s1562_s14 = sphi %s1628_s14, %s1782_s14   ;;  %s1558_s13 = sphi %s1626_s13, %s1781_s13  }
   0x3   : > { %p34_p1 = scmp.ge.s32.totalorder %s32_s16, 2  ;;  %p395_p2 = scmp.lt.s32.totalorder %s1566_s15, 3 }
   0x5   : > { %s1784_s16 = smov (%p34_p1, %s32_s16), 0  ;;  %p396_p3 = pnand %p1321_p0, %p395_p2 }
   0x6   : > { %p473_p4 = scmp.lt.s32.totalorder (!%p396_p3), %s1558_s13, 1 }
   0x7   : > { %399 = sbr.rel (%p396_p3) target bundleno = 1013 (0x3f5), region = 60 }
   0xc   : > { %v1568_v0 = vmov 0   ;;  %s1786_s13 = smov (!%p473_p4, %s1558_s13), 1  ;;  %vm599_vm0 = vcmask 261120   ;;  %v1569_v10 = vmov 0.0   ;;  %v575_v19 = vlaneseq }
   0xd   : > { %1502 = vset.pattern.permute.xlu0 %v1568_v0  ;;  %s1647_s17 = sshll.u32 %s1786_s13, 5  ;;  %s1443_s18 = sshll.u32 %s1786_s13, 4  ;;  %vm710_vm5 = vcmask 130048  }
   0xe   : > { %s486_s21 = scalar_lea.vmem %s1771_s1, %s1647_s17  ;;  %s500_s24 = scalar_lea.vmem %s1773_s3, %s1443_s18  ;;  %v576_v21 = vshrl.u32 %v575_v19, 7  ;;  %v582_v22 = vand.u32 127, %v575_v19 }
   0xf   : > { %v1450_v1 = vld [vmem:[%s486_s21] sm:$0xff]  ;;  %v1451_v2 = vld [vmem:[%s486_s21 + $0x8] sm:$0xff]  ;;  %v1452_v3 = vld [vmem:[%s486_s21 + $0x10] sm:$0xff]  ;;  %s480_s27 = scalar_lea.vmem %s1770_s0, %s1647_s17  ;;  %s504_s30 = scalar_lea.vmem %s1774_s4, %s1786_s13 }
  0x10   : > { %v1453_v4 = vld [vmem:[%s486_s21 + $0x18] sm:$0xff]  ;;  %v604_v5 = vsel %vm599_vm0, %v1450_v1, 0  ;;  %v634_v6 = vsel %vm599_vm0, %v1451_v2, 0  ;;  %v664_v7 = vsel %vm599_vm0, %v1452_v3, 0  ;;  %v553_v8 = vld [vmem:[%s500_s24] sm:$0xff]  ;;  %v554_v12 = vld [vmem:[%s500_s24 + $0x8] sm:$0xff]  ;;  %vm583_vm4 = vcmp.gt.s32.totalorder %v582_v22, %v576_v21  ;;  %s491_s18 = scalar_lea.vmem %s1772_s2, %s1647_s17 }
  0x11   : > { %613 = vmatpush.bf16.xpose.msra.mxu0 %v604_v5  ;;  %643 = vmatpush.bf16.xpose.msra.mxu1 %v634_v6  ;;  %v694_v9 = vsel %vm599_vm0, %v1453_v4, 0  ;;  %vm555_vm1 = vcmp.eq.f32.partialorder %v553_v8, 0.0  ;;  %v1446_v13 = vld [vmem:[%s480_s27] sm:$0xff]  ;;  %v1447_v14 = vld [vmem:[%s480_s27 + $0x8] sm:$0xff]  ;;  %v1448_v15 = vld [vmem:[%s480_s27 + $0x10] sm:$0xff]  ;;  %vm556_vm2 = vcmp.eq.f32.partialorder %v554_v12, 0.0 }
  0x12   : > { %673 = vmatpush.bf16.xpose.msra.mxu2 %v664_v7  ;;  %703 = vmatpush.bf16.xpose.msra.mxu3 %v694_v9  ;;  %v557_v11 = vsel %vm555_vm1, -1e+09, %v1569_v10  ;;  %v1449_v16 = vld [vmem:[%s480_s27 + $0x18] sm:$0xff]  ;;  %v558_v17 = vsel %vm556_vm2, -1e+09, %v1569_v10  ;;  %v577_v31 = vadd.s32 8, %v576_v21 }
  0x13   : > { %564 = vperm.xlu0 %1502, %v557_v11   ;;  %v550_v18 = vld [vmem:[%s504_s30] sm:$0x1]  ;;  %v585_v26 = vsel %vm583_vm4, -1e+09, %v1569_v10  ;;  %s1444_s17 = sshll.u32 %s1786_s13, 3 }
  0x14   : > { %vm551_vm3 = vcmp.eq.f32.partialorder %v550_v18, 0.0  ;;  %vm584_vm6 = vcmp.gt.s32.totalorder %v582_v22, %v577_v31  ;;  %s513_s21 = scalar_lea.vmem %s1775_s5, %s1444_s17  ;;  %s523_s30 = scalar_lea.vmem %s1780_s10, %s1444_s17 }
  0x15   : > { %v552_v20 = vsel %vm551_vm3, -1e+09, %v1569_v10  ;;  %v586_v40 = vsel %vm584_vm6, -1e+09, %v1569_v10 }
  0x16   : > { %v560_v23 = vperm.slane %v552_v20, 0 }
  0x18   : > { %1342 = vmatmul.msk.bf16.vlgmr.msra.gmra.mxu0 %vm599_vm0, %v1446_v13  ;;  %1351 = vmatmul.msk.bf16.vlgmr.msra.gmra.mxu1 %vm599_vm0, %v1447_v14 }
  0x19   : > { %1360 = vmatmul.msk.bf16.vlgmr.msra.gmra.mxu2 %vm599_vm0, %v1448_v15  ;;  %1369 = vmatmul.msk.bf16.vlgmr.msra.gmra.mxu3 %vm599_vm0, %v1449_v16 }
  0x1b   : > { %569 = vperm.xlu0 %1502, %v558_v17  }
  0x85   : > { %v565_v24 = vpop.permute.xlu0 %564 }
  0x86   : > { %v572_v25 = vadd.f32 %v565_v24, %v560_v23 }
  0x88   : > { %v587_v27 = vadd.f32 %v585_v26, %v572_v25 }
  0x8d   : > { %v570_v32 = vpop.permute.xlu0 %569 }
  0x8e   : > { %v573_v37 = vadd.f32 %v570_v32, %v560_v23 }
  0x90   : > { %v588_v41 = vadd.f32 %v586_v40, %v573_v37 }
  0x95   : > { %v615_v28 = vpop.f32.mrf.mxu0  ;;  %v645_v46 = vpop.f32.mrf.mxu1 }
  0x96   : > { %v616_v29 = vadd.f32 %v615_v28, %v587_v27  ;;  %v646_v50 = vadd.f32 %v645_v46, %v587_v27 }
  0x98   : > { %v711_v30 = vsel %vm710_vm5, %v616_v29, -inf  ;;  %v717_v52 = vsel %vm710_vm5, %v646_v50, -inf }
  0x99   : > { %712 = vmax.xlane.f32.xlu0 %v711_v30 }
  0x9c   : > { %v675_v33 = vpop.f32.mrf.mxu2  ;;  %v705_v34 = vpop.f32.mrf.mxu3 }
  0x9d   : > { %v676_v35 = vadd.f32 %v675_v33, %v587_v27  ;;  %v706_v36 = vadd.f32 %v705_v34, %v587_v27  ;;  %v617_v49 = vpop.f32.mrf.mxu0  ;;  %v647_v54 = vpop.f32.mrf.mxu1  ;;  %v1454_v33 = vld [vmem:[%s491_s18] sm:$0xff] }
  0x9e   : > { %v618_v51 = vadd.f32 %v617_v49, %v588_v41  ;;  %v648_v55 = vadd.f32 %v647_v54, %v588_v41  ;;  %828 = vmatpush.bf16.msrb.mxu0 %v1454_v33 }
  0x9f   : > { %v729_v38 = vsel %vm710_vm5, %v706_v36, -inf  ;;  %v723_v39 = vsel %vm710_vm5, %v676_v35, -inf }
  0xa0   : > { %730 = vmax.xlane.f32.xlu2 %v729_v38  ;;  %724 = vmax.xlane.f32.xlu1 %v723_v39  ;;  %v714_v53 = vsel %vm710_vm5, %v618_v51, -inf  ;;  %v720_v56 = vsel %vm710_vm5, %v648_v55, -inf  ;;  %v1455_v38 = vld [vmem:[%s491_s18 + $0x8] sm:$0xff] }
  0xa1   : > { %856 = vmatpush.bf16.msrb.mxu1 %v1455_v38 }
  0xa4   : > { %v677_v42 = vpop.f32.mrf.mxu2  ;;  %v707_v43 = vpop.f32.mrf.mxu3 }
  0xa5   : > { %v678_v44 = vadd.f32 %v677_v42, %v588_v41  ;;  %v708_v45 = vadd.f32 %v707_v43, %v588_v41 }
  0xa7   : > { %v732_v47 = vsel %vm710_vm5, %v708_v45, -inf  ;;  %v726_v48 = vsel %vm710_vm5, %v678_v44, -inf }
  0xa8   : > { %733 = vmax.xlane.f32.xlu2 %v732_v47  ;;  %727 = vmax.xlane.f32.xlu1 %v726_v48 }
  0xb0   : > { %718 = vmax.xlane.f32.xlu2 %v717_v52  ;;  %715 = vmax.xlane.f32.xlu1 %v714_v53 }
  0xb8   : > { %721 = vmax.xlane.f32.xlu1 %v720_v56 }
 0x10c   : > { %v713_v57 = vpop.xlane.xlu0 %712 }
 0x10d   : > { %v735_v58 = vsub.f32 %v616_v29, %v713_v57 }
 0x10f   : > { %v743_v59 = vmul.f32 1.442695, %v735_v58 }
 0x111   : > { %1506 = vpow2.f32 %v743_v59 }
 0x113   : > { %v731_v60 = vpop.xlane.xlu2 %730  ;;  %v725_v61 = vpop.xlane.xlu1 %724 }
 0x114   : > { %v739_v62 = vsub.f32 %v676_v35, %v725_v61  ;;  %v741_v1 = vsub.f32 %v706_v36, %v731_v60  ;;  %v1456_v35 = vld [vmem:[%s491_s18 + $0x10] sm:$0xff]  ;;  %v1457_v36 = vld [vmem:[%s491_s18 + $0x18] sm:$0xff] }
 0x115   : > { %884 = vmatpush.bf16.msrb.mxu2 %v1456_v35  ;;  %912 = vmatpush.bf16.msrb.mxu3 %v1457_v36 }
 0x116   : > { %v751_v63 = vmul.f32 1.442695, %v739_v62  ;;  %v755_v3 = vmul.f32 1.442695, %v741_v1 }
 0x117   : > { %v1681_v0 = vpop.eup %1506 }
 0x118   : > { %v759_v2 = vsel %vm710_vm5, %v1681_v0, 0.0  ;;  %1508 = vpow2.f32 %v751_v63 }
 0x119   : > { %760 = vadd.xlane.f32.xlu2 %v759_v2  ;;  %1510 = vpow2.f32 %v755_v3 }
 0x11b   : > { %v734_v4 = vpop.xlane.xlu2 %733  ;;  %v728_v5 = vpop.xlane.xlu1 %727 }
 0x11c   : > { %v740_v15 = vsub.f32 %v678_v44, %v728_v5  ;;  %v742_v20 = vsub.f32 %v708_v45, %v734_v4 }
 0x11e   : > { %v1685_v6 = vpop.eup %1508  ;;  %v753_v17 = vmul.f32 1.442695, %v740_v15  ;;  %v757_v23 = vmul.f32 1.442695, %v742_v20  ;;  %v1465_v20 = vld [vmem:[%s1776_s6 + $0x38] sm:$0xff] }
 0x11f   : > { %v771_v7 = vsel %vm710_vm5, %v1685_v6, 0.0  ;;  %v1689_v12 = vpop.eup %1510  ;;  %1076 = vmatpush.bf16.msra.mxu3 %v1465_v20 }
 0x120   : > { %v777_v16 = vsel %vm710_vm5, %v1689_v12, 0.0 }
 0x121   : > { %772 = vadd.xlane.f32.xlu2 %v771_v7 }
 0x123   : > { %v719_v8 = vpop.xlane.xlu2 %718  ;;  %v716_v9 = vpop.xlane.xlu1 %715 }
 0x124   : > { %v737_v10 = vsub.f32 %v646_v50, %v719_v8  ;;  %v736_v11 = vsub.f32 %v618_v51, %v716_v9 }
 0x126   : > { %v747_v13 = vmul.f32 1.442695, %v737_v10  ;;  %v745_v14 = vmul.f32 1.442695, %v736_v11 }
 0x128   : > { %1512 = vpow2.f32 %v747_v13 }
 0x129   : > { %1514 = vpow2.f32 %v745_v14  ;;  %778 = vadd.xlane.f32.xlu2 %v777_v16 }
 0x12a   : > { %1516 = vpow2.f32 %v753_v17  ;;  %v1459_v17 = vld [vmem:[%s1776_s6 + $0x8] sm:$0xff] }
 0x12b   : > { %v722_v24 = vpop.xlane.xlu1 %721  ;;  %1518 = vpow2.f32 %v757_v23  ;;  %996 = vmatpush.bf16.msra.mxu1 %v1459_v17  ;;  %v1464_v23 = vld [vmem:[%s1776_s6 + $0x30] sm:$0xff] }
 0x12c   : > { %v738_v26 = vsub.f32 %v648_v55, %v722_v24  ;;  %1077 = vmatpush.bf16.msra.mxu3 %v1464_v23 }
 0x12e   : > { %v1693_v18 = vpop.eup %1512  ;;  %v749_v28 = vmul.f32 1.442695, %v738_v26 }
 0x12f   : > { %v1515_v19 = vpop.eup %1514  ;;  %v765_v22 = vsel %vm710_vm5, %v1693_v18, 0.0 }
 0x130   : > { %v762_v21 = vsel %vm710_vm5, %v1515_v19, 0.0  ;;  %v1517_v25 = vpop.eup %1516  ;;  %1520 = vpow2.f32 %v749_v28 }
 0x131   : > { %763 = vadd.xlane.f32.xlu1 %v762_v21  ;;  %766 = vadd.xlane.f32.xlu2 %v765_v22  ;;  %v774_v27 = vsel %vm710_vm5, %v1517_v25, 0.0  ;;  %v1519_v29 = vpop.eup %1518  ;;  %v1462_v21 = vld [vmem:[%s1776_s6 + $0x20] sm:$0xff]  ;;  %v1461_v22 = vld [vmem:[%s1776_s6 + $0x18] sm:$0xff] }
 0x132   : > { %v780_v30 = vsel %vm710_vm5, %v1519_v29, 0.0  ;;  %962 = vmatpush.bf16.msra.mxu0 %v1461_v22 }
 0x136   : > { %v1521_v31 = vpop.eup %1520 }
 0x137   : > { %v768_v32 = vsel %vm710_vm5, %v1521_v31, 0.0 }
 0x139   : > { %775 = vadd.xlane.f32.xlu1 %v774_v27 }
 0x141   : > { %781 = vadd.xlane.f32.xlu1 %v780_v30 }
 0x149   : > { %769 = vadd.xlane.f32.xlu1 %v768_v32 }
 0x18c   : > { %v761_v34 = vpop.xlane.xlu2 %760 }
 0x18d   : > { %1522 = vrcp.f32 %v761_v34 }
 0x193   : > { %v1523_v40 = vpop.eup %1522 }
 0x194   : > { %v773_v37 = vpop.xlane.xlu2 %772  ;;  %v791_v41 = vmul.f32 %v1523_v40, %v1681_v0 }
 0x196   : > { %v799_v44 = vpack.c.bf16 %v791_v41, %v791_v41 }
 0x198   : > { %v809_v49 = vunpack.c.l.b16 %v799_v44 }
 0x19c   : > { %v779_v42 = vpop.xlane.xlu2 %778 }
 0x1a4   : > { %v764_v39 = vpop.xlane.xlu1 %763  ;;  %v767_v55 = vpop.xlane.xlu2 %766 }
 0x1a5   : > { %1524 = vrcp.f32 %v764_v39 }
 0x1a6   : > { %1526 = vrcp.f32 %v773_v37 }
 0x1ab   : > { %v1525_v43 = vpop.eup %1524 }
 0x1ac   : > { %v792_v45 = vmul.f32 %v1525_v43, %v1515_v19  ;;  %v776_v46 = vpop.xlane.xlu1 %775  ;;  %v1527_v47 = vpop.eup %1526  ;;  %v1463_v19 = vld [vmem:[%s1776_s6 + $0x28] sm:$0xff] }
 0x1ad   : > { %1528 = vrcp.f32 %v776_v46  ;;  %v795_v50 = vmul.f32 %v1527_v47, %v1685_v6  ;;  %1035 = vmatpush.bf16.msra.mxu2 %v1463_v19 }
 0x1ae   : > { %v800_v48 = vpack.c.bf16 %v792_v45, %v792_v45  ;;  %1530 = vrcp.f32 %v779_v42 }
 0x1af   : > { %v803_v54 = vpack.c.bf16 %v795_v50, %v795_v50 }
 0x1b0   : > { %v810_v51 = vunpack.c.l.b16 %v800_v48 }
 0x1b1   : > { %v865_v60 = vunpack.c.l.b16 %v803_v54  ;;  %1036 = vmatpush.bf16.msra.mxu2 %v1462_v21 }
 0x1b2   : > { %v811_v52 = vpack.c.b16 %v810_v51, %v809_v49 }
 0x1b3   : > { %v1529_v53 = vpop.eup %1528 }
 0x1b4   : > { %v796_v56 = vmul.f32 %v1529_v53, %v1517_v25  ;;  %v782_v57 = vpop.xlane.xlu1 %781  ;;  %1374 = vmatmul.msk.bf16.vlgmr.msrb.gmra.mxu0 %vm710_vm5, %v811_v52  ;;  %v1531_v58 = vpop.eup %1530  ;;  %v1460_v25 = vld [vmem:[%s1776_s6 + $0x10] sm:$0xff] }
 0x1b5   : > { %1532 = vrcp.f32 %v782_v57  ;;  %v797_v61 = vmul.f32 %v1531_v58, %v1689_v12  ;;  %963 = vmatpush.bf16.msra.mxu0 %v1460_v25  ;;  %v1467_v57 = vld [vmem:[%s513_s21] sm:$0xff]  }
 0x1b6   : > { %v804_v59 = vpack.c.bf16 %v796_v56, %v796_v56  ;;  %1534 = vrcp.f32 %v767_v55 }
 0x1b7   : > { %v805_v1 = vpack.c.bf16 %v797_v61, %v797_v61 }
 0x1b8   : > { %v866_v62 = vunpack.c.l.b16 %v804_v59  ;;  %v1503_v59 = vld [vmem:[%s1777_s7] ss:$0 sm:$0xff] }
 0x1b9   : > { %v893_v6 = vunpack.c.l.b16 %v805_v1 }
 0x1ba   : > { %v867_v63 = vpack.c.b16 %v866_v62, %v865_v60  ;;  %v1468_v62 = vunpack.c.l.bf16 %v1467_v57 }
 0x1bb   : > { %v1533_v0 = vpop.eup %1532 }
 0x1bc   : > { %v798_v2 = vmul.f32 %v1533_v0, %v1519_v29  ;;  %v770_v3 = vpop.xlane.xlu1 %769  ;;  %1384 = vmatmul.msk.bf16.vlgmr.msrb.gmra.mxu2 %vm710_vm5, %v867_v63  ;;  %v1535_v4 = vpop.eup %1534 }
 0x1bd   : > { %1536 = vrcp.f32 %v770_v3  ;;  %v793_v7 = vmul.f32 %v1535_v4, %v1693_v18  ;;  %v1458_v18 = vld [vmem:[%s1776_s6] sm:$0xff] }
 0x1be   : > { %v806_v5 = vpack.c.bf16 %v798_v2, %v798_v2  ;;  %997 = vmatpush.bf16.msra.mxu1 %v1458_v18 }
 0x1bf   : > { %v801_v11 = vpack.c.bf16 %v793_v7, %v793_v7 }
 0x1c0   : > { %v894_v8 = vunpack.c.l.b16 %v806_v5 }
 0x1c1   : > { %v837_v14 = vunpack.c.l.b16 %v801_v11  ;;  %v1570_v11 = vmov 128.0  }
 0x1c2   : > { %v895_v9 = vpack.c.b16 %v894_v8, %v893_v6  ;;  %v1469_v8 = vunpack.c.h.bf16 %v1467_v57  ;;  %1538 = vrcp.f32 %v1570_v11 }
 0x1c3   : > { %v1537_v10 = vpop.eup %1536 }
 0x1c4   : > { %v794_v13 = vmul.f32 %v1537_v10, %v1521_v31  ;;  %1389 = vmatmul.msk.bf16.vlgmr.msrb.gmra.mxu3 %vm710_vm5, %v895_v9 }
 0x1c6   : > { %v802_v12 = vpack.c.bf16 %v794_v13, %v794_v13 }
 0x1c8   : > { %v838_v15 = vunpack.c.l.b16 %v802_v12  ;;  %v1539_v13 = vpop.eup %1538 }
 0x1c9   : > { %v1105_v12 = vmul.f32 128.0, %v1539_v13  ;;  %vm1109_vm7 = vweird.f32 %v1539_v13 }
 0x1ca   : > { %v839_v16 = vpack.c.b16 %v838_v15, %v837_v14 }
 0x1cb   : > { %v1106_v14 = vsub.f32 1.0, %v1105_v12 }
 0x1cc   : > { %1379 = vmatmul.msk.bf16.vlgmr.msrb.gmra.mxu1 %vm710_vm5, %v839_v16 }
 0x1cd   : > { %v1107_v15 = vmul.f32 %v1539_v13, %v1106_v14 }
 0x1cf   : > { %v1108_v16 = vadd.f32 %v1539_v13, %v1107_v15 }
 0x1d1   : > { %v1110_v17 = vsel %vm1109_vm7, %v1539_v13, %v1108_v16 }
 0x231   : > { %v830_v24 = vpop.f32.mrf.mxu0 }
 0x232   : > { %v919_v26 = vpack.c.bf16 %v830_v24, %v830_v24 }
 0x234   : > { %v972_v29 = vunpack.c.l.b16 %v919_v26 }
 0x239   : > { %v832_v27 = vpop.f32.mrf.mxu0 }
 0x23a   : > { %v920_v28 = vpack.c.bf16 %v832_v27, %v832_v27 }
 0x23c   : > { %v973_v30 = vunpack.c.l.b16 %v920_v28 }
 0x23e   : > { %v974_v31 = vpack.c.b16 %v973_v30, %v972_v29 }
 0x23f   : > { %v886_v32 = vpop.f32.mrf.mxu2 }
 0x240   : > { %1411 = vmatmul.msk.bf16.vlgmr.msra.gmra.mxu1 %vm599_vm0, %v974_v31  ;;  %v923_v33 = vpack.c.bf16 %v886_v32, %v886_v32 }
 0x242   : > { %v1011_v38 = vunpack.c.l.b16 %v923_v33 }
 0x247   : > { %v888_v34 = vpop.f32.mrf.mxu2  ;;  %v914_v35 = vpop.f32.mrf.mxu3 }
 0x248   : > { %v924_v36 = vpack.c.bf16 %v888_v34, %v888_v34  ;;  %v925_v41 = vpack.c.bf16 %v914_v35, %v914_v35 }
 0x249   : > { %v858_v37 = vpop.f32.mrf.mxu1 }
 0x24a   : > { %v1012_v39 = vunpack.c.l.b16 %v924_v36  ;;  %v921_v43 = vpack.c.bf16 %v858_v37, %v858_v37  ;;  %v1052_v46 = vunpack.c.l.b16 %v925_v41 }
 0x24c   : > { %v1013_v40 = vpack.c.b16 %v1012_v39, %v1011_v38  ;;  %v938_v49 = vunpack.c.l.b16 %v921_v43 }
 0x24e   : > { %1424 = vmatmul.msk.bf16.vlgmr.msra.gmra.mxu2 %vm599_vm0, %v1013_v40 }
 0x24f   : > { %v916_v42 = vpop.f32.mrf.mxu3 }
 0x250   : > { %v926_v44 = vpack.c.bf16 %v916_v42, %v916_v42 }
 0x251   : > { %v860_v45 = vpop.f32.mrf.mxu1 }
 0x252   : > { %v1053_v47 = vunpack.c.l.b16 %v926_v44  ;;  %v922_v48 = vpack.c.bf16 %v860_v45, %v860_v45  ;;  %v1504_v44 = vld [vmem:[%s1778_s8] ss:$0 sm:$0xff] }
 0x254   : > { %v1054_v50 = vpack.c.b16 %v1053_v47, %v1052_v46  ;;  %v939_v51 = vunpack.c.l.b16 %v922_v48  ;;  %v1505_v48 = vld [vmem:[%s1779_s9] ss:$0 sm:$0xff] }
 0x256   : > { %v940_v52 = vpack.c.b16 %v939_v51, %v938_v49  ;;  %1437 = vmatmul.msk.bf16.vlgmr.msra.gmra.mxu3 %vm599_vm0, %v1054_v50 }
 0x258   : > { %1402 = vmatmul.msk.bf16.vlgmr.msra.gmra.mxu0 %vm599_vm0, %v940_v52 }
 0x2bd   : > { %v999_v53 = vpop.f32.mrf.mxu1 }
 0x2c5   : > { %v1001_v0 = vpop.f32.mrf.mxu1 }
 0x2d1   : > { %v1038_v54 = vpop.f32.mrf.mxu2 }
 0x2d5   : > { %v965_v55 = vpop.f32.mrf.mxu0 }
 0x2d6   : > { %v1000_v56 = vadd.f32 %v999_v53, %v965_v55 }
 0x2d8   : > { %v1043_v58 = vadd.f32 %v1038_v54, %v1000_v56 }
 0x2d9   : > { %v1079_v60 = vpop.f32.mrf.mxu3  ;;  %v1040_v4 = vpop.f32.mrf.mxu2 }
 0x2da   : > { %v1084_v61 = vadd.f32 %v1079_v60, %v1043_v58 }
 0x2dc   : > { %v1090_v63 = vadd.f32 %v1503_v59, %v1084_v61 }
 0x2dd   : > { %v967_v1 = vpop.f32.mrf.mxu0 }
 0x2de   : > { %v1002_v2 = vadd.f32 %v1001_v0, %v967_v1  ;;  %v1096_v3 = vadd.f32 %v1468_v62, %v1090_v63 }
 0x2e0   : > { %1100 = vadd.xlane.f32.xlu2 %v1096_v3  ;;  %v1044_v5 = vadd.f32 %v1040_v4, %v1002_v2 }
 0x2e1   : > { %v1081_v6 = vpop.f32.mrf.mxu3 }
 0x2e2   : > { %v1085_v7 = vadd.f32 %v1081_v6, %v1044_v5 }
 0x2e4   : > { %v1091_v9 = vadd.f32 %v1503_v59, %v1085_v7 }
 0x2e6   : > { %v1097_v10 = vadd.f32 %v1469_v8, %v1091_v9 }
 0x2e8   : > { %1102 = vadd.xlane.f32.xlu0 %v1097_v10 }
 0x353   : > { %v1101_v18 = vpop.xlane.xlu2 %1100 }
 0x354   : > { %v1111_v19 = vmul.f32 %v1110_v17, %v1101_v18 }
 0x356   : > { %v1113_v20 = vsub.f32 %v1096_v3, %v1111_v19 }
 0x358   : > { %v1115_v21 = vmul.f32 %v1113_v20, %v1113_v20 }
 0x35a   : > { %1117 = vadd.xlane.f32.xlu1 %v1115_v21 }
 0x35b   : > { %v1103_v22 = vpop.xlane.xlu0 %1102 }
 0x35c   : > { %v1112_v23 = vmul.f32 %v1110_v17, %v1103_v22 }
 0x35e   : > { %v1114_v24 = vsub.f32 %v1097_v10, %v1112_v23 }
 0x360   : > { %v1116_v25 = vmul.f32 %v1114_v24, %v1114_v24 }
 0x362   : > { %1119 = vadd.xlane.f32.xlu2 %v1116_v25 }
 0x3cd   : > { %v1118_v26 = vpop.xlane.xlu1 %1117 }
 0x3ce   : > { %v1121_v27 = vmul.f32 %v1118_v26, %v1110_v17 }
 0x3d0   : > { %v1123_v28 = vadd.f32 1e-05, %v1121_v27 }
 0x3d2   : > { %1540 = vrsqrt.f32 %v1123_v28  ;;  %vm1131_vm9 = vweird.f32 %v1123_v28 }
 0x3d5   : > { %v1120_v29 = vpop.xlane.xlu2 %1119 }
 0x3d6   : > { %v1122_v30 = vmul.f32 %v1120_v29, %v1110_v17 }
 0x3d8   : > { %v1541_v31 = vpop.eup %1540  ;;  %v1124_v32 = vadd.f32 1e-05, %v1122_v30 }
 0x3d9   : > { %v1126_v33 = vmul.f32 %v1541_v31, %v1123_v28  ;;  %vm1132_vm8 = vweird.f32 %v1541_v31 }
 0x3da   : > { %1542 = vrsqrt.f32 %v1124_v32  ;;  %vm1133_vm10 = vmor %vm1131_vm9, %vm1132_vm8  ;;  %vm1141_vm12 = vweird.f32 %v1124_v32 }
 0x3db   : > { %v1127_v34 = vmul.f32 %v1541_v31, %v1126_v33 }
 0x3dd   : > { %v1128_v35 = vmul.f32 0.5, %v1127_v34 }
 0x3df   : > { %v1129_v36 = vsub.f32 1.5, %v1128_v35 }
 0x3e0   : > { %v1543_v37 = vpop.eup %1542 }
 0x3e1   : > { %v1130_v38 = vmul.f32 %v1541_v31, %v1129_v36  ;;  %v1136_v39 = vmul.f32 %v1543_v37, %v1124_v32  ;;  %vm1142_vm11 = vweird.f32 %v1543_v37 }
 0x3e2   : > { %vm1143_vm13 = vmor %vm1141_vm12, %vm1142_vm11 }
 0x3e3   : > { %v1137_v40 = vmul.f32 %v1543_v37, %v1136_v39  ;;  %v1134_v41 = vsel %vm1133_vm10, %v1541_v31, %v1130_v38 }
 0x3e4   : > { %v1145_v45 = vmul.f32 %v1134_v41, %v1113_v20 }
 0x3e5   : > { %v1138_v42 = vmul.f32 0.5, %v1137_v40 }
 0x3e6   : > { %v1150_v49 = vmul.f32 %v1504_v44, %v1145_v45 }
 0x3e7   : > { %v1139_v43 = vsub.f32 1.5, %v1138_v42 }
 0x3e8   : > { %v1155_v52 = vadd.f32 %v1505_v48, %v1150_v49 }
 0x3e9   : > { %v1140_v46 = vmul.f32 %v1543_v37, %v1139_v43 }
 0x3eb   : > { %v1144_v47 = vsel %vm1143_vm13, %v1543_v37, %v1140_v46 }
 0x3ec   : > { %v1146_v50 = vmul.f32 %v1144_v47, %v1114_v24 }
 0x3ee   : > { %v1151_v51 = vmul.f32 %v1504_v44, %v1146_v50 }
 0x3f0   : > { %v1156_v53 = vadd.f32 %v1505_v48, %v1151_v51 }
 0x3f2   : > { %v1473_v54 = vpack.c.bf16 %v1156_v53, %v1155_v52 }
 0x3f4   : > { %1474 = vst [vmem:[%s523_s30] sm:$0xff] %v1473_v54  }
 0x3f5 PF: > { %s20_s15 = sadd.s32 1, %s1566_s15   ;;  %s1781_s13 = smov %s1562_s14 }
 0x3f6   : > { %p17_p5 = scmp.ge.s32.totalorder %s20_s15, 4   ;;  %s1782_s14 = smov %s1784_s16 }
 0x3f8   :  { %19 = sbr.rel (!%p17_p5) target bundleno = 2 (0x2), region = 108 }

// kernel: transformer_forward.20
= control target key start
LH: loop header
LB: loop body
LE: loop exit
PB: predicated region body
PF: predicated region fallthrough
CT: control target
= control target key end

     0   :  { %s1611_s13 = smov 0   ;;  %s1613_s14 = smov 0   ;;  %s1755_s0 = inlined_call_operand.vmem [shape: bf16[2,4,16,32], index: 0, kind: input, shape index: {}]   ;;  %s1756_s1 = inlined_call_operand.vmem [shape: bf16[2,4,16,32], index: 1, kind: input, shape index: {}]   ;;  %s1757_s2 = inlined_call_operand.vmem [shape: bf16[2,4,16,32], index: 2, kind: input, shape index: {}]   ;;  %s1758_s3 = inlined_call_operand.vmem [shape: f32[2,16,1], index: 3, kind: input, shape index: {}]   ;;  %s1759_s4 = inlined_call_operand.vmem [shape: f32[2,1,16], index: 4, kind: input, shape index: {}]   ;;  %s1760_s5 = inlined_call_operand.vmem [shape: bf16[2,16,128], index: 5, kind: input, shape index: {}]   ;;  %s1761_s6 = inlined_call_operand.vmem [shape: bf16[4,32,128], index: 6, kind: input, shape index: {}]   ;;  %s1762_s7 = inlined_call_operand.vmem [shape: f32[1,128], index: 7, kind: input, shape index: {}]   ;;  %s1763_s8 = inlined_call_operand.vmem [shape: f32[1,128], index: 8, kind: input, shape index: {}]   ;;  %s1764_s9 = inlined_call_operand.vmem [shape: f32[1,128], index: 9, kind: input, shape index: {}]   ;;  %s1765_s10 = inlined_call_operand.vmem [shape: bf16[2,16,128], index: 10, kind: output, shape index: {}]  }
   0x1   :  { %s1615_s15 = smov 0  }
   0x2 LB: > { %s32_s16 = sadd.s32 1, %s1547_s14  ;;  %p1306_p0 = scmp.ge.s32.totalorder %s1551_s15, 1  ;;  %s1551_s15 = sphi %s1615_s15, %s20_s15   ;;  %s1547_s14 = sphi %s1613_s14, %s1767_s14   ;;  %s1543_s13 = sphi %s1611_s13, %s1766_s13  }
   0x3   : > { %p34_p1 = scmp.ge.s32.totalorder %s32_s16, 2  ;;  %p395_p2 = scmp.lt.s32.totalorder %s1551_s15, 3 }
   0x5   : > { %s1769_s16 = smov (%p34_p1, %s32_s16), 0  ;;  %p396_p3 = pnand %p1306_p0, %p395_p2 }
   0x6   : > { %p473_p4 = scmp.lt.s32.totalorder (!%p396_p3), %s1543_s13, 1 }
   0x7   : > { %399 = sbr.rel (%p396_p3) target bundleno = 1013 (0x3f5), region = 60 }
   0xc   : > { %v1553_v0 = vmov 0   ;;  %s1771_s13 = smov (!%p473_p4, %s1543_s13), 1  ;;  %vm584_vm0 = vcmask 261120   ;;  %v1554_v10 = vmov 0.0   ;;  %vm695_vm4 = vcmask 130048  }
   0xd   : > { %1487 = vset.pattern.permute.xlu0 %v1553_v0  ;;  %s1632_s17 = sshll.u32 %s1771_s13, 5  ;;  %s1428_s18 = sshll.u32 %s1771_s13, 4 }
   0xe   : > { %s486_s21 = scalar_lea.vmem %s1756_s1, %s1632_s17  ;;  %s500_s24 = scalar_lea.vmem %s1758_s3, %s1428_s18 }
   0xf   : > { %v1435_v1 = vld [vmem:[%s486_s21] sm:$0xff]  ;;  %v1436_v2 = vld [vmem:[%s486_s21 + $0x8] sm:$0xff]  ;;  %v1437_v3 = vld [vmem:[%s486_s21 + $0x10] sm:$0xff]  ;;  %s480_s27 = scalar_lea.vmem %s1755_s0, %s1632_s17  ;;  %s504_s30 = scalar_lea.vmem %s1759_s4, %s1771_s13 }
  0x10   : > { %v1438_v4 = vld [vmem:[%s486_s21 + $0x18] sm:$0xff]  ;;  %v589_v5 = vsel %vm584_vm0, %v1435_v1, 0  ;;  %v619_v6 = vsel %vm584_vm0, %v1436_v2, 0  ;;  %v649_v7 = vsel %vm584_vm0, %v1437_v3, 0  ;;  %v553_v8 = vld [vmem:[%s500_s24] sm:$0xff]  ;;  %v554_v12 = vld [vmem:[%s500_s24 + $0x8] sm:$0xff]  ;;  %s491_s18 = scalar_lea.vmem %s1757_s2, %s1632_s17 }
  0x11   : > { %598 = vmatpush.bf16.xpose.msra.mxu0 %v589_v5  ;;  %628 = vmatpush.bf16.xpose.msra.mxu1 %v619_v6  ;;  %v679_v9 = vsel %vm584_vm0, %v1438_v4, 0  ;;  %vm555_vm1 = vcmp.eq.f32.partialorder %v553_v8, 0.0  ;;  %v1431_v13 = vld [vmem:[%s480_s27] sm:$0xff]  ;;  %v1432_v14 = vld [vmem:[%s480_s27 + $0x8] sm:$0xff]  ;;  %v1433_v15 = vld [vmem:[%s480_s27 + $0x10] sm:$0xff]  ;;  %vm556_vm2 = vcmp.eq.f32.partialorder %v554_v12, 0.0 }
  0x12   : > { %658 = vmatpush.bf16.xpose.msra.mxu2 %v649_v7  ;;  %688 = vmatpush.bf16.xpose.msra.mxu3 %v679_v9  ;;  %v557_v11 = vsel %vm555_vm1, -1e+09, %v1554_v10  ;;  %v1434_v16 = vld [vmem:[%s480_s27 + $0x18] sm:$0xff]  ;;  %v558_v17 = vsel %vm556_vm2, -1e+09, %v1554_v10  ;;  %s1429_s17 = sshll.u32 %s1771_s13, 3 }
  0x13   : > { %564 = vperm.xlu0 %1487, %v557_v11   ;;  %v550_v18 = vld [vmem:[%s504_s30] sm:$0x1]  ;;  %s513_s21 = scalar_lea.vmem %s1760_s5, %s1429_s17  ;;  %s523_s30 = scalar_lea.vmem %s1765_s10, %s1429_s17 }
  0x14   : > { %vm551_vm3 = vcmp.eq.f32.partialorder %v550_v18, 0.0 }
  0x15   : > { %v552_v19 = vsel %vm551_vm3, -1e+09, %v1554_v10 }
  0x16   : > { %v560_v20 = vperm.slane %v552_v19, 0 }
  0x18   : > { %1327 = vmatmul.msk.bf16.vlgmr.msra.gmra.mxu0 %vm584_vm0, %v1431_v13  ;;  %1336 = vmatmul.msk.bf16.vlgmr.msra.gmra.mxu1 %vm584_vm0, %v1432_v14 }
  0x19   : > { %1345 = vmatmul.msk.bf16.vlgmr.msra.gmra.mxu2 %vm584_vm0, %v1433_v15  ;;  %1354 = vmatmul.msk.bf16.vlgmr.msra.gmra.mxu3 %vm584_vm0, %v1434_v16 }
  0x1b   : > { %569 = vperm.xlu0 %1487, %v558_v17  }
  0x85   : > { %v565_v21 = vpop.permute.xlu0 %564 }
  0x86   : > { %v572_v22 = vadd.f32 %v565_v21, %v560_v20 }
  0x8d   : > { %v570_v32 = vpop.permute.xlu0 %569 }
  0x8e   : > { %v573_v33 = vadd.f32 %v570_v32, %v560_v20 }
  0x95   : > { %v600_v23 = vpop.f32.mrf.mxu0  ;;  %v630_v38 = vpop.f32.mrf.mxu1 }
  0x96   : > { %v601_v24 = vadd.f32 %v600_v23, %v572_v22  ;;  %v631_v42 = vadd.f32 %v630_v38, %v572_v22 }
  0x98   : > { %v696_v25 = vsel %vm695_vm4, %v601_v24, -inf  ;;  %v702_v44 = vsel %vm695_vm4, %v631_v42, -inf }
  0x99   : > { %697 = vmax.xlane.f32.xlu0 %v696_v25  ;;  %v1439_v25 = vld [vmem:[%s491_s18] sm:$0xff] }
  0x9a   : > { %813 = vmatpush.bf16.msrb.mxu0 %v1439_v25 }
  0x9c   : > { %v660_v26 = vpop.f32.mrf.mxu2  ;;  %v690_v27 = vpop.f32.mrf.mxu3 }
  0x9d   : > { %v661_v28 = vadd.f32 %v660_v26, %v572_v22  ;;  %v691_v29 = vadd.f32 %v690_v27, %v572_v22  ;;  %v602_v41 = vpop.f32.mrf.mxu0  ;;  %v632_v46 = vpop.f32.mrf.mxu1  ;;  %v1441_v27 = vld [vmem:[%s491_s18 + $0x10] sm:$0xff] }
  0x9e   : > { %v603_v43 = vadd.f32 %v602_v41, %v573_v33  ;;  %v633_v47 = vadd.f32 %v632_v46, %v573_v33  ;;  %869 = vmatpush.bf16.msrb.mxu2 %v1441_v27 }
  0x9f   : > { %v714_v30 = vsel %vm695_vm4, %v691_v29, -inf  ;;  %v708_v31 = vsel %vm695_vm4, %v661_v28, -inf }
  0xa0   : > { %715 = vmax.xlane.f32.xlu2 %v714_v30  ;;  %709 = vmax.xlane.f32.xlu1 %v708_v31  ;;  %v699_v45 = vsel %vm695_vm4, %v603_v43, -inf  ;;  %v705_v48 = vsel %vm695_vm4, %v633_v47, -inf  ;;  %v1440_v30 = vld [vmem:[%s491_s18 + $0x8] sm:$0xff] }
  0xa1   : > { %841 = vmatpush.bf16.msrb.mxu1 %v1440_v30 }
  0xa4   : > { %v662_v34 = vpop.f32.mrf.mxu2  ;;  %v692_v35 = vpop.f32.mrf.mxu3 }
  0xa5   : > { %v663_v36 = vadd.f32 %v662_v34, %v573_v33  ;;  %v693_v37 = vadd.f32 %v692_v35, %v573_v33 }
  0xa7   : > { %v717_v39 = vsel %vm695_vm4, %v693_v37, -inf  ;;  %v711_v40 = vsel %vm695_vm4, %v663_v36, -inf }
  0xa8   : > { %718 = vmax.xlane.f32.xlu2 %v717_v39  ;;  %712 = vmax.xlane.f32.xlu1 %v711_v40 }
  0xb0   : > { %703 = vmax.xlane.f32.xlu2 %v702_v44  ;;  %700 = vmax.xlane.f32.xlu1 %v699_v45 }
  0xb8   : > { %706 = vmax.xlane.f32.xlu1 %v705_v48 }
 0x10c   : > { %v698_v49 = vpop.xlane.xlu0 %697 }
 0x10d   : > { %v720_v50 = vsub.f32 %v601_v24, %v698_v49 }
 0x10f   : > { %v728_v51 = vmul.f32 1.442695, %v720_v50 }
 0x111   : > { %1491 = vpow2.f32 %v728_v51 }
 0x113   : > { %v716_v52 = vpop.xlane.xlu2 %715  ;;  %v710_v53 = vpop.xlane.xlu1 %709 }
 0x114   : > { %v724_v54 = vsub.f32 %v661_v28, %v710_v53  ;;  %v726_v57 = vsub.f32 %v691_v29, %v716_v52  ;;  %v1442_v28 = vld [vmem:[%s491_s18 + $0x18] sm:$0xff] }
 0x115   : > { %897 = vmatpush.bf16.msrb.mxu3 %v1442_v28 }
 0x116   : > { %v736_v55 = vmul.f32 1.442695, %v724_v54  ;;  %v740_v59 = vmul.f32 1.442695, %v726_v57 }
 0x117   : > { %v1666_v56 = vpop.eup %1491 }
 0x118   : > { %v744_v58 = vsel %vm695_vm4, %v1666_v56, 0.0  ;;  %1493 = vpow2.f32 %v736_v55 }
 0x119   : > { %745 = vadd.xlane.f32.xlu2 %v744_v58  ;;  %1495 = vpow2.f32 %v740_v59 }
 0x11b   : > { %v719_v60 = vpop.xlane.xlu2 %718  ;;  %v713_v61 = vpop.xlane.xlu1 %712 }
 0x11c   : > { %v725_v7 = vsub.f32 %v663_v36, %v713_v61  ;;  %v727_v12 = vsub.f32 %v693_v37, %v719_v60 }
 0x11e   : > { %v1670_v62 = vpop.eup %1493  ;;  %v738_v9 = vmul.f32 1.442695, %v725_v7  ;;  %v742_v15 = vmul.f32 1.442695, %v727_v12  ;;  %v1450_v12 = vld [vmem:[%s1761_s6 + $0x38] sm:$0xff] }
 0x11f   : > { %v756_v63 = vsel %vm695_vm4, %v1670_v62, 0.0  ;;  %v1674_v4 = vpop.eup %1495  ;;  %1061 = vmatpush.bf16.msra.mxu3 %v1450_v12 }
 0x120   : > { %v762_v8 = vsel %vm695_vm4, %v1674_v4, 0.0 }
 0x121   : > { %757 = vadd.xlane.f32.xlu2 %v756_v63 }
 0x123   : > { %v704_v0 = vpop.xlane.xlu2 %703  ;;  %v701_v1 = vpop.xlane.xlu1 %700 }
 0x124   : > { %v722_v2 = vsub.f32 %v631_v42, %v704_v0  ;;  %v721_v3 = vsub.f32 %v603_v43, %v701_v1 }
 0x126   : > { %v732_v5 = vmul.f32 1.442695, %v722_v2  ;;  %v730_v6 = vmul.f32 1.442695, %v721_v3 }
 0x128   : > { %1497 = vpow2.f32 %v732_v5 }
 0x129   : > { %1499 = vpow2.f32 %v730_v6  ;;  %763 = vadd.xlane.f32.xlu2 %v762_v8 }
 0x12a   : > { %1501 = vpow2.f32 %v738_v9  ;;  %v1444_v9 = vld [vmem:[%s1761_s6 + $0x8] sm:$0xff] }
 0x12b   : > { %v707_v16 = vpop.xlane.xlu1 %706  ;;  %1503 = vpow2.f32 %v742_v15  ;;  %981 = vmatpush.bf16.msra.mxu1 %v1444_v9  ;;  %v1449_v15 = vld [vmem:[%s1761_s6 + $0x30] sm:$0xff] }
 0x12c   : > { %v723_v18 = vsub.f32 %v633_v47, %v707_v16  ;;  %1062 = vmatpush.bf16.msra.mxu3 %v1449_v15 }
 0x12e   : > { %v1678_v10 = vpop.eup %1497  ;;  %v734_v20 = vmul.f32 1.442695, %v723_v18 }
 0x12f   : > { %v1500_v11 = vpop.eup %1499  ;;  %v750_v14 = vsel %vm695_vm4, %v1678_v10, 0.0 }
 0x130   : > { %v747_v13 = vsel %vm695_vm4, %v1500_v11, 0.0  ;;  %v1502_v17 = vpop.eup %1501  ;;  %1505 = vpow2.f32 %v734_v20 }
 0x131   : > { %748 = vadd.xlane.f32.xlu1 %v747_v13  ;;  %751 = vadd.xlane.f32.xlu2 %v750_v14  ;;  %v759_v19 = vsel %vm695_vm4, %v1502_v17, 0.0  ;;  %v1504_v21 = vpop.eup %1503  ;;  %v1447_v13 = vld [vmem:[%s1761_s6 + $0x20] sm:$0xff]  ;;  %v1446_v14 = vld [vmem:[%s1761_s6 + $0x18] sm:$0xff] }
 0x132   : > { %v765_v22 = vsel %vm695_vm4, %v1504_v21, 0.0  ;;  %947 = vmatpush.bf16.msra.mxu0 %v1446_v14 }
 0x136   : > { %v1506_v23 = vpop.eup %1505 }
 0x137   : > { %v753_v24 = vsel %vm695_vm4, %v1506_v23, 0.0 }
 0x139   : > { %760 = vadd.xlane.f32.xlu1 %v759_v19 }
 0x141   : > { %766 = vadd.xlane.f32.xlu1 %v765_v22 }
 0x149   : > { %754 = vadd.xlane.f32.xlu1 %v753_v24 }
 0x18c   : > { %v746_v26 = vpop.xlane.xlu2 %745 }
 0x18d   : > { %1507 = vrcp.f32 %v746_v26 }
 0x193   : > { %v1508_v32 = vpop.eup %1507 }
 0x194   : > { %v758_v29 = vpop.xlane.xlu2 %757  ;;  %v776_v33 = vmul.f32 %v1508_v32, %v1666_v56 }
 0x196   : > { %v784_v36 = vpack.c.bf16 %v776_v33, %v776_v33 }
 0x198   : > { %v794_v41 = vunpack.c.l.b16 %v784_v36 }
 0x19c   : > { %v764_v34 = vpop.xlane.xlu2 %763 }
 0x1a4   : > { %v749_v31 = vpop.xlane.xlu1 %748  ;;  %v752_v47 = vpop.xlane.xlu2 %751 }
 0x1a5   : > { %1509 = vrcp.f32 %v749_v31 }
 0x1a6   : > { %1511 = vrcp.f32 %v758_v29 }
 0x1ab   : > { %v1510_v35 = vpop.eup %1509 }
 0x1ac   : > { %v777_v37 = vmul.f32 %v1510_v35, %v1500_v11  ;;  %v761_v38 = vpop.xlane.xlu1 %760  ;;  %v1512_v39 = vpop.eup %1511  ;;  %v1448_v11 = vld [vmem:[%s1761_s6 + $0x28] sm:$0xff] }
 0x1ad   : > { %1513 = vrcp.f32 %v761_v38  ;;  %v780_v42 = vmul.f32 %v1512_v39, %v1670_v62  ;;  %1020 = vmatpush.bf16.msra.mxu2 %v1448_v11 }
 0x1ae   : > { %v785_v40 = vpack.c.bf16 %v777_v37, %v777_v37  ;;  %1515 = vrcp.f32 %v764_v34 }
 0x1af   : > { %v788_v46 = vpack.c.bf16 %v780_v42, %v780_v42 }
 0x1b0   : > { %v795_v43 = vunpack.c.l.b16 %v785_v40 }
 0x1b1   : > { %v850_v52 = vunpack.c.l.b16 %v788_v46  ;;  %1021 = vmatpush.bf16.msra.mxu2 %v1447_v13 }
 0x1b2   : > { %v796_v44 = vpack.c.b16 %v795_v43, %v794_v41 }
 0x1b3   : > { %v1514_v45 = vpop.eup %1513 }
 0x1b4   : > { %v781_v48 = vmul.f32 %v1514_v45, %v1502_v17  ;;  %v767_v49 = vpop.xlane.xlu1 %766  ;;  %1359 = vmatmul.msk.bf16.vlgmr.msrb.gmra.mxu0 %vm695_vm4, %v796_v44  ;;  %v1516_v50 = vpop.eup %1515  ;;  %v1445_v17 = vld [vmem:[%s1761_s6 + $0x10] sm:$0xff] }
 0x1b5   : > { %1517 = vrcp.f32 %v767_v49  ;;  %v782_v53 = vmul.f32 %v1516_v50, %v1674_v4  ;;  %948 = vmatpush.bf16.msra.mxu0 %v1445_v17  ;;  %v1452_v49 = vld [vmem:[%s513_s21] sm:$0xff]  }
 0x1b6   : > { %v789_v51 = vpack.c.bf16 %v781_v48, %v781_v48  ;;  %1519 = vrcp.f32 %v752_v47 }
 0x1b7   : > { %v790_v57 = vpack.c.bf16 %v782_v53, %v782_v53 }
 0x1b8   : > { %v851_v54 = vunpack.c.l.b16 %v789_v51  ;;  %v1488_v51 = vld [vmem:[%s1762_s7] ss:$0 sm:$0xff] }
 0x1b9   : > { %v878_v62 = vunpack.c.l.b16 %v790_v57 }
 0x1ba   : > { %v852_v55 = vpack.c.b16 %v851_v54, %v850_v52  ;;  %v1453_v54 = vunpack.c.l.bf16 %v1452_v49 }
 0x1bb   : > { %v1518_v56 = vpop.eup %1517 }
 0x1bc   : > { %v783_v58 = vmul.f32 %v1518_v56, %v1504_v21  ;;  %v755_v59 = vpop.xlane.xlu1 %754  ;;  %1369 = vmatmul.msk.bf16.vlgmr.msrb.gmra.mxu2 %vm695_vm4, %v852_v55  ;;  %v1520_v60 = vpop.eup %1519 }
 0x1bd   : > { %1521 = vrcp.f32 %v755_v59  ;;  %v778_v63 = vmul.f32 %v1520_v60, %v1678_v10  ;;  %v1443_v10 = vld [vmem:[%s1761_s6] sm:$0xff] }
 0x1be   : > { %v791_v61 = vpack.c.bf16 %v783_v58, %v783_v58  ;;  %982 = vmatpush.bf16.msra.mxu1 %v1443_v10 }
 0x1bf   : > { %v786_v3 = vpack.c.bf16 %v778_v63, %v778_v63 }
 0x1c0   : > { %v879_v0 = vunpack.c.l.b16 %v791_v61 }
 0x1c1   : > { %v822_v6 = vunpack.c.l.b16 %v786_v3  ;;  %v1555_v3 = vmov 128.0  }
 0x1c2   : > { %v880_v1 = vpack.c.b16 %v879_v0, %v878_v62  ;;  %v1454_v0 = vunpack.c.h.bf16 %v1452_v49  ;;  %1523 = vrcp.f32 %v1555_v3 }
 0x1c3   : > { %v1522_v2 = vpop.eup %1521 }
 0x1c4   : > { %v779_v5 = vmul.f32 %v1522_v2, %v1506_v23  ;;  %1374 = vmatmul.msk.bf16.vlgmr.msrb.gmra.mxu3 %vm695_vm4, %v880_v1 }
 0x1c6   : > { %v787_v4 = vpack.c.bf16 %v779_v5, %v779_v5 }
 0x1c8   : > { %v823_v7 = vunpack.c.l.b16 %v787_v4  ;;  %v1524_v5 = vpop.eup %1523 }
 0x1c9   : > { %v1090_v4 = vmul.f32 128.0, %v1524_v5  ;;  %vm1094_vm5 = vweird.f32 %v1524_v5 }
 0x1ca   : > { %v824_v8 = vpack.c.b16 %v823_v7, %v822_v6 }
 0x1cb   : > { %v1091_v6 = vsub.f32 1.0, %v1090_v4 }
 0x1cc   : > { %1364 = vmatmul.msk.bf16.vlgmr.msrb.gmra.mxu1 %vm695_vm4, %v824_v8 }
 0x1cd   : > { %v1092_v7 = vmul.f32 %v1524_v5, %v1091_v6 }
 0x1cf   : > { %v1093_v8 = vadd.f32 %v1524_v5, %v1092_v7 }
 0x1d1   : > { %v1095_v9 = vsel %vm1094_vm5, %v1524_v5, %v1093_v8 }
 0x231   : > { %v815_v16 = vpop.f32.mrf.mxu0 }
 0x232   : > { %v904_v18 = vpack.c.bf16 %v815_v16, %v815_v16 }
 0x234   : > { %v957_v21 = vunpack.c.l.b16 %v904_v18 }
 0x239   : > { %v817_v19 = vpop.f32.mrf.mxu0 }
 0x23a   : > { %v905_v20 = vpack.c.bf16 %v817_v19, %v817_v19 }
 0x23c   : > { %v958_v22 = vunpack.c.l.b16 %v905_v20 }
 0x23e   : > { %v959_v23 = vpack.c.b16 %v958_v22, %v957_v21 }
 0x23f   : > { %v871_v24 = vpop.f32.mrf.mxu2 }
 0x240   : > { %1396 = vmatmul.msk.bf16.vlgmr.msra.gmra.mxu1 %vm584_vm0, %v959_v23  ;;  %v908_v25 = vpack.c.bf16 %v871_v24, %v871_v24 }
 0x242   : > { %v996_v30 = vunpack.c.l.b16 %v908_v25 }
 0x247   : > { %v873_v26 = vpop.f32.mrf.mxu2  ;;  %v899_v27 = vpop.f32.mrf.mxu3 }
 0x248   : > { %v909_v28 = vpack.c.bf16 %v873_v26, %v873_v26  ;;  %v910_v33 = vpack.c.bf16 %v899_v27, %v899_v27 }
 0x249   : > { %v843_v29 = vpop.f32.mrf.mxu1 }
 0x24a   : > { %v997_v31 = vunpack.c.l.b16 %v909_v28  ;;  %v906_v35 = vpack.c.bf16 %v843_v29, %v843_v29  ;;  %v1037_v38 = vunpack.c.l.b16 %v910_v33 }
 0x24c   : > { %v998_v32 = vpack.c.b16 %v997_v31, %v996_v30  ;;  %v923_v41 = vunpack.c.l.b16 %v906_v35 }
 0x24e   : > { %1409 = vmatmul.msk.bf16.vlgmr.msra.gmra.mxu2 %vm584_vm0, %v998_v32 }
 0x24f   : > { %v901_v34 = vpop.f32.mrf.mxu3 }
 0x250   : > { %v911_v36 = vpack.c.bf16 %v901_v34, %v901_v34 }
 0x251   : > { %v845_v37 = vpop.f32.mrf.mxu1 }
 0x252   : > { %v1038_v39 = vunpack.c.l.b16 %v911_v36  ;;  %v907_v40 = vpack.c.bf16 %v845_v37, %v845_v37  ;;  %v1489_v36 = vld [vmem:[%s1763_s8] ss:$0 sm:$0xff] }
 0x254   : > { %v1039_v42 = vpack.c.b16 %v1038_v39, %v1037_v38  ;;  %v924_v43 = vunpack.c.l.b16 %v907_v40  ;;  %v1490_v40 = vld [vmem:[%s1764_s9] ss:$0 sm:$0xff] }
 0x256   : > { %v925_v44 = vpack.c.b16 %v924_v43, %v923_v41  ;;  %1422 = vmatmul.msk.bf16.vlgmr.msra.gmra.mxu3 %vm584_vm0, %v1039_v42 }
 0x258   : > { %1387 = vmatmul.msk.bf16.vlgmr.msra.gmra.mxu0 %vm584_vm0, %v925_v44 }
 0x2bd   : > { %v984_v45 = vpop.f32.mrf.mxu1 }
 0x2c5   : > { %v986_v56 = vpop.f32.mrf.mxu1 }
 0x2d1   : > { %v1023_v46 = vpop.f32.mrf.mxu2 }
 0x2d5   : > { %v950_v47 = vpop.f32.mrf.mxu0 }
 0x2d6   : > { %v985_v48 = vadd.f32 %v984_v45, %v950_v47 }
 0x2d8   : > { %v1028_v50 = vadd.f32 %v1023_v46, %v985_v48 }
 0x2d9   : > { %v1064_v52 = vpop.f32.mrf.mxu3  ;;  %v1025_v60 = vpop.f32.mrf.mxu2 }
 0x2da   : > { %v1069_v53 = vadd.f32 %v1064_v52, %v1028_v50 }
 0x2dc   : > { %v1075_v55 = vadd.f32 %v1488_v51, %v1069_v53 }
 0x2dd   : > { %v952_v57 = vpop.f32.mrf.mxu0 }
 0x2de   : > { %v987_v58 = vadd.f32 %v986_v56, %v952_v57  ;;  %v1081_v59 = vadd.f32 %v1453_v54, %v1075_v55 }
 0x2e0   : > { %1085 = vadd.xlane.f32.xlu2 %v1081_v59  ;;  %v1029_v61 = vadd.f32 %v1025_v60, %v987_v58 }
 0x2e1   : > { %v1066_v62 = vpop.f32.mrf.mxu3 }
 0x2e2   : > { %v1070_v63 = vadd.f32 %v1066_v62, %v1029_v61 }
 0x2e4   : > { %v1076_v1 = vadd.f32 %v1488_v51, %v1070_v63 }
 0x2e6   : > { %v1082_v2 = vadd.f32 %v1454_v0, %v1076_v1 }
 0x2e8   : > { %1087 = vadd.xlane.f32.xlu0 %v1082_v2 }
 0x353   : > { %v1086_v10 = vpop.xlane.xlu2 %1085 }
 0x354   : > { %v1096_v11 = vmul.f32 %v1095_v9, %v1086_v10 }
 0x356   : > { %v1098_v12 = vsub.f32 %v1081_v59, %v1096_v11 }
 0x358   : > { %v1100_v13 = vmul.f32 %v1098_v12, %v1098_v12 }
 0x35a   : > { %1102 = vadd.xlane.f32.xlu1 %v1100_v13 }
 0x35b   : > { %v1088_v14 = vpop.xlane.xlu0 %1087 }
 0x35c   : > { %v1097_v15 = vmul.f32 %v1095_v9, %v1088_v14 }
 0x35e   : > { %v1099_v16 = vsub.f32 %v1082_v2, %v1097_v15 }
 0x360   : > { %v1101_v17 = vmul.f32 %v1099_v16, %v1099_v16 }
 0x362   : > { %1104 = vadd.xlane.f32.xlu2 %v1101_v17 }
 0x3cd   : > { %v1103_v18 = vpop.xlane.xlu1 %1102 }
 0x3ce   : > { %v1106_v19 = vmul.f32 %v1103_v18, %v1095_v9 }
 0x3d0   : > { %v1108_v20 = vadd.f32 1e-05, %v1106_v19 }
 0x3d2   : > { %1525 = vrsqrt.f32 %v1108_v20  ;;  %vm1116_vm7 = vweird.f32 %v1108_v20 }
 0x3d5   : > { %v1105_v21 = vpop.xlane.xlu2 %1104 }
 0x3d6   : > { %v1107_v22 = vmul.f32 %v1105_v21, %v1095_v9 }
 0x3d8   : > { %v1526_v23 = vpop.eup %1525  ;;  %v1109_v24 = vadd.f32 1e-05, %v1107_v22 }
 0x3d9   : > { %v1111_v25 = vmul.f32 %v1526_v23, %v1108_v20  ;;  %vm1117_vm6 = vweird.f32 %v1526_v23 }
 0x3da   : > { %1527 = vrsqrt.f32 %v1109_v24  ;;  %vm1118_vm8 = vmor %vm1116_vm7, %vm1117_vm6  ;;  %vm1126_vm10 = vweird.f32 %v1109_v24 }
 0x3db   : > { %v1112_v26 = vmul.f32 %v1526_v23, %v1111_v25 }
 0x3dd   : > { %v1113_v27 = vmul.f32 0.5, %v1112_v26 }
 0x3df   : > { %v1114_v28 = vsub.f32 1.5, %v1113_v27 }
 0x3e0   : > { %v1528_v29 = vpop.eup %1527 }
 0x3e1   : > { %v1115_v30 = vmul.f32 %v1526_v23, %v1114_v28  ;;  %v1121_v31 = vmul.f32 %v1528_v29, %v1109_v24  ;;  %vm1127_vm9 = vweird.f32 %v1528_v29 }
 0x3e2   : > { %vm1128_vm11 = vmor %vm1126_vm10, %vm1127_vm9 }
 0x3e3   : > { %v1122_v32 = vmul.f32 %v1528_v29, %v1121_v31  ;;  %v1119_v33 = vsel %vm1118_vm8, %v1526_v23, %v1115_v30 }
 0x3e4   : > { %v1130_v37 = vmul.f32 %v1119_v33, %v1098_v12 }
 0x3e5   : > { %v1123_v34 = vmul.f32 0.5, %v1122_v32 }
 0x3e6   : > { %v1135_v41 = vmul.f32 %v1489_v36, %v1130_v37 }
 0x3e7   : > { %v1124_v35 = vsub.f32 1.5, %v1123_v34 }
 0x3e8   : > { %v1140_v44 = vadd.f32 %v1490_v40, %v1135_v41 }
 0x3e9   : > { %v1125_v38 = vmul.f32 %v1528_v29, %v1124_v35 }
 0x3eb   : > { %v1129_v39 = vsel %vm1128_vm11, %v1528_v29, %v1125_v38 }
 0x3ec   : > { %v1131_v42 = vmul.f32 %v1129_v39, %v1099_v16 }
 0x3ee   : > { %v1136_v43 = vmul.f32 %v1489_v36, %v1131_v42 }
 0x3f0   : > { %v1141_v45 = vadd.f32 %v1490_v40, %v1136_v43 }
 0x3f2   : > { %v1458_v46 = vpack.c.bf16 %v1141_v45, %v1140_v44 }
 0x3f4   : > { %1459 = vst [vmem:[%s523_s30] sm:$0xff] %v1458_v46  }
 0x3f5 PF: > { %s20_s15 = sadd.s32 1, %s1551_s15   ;;  %s1766_s13 = smov %s1547_s14 }
 0x3f6   : > { %p17_p5 = scmp.ge.s32.totalorder %s20_s15, 4   ;;  %s1767_s14 = smov %s1769_s16 }
 0x3f8   :  { %19 = sbr.rel (!%p17_p5) target bundleno = 2 (0x2), region = 108 }

// kernel: transformer_forward.28
= control target key start
LH: loop header
LB: loop body
LE: loop exit
PB: predicated region body
PF: predicated region fallthrough
CT: control target
= control target key end

     0   :  { %s661_s12 = smov 0   ;;  %s663_s13 = smov 0   ;;  %s800_s0 = inlined_call_operand.vmem [shape: bf16[32,128], index: 0, kind: input, shape index: {}]   ;;  %s801_s1 = inlined_call_operand.vmem [shape: bf16[128,256], index: 1, kind: input, shape index: {}]   ;;  %s802_s2 = inlined_call_operand.vmem [shape: f32[1,256], index: 2, kind: input, shape index: {}]   ;;  %s803_s3 = inlined_call_operand.vmem [shape: bf16[32,256], index: 3, kind: output, shape index: {}]  }
   0x1   :  { %s665_s14 = smov 0  }
   0x2 LB: > { %s25_s15 = sadd.s32 1, %s635_s13  ;;  %p499_p0 = scmp.ge.s32.totalorder %s639_s14, 1  ;;  %s639_s14 = sphi %s665_s14, %s13_s14   ;;  %s635_s13 = sphi %s663_s13, %s805_s13   ;;  %s631_s12 = sphi %s661_s12, %s804_s12  }
   0x3   : > { %p27_p1 = scmp.ge.s32.totalorder %s25_s15, 2  ;;  %p173_p2 = scmp.lt.s32.totalorder %s639_s14, 3 }
   0x5   : > { %s807_s15 = smov (%p27_p1, %s25_s15), 0  ;;  %p174_p3 = pnand %p499_p0, %p173_p2 }
   0x6   : > { %s500_s6 = sshll.u32 (!%p174_p3), %s631_s12, 1 }
   0x7   : > { %177 = sbr.rel (%p174_p3) target bundleno = 186 (0xba), region = 32  ;;  %p212_p4 = scmp.lt.s32.totalorder (!%p174_p3), %s500_s6, 3 }
   0xc   : > { %v567_v0 = vld [vmem:[%s801_s1 + $0x70] sm:$0xf]  ;;  %v592_v1 = vld [vmem:[%s801_s1 + $0x74] sm:$0xf0]  ;;  %v591_v2 = vld [vmem:[%s801_s1 + $0x74] sm:$0xf] }
   0xd   : > { %v568_v3 = vor.u32 %v592_v1, %v567_v0  ;;  %v569_v4 = vld [vmem:[%s801_s1 + $0x78] sm:$0xf0]  ;;  %v559_v5 = vld [vmem:[%s801_s1 + $0x60] sm:$0xf]  ;;  %v590_v6 = vld [vmem:[%s801_s1 + $0x64] sm:$0xf0] }
   0xe   : > { %v572_v7 = vor.u32 %v591_v2, %v569_v4  ;;  %v589_v8 = vld [vmem:[%s801_s1 + $0x64] sm:$0xf]  ;;  %v561_v9 = vld [vmem:[%s801_s1 + $0x68] sm:$0xf0]  ;;  %v560_v10 = vor.u32 %v590_v6, %v559_v5  ;;  %v551_v12 = vld [vmem:[%s801_s1 + $0x50] sm:$0xf] }
   0xf   : > { %350 = vmatpush.bf16.msra.mxu0 %v568_v3  ;;  %v564_v11 = vor.u32 %v589_v8, %v561_v9  ;;  %v588_v13 = vld [vmem:[%s801_s1 + $0x54] sm:$0xf0]  ;;  %v587_v14 = vld [vmem:[%s801_s1 + $0x54] sm:$0xf]  ;;  %v553_v15 = vld [vmem:[%s801_s1 + $0x58] sm:$0xf0] }
  0x10   : > { %364 = vmatpush.bf16.msra.mxu1 %v572_v7  ;;  %v552_v16 = vor.u32 %v588_v13, %v551_v12  ;;  %v556_v17 = vor.u32 %v587_v14, %v553_v15  ;;  %v543_v18 = vld [vmem:[%s801_s1 + $0x40] sm:$0xf]  ;;  %v586_v19 = vld [vmem:[%s801_s1 + $0x44] sm:$0xf0]  ;;  %v585_v20 = vld [vmem:[%s801_s1 + $0x44] sm:$0xf] }
  0x11   : > { %v545_v21 = vld [vmem:[%s801_s1 + $0x48] sm:$0xf0]  ;;  %v544_v22 = vor.u32 %v586_v19, %v543_v18  ;;  %v535_v24 = vld [vmem:[%s801_s1 + $0x30] sm:$0xf]  ;;  %v584_v25 = vld [vmem:[%s801_s1 + $0x34] sm:$0xf0] }
  0x12   : > { %v548_v23 = vor.u32 %v585_v20, %v545_v21  ;;  %v583_v26 = vld [vmem:[%s801_s1 + $0x34] sm:$0xf]  ;;  %v537_v27 = vld [vmem:[%s801_s1 + $0x38] sm:$0xf0]  ;;  %v536_v28 = vor.u32 %v584_v25, %v535_v24  ;;  %v527_v30 = vld [vmem:[%s801_s1 + $0x20] sm:$0xf] }
  0x13   : > { %351 = vmatpush.bf16.msra.mxu0 %v560_v10  ;;  %v540_v29 = vor.u32 %v583_v26, %v537_v27  ;;  %v582_v31 = vld [vmem:[%s801_s1 + $0x24] sm:$0xf0]  ;;  %v581_v32 = vld [vmem:[%s801_s1 + $0x24] sm:$0xf]  ;;  %v529_v33 = vld [vmem:[%s801_s1 + $0x28] sm:$0xf0] }
  0x14   : > { %365 = vmatpush.bf16.msra.mxu1 %v564_v11  ;;  %v528_v34 = vor.u32 %v582_v31, %v527_v30  ;;  %v532_v35 = vor.u32 %v581_v32, %v529_v33  ;;  %v519_v36 = vld [vmem:[%s801_s1 + $0x10] sm:$0xf]  ;;  %v580_v37 = vld [vmem:[%s801_s1 + $0x14] sm:$0xf0]  ;;  %s809_s6 = smov (!%p212_p4, %s500_s6), 3 }
  0x15   : > { %v579_v38 = vld [vmem:[%s801_s1 + $0x14] sm:$0xf]  ;;  %v521_v39 = vld [vmem:[%s801_s1 + $0x18] sm:$0xf0]  ;;  %v520_v40 = vor.u32 %v580_v37, %v519_v36  ;;  %v511_v42 = vld [vmem:[%s801_s1] sm:$0xf] }
  0x16   : > { %v524_v41 = vor.u32 %v579_v38, %v521_v39  ;;  %v578_v43 = vld [vmem:[%s801_s1 + $0x4] sm:$0xf0]  ;;  %s501_s30 = sshll.u32 %s809_s6, 2  ;;  %v577_v44 = vld [vmem:[%s801_s1 + $0x4] sm:$0xf]  ;;  %s575_s18 = sshll.u32 %s809_s6, 3 }
  0x17   : > { %352 = vmatpush.bf16.msra.mxu0 %v552_v16  ;;  %v513_v45 = vld [vmem:[%s801_s1 + $0x8] sm:$0xf0]  ;;  %v512_v46 = vor.u32 %v578_v43, %v511_v42  ;;  %s215_s11 = scalar_lea.vmem %s800_s0, %s501_s30  ;;  %v258_v49 = vld [vmem:[%s802_s2] sm:$0x3]  ;;  %s237_s20 = scalar_lea.vmem %s803_s3, %s575_s18 }
  0x18   : > { %366 = vmatpush.bf16.msra.mxu1 %v556_v17  ;;  %v516_v47 = vor.u32 %v577_v44, %v513_v45  ;;  %v576_v48 = vld [vmem:[%s215_s11] sm:$0xff]  ;;  %v260_v50 = vperm.slane %v258_v49, 0  ;;  %v261_v51 = vperm.slane %v258_v49, 1 }
  0x1b   : > { %353 = vmatpush.bf16.msra.mxu0 %v544_v22 }
  0x1c   : > { %367 = vmatpush.bf16.msra.mxu1 %v548_v23 }
  0x1f   : > { %354 = vmatpush.bf16.msra.mxu0 %v536_v28 }
  0x20   : > { %368 = vmatpush.bf16.msra.mxu1 %v540_v29 }
  0x23   : > { %355 = vmatpush.bf16.msra.mxu0 %v528_v34 }
  0x24   : > { %369 = vmatpush.bf16.msra.mxu1 %v532_v35 }
  0x27   : > { %356 = vmatpush.bf16.msra.mxu0 %v520_v40 }
  0x28   : > { %370 = vmatpush.bf16.msra.mxu1 %v524_v41 }
  0x2b   : > { %357 = vmatpush.bf16.msra.mxu0 %v512_v46 }
  0x2c   : > { %371 = vmatpush.bf16.msra.mxu1 %v516_v47 }
  0x2e   : > { %358 = vmatmul.bf16.vlgmr.msra.gmra.mxu0 %v576_v48 }
  0x2f   : > { %372 = vmatmul.bf16.vlgmr.msra.gmra.mxu1 %v576_v48 }
  0xab   : > { %v359_v52 = vpop.f32.mrf.mxu0 }
  0xac   : > { %v360_v53 = vadd.f32 %v359_v52, %v260_v50  ;;  %v373_v54 = vpop.f32.mrf.mxu1 }
  0xad   : > { %v374_v55 = vadd.f32 %v373_v54, %v261_v51 }
  0xaf   : > { %v378_v56 = vpack.c.bf16 %v374_v55, %v360_v53 }
  0xb1   : > { %380 = vst [vmem:[%s237_s20] sm:$0xff] %v378_v56 }
  0xb3   : > { %v361_v57 = vpop.f32.mrf.mxu0 }
  0xb4   : > { %v362_v58 = vadd.f32 %v361_v57, %v260_v50  ;;  %v375_v59 = vpop.f32.mrf.mxu1 }
  0xb5   : > { %v376_v60 = vadd.f32 %v375_v59, %v261_v51 }
  0xb7   : > { %v379_v61 = vpack.c.bf16 %v376_v60, %v362_v58 }
  0xb9   : > { %381 = vst [vmem:[%s237_s20 + $0x8] sm:$0xff] %v379_v61 }
  0xba PF: > { %s13_s14 = sadd.s32 1, %s639_s14   ;;  %s804_s12 = smov %s635_s13 }
  0xbb   : > { %p10_p5 = scmp.ge.s32.totalorder %s13_s14, 4   ;;  %s805_s13 = smov %s807_s15 }
  0xbd   :  { %12 = sbr.rel (!%p10_p5) target bundleno = 2 (0x2), region = 68 }

// kernel: transformer_forward.21
= control target key start
LH: loop header
LB: loop body
LE: loop exit
PB: predicated region body
PF: predicated region fallthrough
CT: control target
= control target key end

     0   :  { %s957_s24 = smov 0   ;;  %s1143_s0 = inlined_call_operand.vmem [shape: bf16[32,128], index: 0, kind: input, shape index: {}]   ;;  %s1144_s1 = inlined_call_operand.vmem [shape: bf16[128,256], index: 1, kind: input, shape index: {}]   ;;  %s1145_s2 = inlined_call_operand.vmem [shape: f32[1,256], index: 2, kind: input, shape index: {}]   ;;  %s1146_s3 = inlined_call_operand.vmem [shape: bf16[256,128], index: 3, kind: input, shape index: {}]   ;;  %s1147_s4 = inlined_call_operand.vmem [shape: f32[1,128], index: 4, kind: input, shape index: {}]   ;;  %s1148_s5 = inlined_call_operand.vmem [shape: f32[1,128], index: 5, kind: input, shape index: {}]   ;;  %s1149_s6 = inlined_call_operand.vmem [shape: f32[1,128], index: 6, kind: input, shape index: {}]   ;;  %s1150_s7 = inlined_call_operand.vmem [shape: bf16[32,128], index: 7, kind: output, shape index: {}]  }
   0x1 LB: > { %s709_s25 = sadd.s32 4294967295, %s914_s24   ;;  %p713_p0 = scmp.ge.s32.totalorder %s914_s24, 1  ;;  %s914_s24 = sphi %s957_s24, %s17_s24  }
   0x2   : > { %p238_p1 = scmp.lt.s32.totalorder %s914_s24, 3 }
   0x4   : > { %p239_p2 = pnand %p713_p0, %p238_p1 }
   0x5   : > { %s714_s30 = sshll.u32 (!%p239_p2), %s709_s25, 1 }
   0x6   : > { %242 = sbr.rel (%p239_p2) target bundleno = 600 (0x258), region = 48  ;;  %p271_p3 = scmp.lt.s32.totalorder (!%p239_p2), %s714_s30, 3 }
   0xb   : > { %v780_v0 = vld [vmem:[%s1144_s1 + $0x70] sm:$0xf]  ;;  %v868_v1 = vld [vmem:[%s1144_s1 + $0x74] sm:$0xf0]  ;;  %v867_v2 = vld [vmem:[%s1144_s1 + $0x74] sm:$0xf] }
   0xc   : > { %v781_v3 = vor.u32 %v868_v1, %v780_v0  ;;  %v782_v4 = vld [vmem:[%s1144_s1 + $0x78] sm:$0xf0]  ;;  %v772_v5 = vld [vmem:[%s1144_s1 + $0x60] sm:$0xf]  ;;  %v866_v6 = vld [vmem:[%s1144_s1 + $0x64] sm:$0xf0] }
   0xd   : > { %v785_v7 = vor.u32 %v867_v2, %v782_v4  ;;  %v865_v8 = vld [vmem:[%s1144_s1 + $0x64] sm:$0xf]  ;;  %v774_v9 = vld [vmem:[%s1144_s1 + $0x68] sm:$0xf0]  ;;  %v773_v10 = vor.u32 %v866_v6, %v772_v5  ;;  %v764_v12 = vld [vmem:[%s1144_s1 + $0x50] sm:$0xf] }
   0xe   : > { %392 = vmatpush.bf16.msra.mxu0 %v781_v3  ;;  %v777_v11 = vor.u32 %v865_v8, %v774_v9  ;;  %v864_v13 = vld [vmem:[%s1144_s1 + $0x54] sm:$0xf0]  ;;  %v863_v14 = vld [vmem:[%s1144_s1 + $0x54] sm:$0xf]  ;;  %v766_v15 = vld [vmem:[%s1144_s1 + $0x58] sm:$0xf0] }
   0xf   : > { %406 = vmatpush.bf16.msra.mxu1 %v785_v7  ;;  %v765_v16 = vor.u32 %v864_v13, %v764_v12  ;;  %v769_v17 = vor.u32 %v863_v14, %v766_v15  ;;  %v756_v18 = vld [vmem:[%s1144_s1 + $0x40] sm:$0xf]  ;;  %v862_v19 = vld [vmem:[%s1144_s1 + $0x44] sm:$0xf0]  ;;  %v861_v20 = vld [vmem:[%s1144_s1 + $0x44] sm:$0xf] }
  0x10   : > { %v758_v21 = vld [vmem:[%s1144_s1 + $0x48] sm:$0xf0]  ;;  %v876_v22 = vld [vmem:[%s1146_s3 + $0x38] sm:$0xff]  ;;  %v757_v23 = vor.u32 %v862_v19, %v756_v18  ;;  %v748_v24 = vld [vmem:[%s1144_s1 + $0x30] sm:$0xf]  ;;  %s1152_s30 = smov (!%p271_p3, %s714_s30), 3 }
  0x11   : > { %v884_v25 = vld [vmem:[%s1146_s3 + $0x78] sm:$0xff]  ;;  %v761_v26 = vor.u32 %v861_v20, %v758_v21  ;;  %v859_v28 = vld [vmem:[%s1144_s1 + $0x34] sm:$0xf]  ;;  %558 = vmatpush.bf16.msra.mxu2 %v876_v22  ;;  %v740_v34 = vld [vmem:[%s1144_s1 + $0x20] sm:$0xf]  ;;  %s715_s16 = sshll.u32 %s1152_s30, 2 }
  0x12   : > { %393 = vmatpush.bf16.msra.mxu0 %v773_v10  ;;  %v860_v27 = vld [vmem:[%s1144_s1 + $0x34] sm:$0xf0]  ;;  %v875_v29 = vld [vmem:[%s1146_s3 + $0x30] sm:$0xff]  ;;  %v750_v30 = vld [vmem:[%s1144_s1 + $0x38] sm:$0xf0]  ;;  %572 = vmatpush.bf16.msra.mxu3 %v884_v25  ;;  %s1095_s23 = scalar_lea.vmem %s1143_s0, %s715_s16  ;;  %s280_s10 = scalar_lea.vmem %s1150_s7, %s715_s16 }
  0x13   : > { %407 = vmatpush.bf16.msra.mxu1 %v777_v11  ;;  %v883_v31 = vld [vmem:[%s1146_s3 + $0x70] sm:$0xff]  ;;  %v749_v32 = vor.u32 %v860_v27, %v748_v24  ;;  %v753_v33 = vor.u32 %v859_v28, %v750_v30  ;;  %v858_v35 = vld [vmem:[%s1144_s1 + $0x24] sm:$0xf0]  ;;  %v857_v37 = vld [vmem:[%s1144_s1 + $0x24] sm:$0xf] }
  0x14   : > { %v874_v36 = vld [vmem:[%s1146_s3 + $0x28] sm:$0xff]  ;;  %v741_v40 = vor.u32 %v858_v35, %v740_v34  ;;  %v732_v42 = vld [vmem:[%s1144_s1 + $0x10] sm:$0xf]  ;;  %v856_v43 = vld [vmem:[%s1144_s1 + $0x14] sm:$0xf0] }
  0x15   : > { %559 = vmatpush.bf16.msra.mxu2 %v875_v29  ;;  %v742_v38 = vld [vmem:[%s1144_s1 + $0x28] sm:$0xf0]  ;;  %v873_v44 = vld [vmem:[%s1146_s3 + $0x20] sm:$0xff]  ;;  %v855_v45 = vld [vmem:[%s1144_s1 + $0x14] sm:$0xf]  ;;  %v733_v48 = vor.u32 %v856_v43, %v732_v42 }
  0x16   : > { %394 = vmatpush.bf16.msra.mxu0 %v765_v16  ;;  %573 = vmatpush.bf16.msra.mxu3 %v883_v31  ;;  %v882_v39 = vld [vmem:[%s1146_s3 + $0x68] sm:$0xff]  ;;  %v745_v41 = vor.u32 %v857_v37, %v742_v38  ;;  %v734_v46 = vld [vmem:[%s1144_s1 + $0x18] sm:$0xf0]  ;;  %v881_v47 = vld [vmem:[%s1146_s3 + $0x60] sm:$0xff] }
  0x17   : > { %408 = vmatpush.bf16.msra.mxu1 %v769_v17  ;;  %v737_v49 = vor.u32 %v855_v45, %v734_v46  ;;  %v724_v50 = vld [vmem:[%s1144_s1] sm:$0xf]  ;;  %v854_v51 = vld [vmem:[%s1144_s1 + $0x4] sm:$0xf0]  ;;  %v853_v52 = vld [vmem:[%s1144_s1 + $0x4] sm:$0xf] }
  0x18   : > { %v726_v53 = vld [vmem:[%s1144_s1 + $0x8] sm:$0xf0]  ;;  %v725_v54 = vor.u32 %v854_v51, %v724_v50  ;;  %v852_v56 = vld [vmem:[%s1095_s23] sm:$0xff]  ;;  %v872_v57 = vld [vmem:[%s1146_s3 + $0x18] sm:$0xff] }
  0x19   : > { %560 = vmatpush.bf16.msra.mxu2 %v874_v36  ;;  %v729_v55 = vor.u32 %v853_v52, %v726_v53  ;;  %v880_v58 = vld [vmem:[%s1146_s3 + $0x58] sm:$0xff]  ;;  %v871_v59 = vld [vmem:[%s1146_s3 + $0x10] sm:$0xff]  ;;  %v870_v61 = vld [vmem:[%s1146_s3 + $0x8] sm:$0xff] }
  0x1a   : > { %395 = vmatpush.bf16.msra.mxu0 %v757_v23  ;;  %574 = vmatpush.bf16.msra.mxu3 %v882_v39  ;;  %v879_v60 = vld [vmem:[%s1146_s3 + $0x50] sm:$0xff]  ;;  %v878_v62 = vld [vmem:[%s1146_s3 + $0x48] sm:$0xff]  ;;  %v869_v63 = vld [vmem:[%s1146_s3] sm:$0xff] }
  0x1b   : > { %409 = vmatpush.bf16.msra.mxu1 %v761_v26  ;;  %v877_v0 = vld [vmem:[%s1146_s3 + $0x40] sm:$0xff] }
  0x1c   : > { %v300_v1 = vld [vmem:[%s1145_s2] sm:$0x3] }
  0x1d   : > { %561 = vmatpush.bf16.msra.mxu2 %v873_v44  ;;  %v302_v4 = vperm.slane %v300_v1, 0  ;;  %v303_v5 = vperm.slane %v300_v1, 1  ;;  %v899_v18 = vld [vmem:[%s1147_s4] ss:$0 sm:$0xff] }
  0x1e   : > { %396 = vmatpush.bf16.msra.mxu0 %v749_v32  ;;  %575 = vmatpush.bf16.msra.mxu3 %v881_v47  ;;  %v282_v19 = vld [vmem:[%s1095_s23] sm:$0xff]   ;;  %v916_v32 = vmov 128.0  }
  0x1f   : > { %410 = vmatpush.bf16.msra.mxu1 %v753_v33  ;;  %v586_v23 = vunpack.c.l.bf16 %v282_v19  ;;  %v587_v28 = vunpack.c.h.bf16 %v282_v19  ;;  %902 = vrcp.f32 %v916_v32  ;;  %v900_v1 = vld [vmem:[%s1148_s5] ss:$0 sm:$0xff] }
  0x21   : > { %562 = vmatpush.bf16.msra.mxu2 %v872_v57 }
  0x22   : > { %397 = vmatpush.bf16.msra.mxu0 %v741_v40  ;;  %576 = vmatpush.bf16.msra.mxu3 %v880_v58 }
  0x23   : > { %411 = vmatpush.bf16.msra.mxu1 %v745_v41 }
  0x25   : > { %563 = vmatpush.bf16.msra.mxu2 %v871_v59  ;;  %v903_v33 = vpop.eup %902 }
  0x26   : > { %398 = vmatpush.bf16.msra.mxu0 %v733_v48  ;;  %577 = vmatpush.bf16.msra.mxu3 %v879_v60  ;;  %v597_v34 = vmul.f32 128.0, %v903_v33  ;;  %vm601_vm0 = vweird.f32 %v903_v33 }
  0x27   : > { %412 = vmatpush.bf16.msra.mxu1 %v737_v49 }
  0x28   : > { %v598_v35 = vsub.f32 1.0, %v597_v34 }
  0x29   : > { %564 = vmatpush.bf16.msra.mxu2 %v870_v61 }
  0x2a   : > { %399 = vmatpush.bf16.msra.mxu0 %v725_v54  ;;  %578 = vmatpush.bf16.msra.mxu3 %v878_v62  ;;  %v599_v36 = vmul.f32 %v903_v33, %v598_v35 }
  0x2b   : > { %413 = vmatpush.bf16.msra.mxu1 %v729_v55 }
  0x2c   : > { %v600_v37 = vadd.f32 %v903_v33, %v599_v36 }
  0x2d   : > { %400 = vmatmul.bf16.vlgmr.msra.gmra.mxu0 %v852_v56  ;;  %565 = vmatpush.bf16.msra.mxu2 %v869_v63 }
  0x2e   : > { %414 = vmatmul.bf16.vlgmr.msra.gmra.mxu1 %v852_v56  ;;  %579 = vmatpush.bf16.msra.mxu3 %v877_v0  ;;  %v602_v38 = vsel %vm601_vm0, %v903_v33, %v600_v37 }
  0xaa   : > { %v401_v2 = vpop.f32.mrf.mxu0 }
  0xab   : > { %v415_v3 = vpop.f32.mrf.mxu1  ;;  %v402_v6 = vadd.f32 %v401_v2, %v302_v4 }
  0xac   : > { %v416_v7 = vadd.f32 %v415_v3, %v303_v5 }
  0xad   : > { %v420_v12 = vmax.f32 %v402_v6, 0.0 }
  0xae   : > { %v421_v14 = vmax.f32 %v416_v7, 0.0 }
  0xb2   : > { %v403_v8 = vpop.f32.mrf.mxu0 }
  0xb3   : > { %v404_v9 = vadd.f32 %v403_v8, %v302_v4  ;;  %v417_v10 = vpop.f32.mrf.mxu1 }
  0xb4   : > { %v418_v11 = vadd.f32 %v417_v10, %v303_v5  ;;  %v901_v5 = vld [vmem:[%s1149_s6] ss:$0 sm:$0xff] }
  0xb5   : > { %v422_v13 = vmax.f32 %v404_v9, 0.0 }
  0xb6   : > { %v423_v15 = vmax.f32 %v418_v11, 0.0 }
  0xb7   : > { %v424_v16 = vpack.c.bf16 %v422_v13, %v420_v12 }
  0xb8   : > { %v425_v17 = vpack.c.bf16 %v423_v15, %v421_v14 }
  0xb9   : > { %566 = vmatmul.bf16.vlgmr.msra.gmra.mxu2 %v424_v16 }
  0xba   : > { %580 = vmatmul.bf16.vlgmr.msra.gmra.mxu3 %v425_v17 }
 0x13c   : > { %v567_v20 = vpop.f32.mrf.mxu2 }
 0x13d   : > { %v568_v21 = vadd.f32 %v899_v18, %v567_v20  ;;  %v581_v22 = vpop.f32.mrf.mxu3 }
 0x13f   : > { %v582_v24 = vadd.f32 %v581_v22, %v568_v21 }
 0x141   : > { %v588_v25 = vadd.f32 %v586_v23, %v582_v24 }
 0x143   : > { %592 = vadd.xlane.f32.xlu0 %v588_v25 }
 0x144   : > { %v569_v26 = vpop.f32.mrf.mxu2 }
 0x145   : > { %v570_v27 = vadd.f32 %v899_v18, %v569_v26  ;;  %v583_v29 = vpop.f32.mrf.mxu3 }
 0x147   : > { %v584_v30 = vadd.f32 %v583_v29, %v570_v27 }
 0x149   : > { %v589_v31 = vadd.f32 %v587_v28, %v584_v30 }
 0x14b   : > { %594 = vadd.xlane.f32.xlu0 %v589_v31 }
 0x1b6   : > { %v593_v39 = vpop.xlane.xlu0 %592 }
 0x1b7   : > { %v603_v40 = vmul.f32 %v602_v38, %v593_v39 }
 0x1b9   : > { %v605_v41 = vsub.f32 %v588_v25, %v603_v40 }
 0x1bb   : > { %v607_v42 = vmul.f32 %v605_v41, %v605_v41 }
 0x1bd   : > { %609 = vadd.xlane.f32.xlu1 %v607_v42 }
 0x1be   : > { %v595_v43 = vpop.xlane.xlu0 %594 }
 0x1bf   : > { %v604_v44 = vmul.f32 %v602_v38, %v595_v43 }
 0x1c1   : > { %v606_v45 = vsub.f32 %v589_v31, %v604_v44 }
 0x1c3   : > { %v608_v46 = vmul.f32 %v606_v45, %v606_v45 }
 0x1c5   : > { %611 = vadd.xlane.f32.xlu1 %v608_v46 }
 0x230   : > { %v610_v47 = vpop.xlane.xlu1 %609 }
 0x231   : > { %v613_v48 = vmul.f32 %v610_v47, %v602_v38 }
 0x233   : > { %v615_v49 = vadd.f32 1e-05, %v613_v48 }
 0x235   : > { %904 = vrsqrt.f32 %v615_v49  ;;  %vm623_vm2 = vweird.f32 %v615_v49 }
 0x238   : > { %v612_v50 = vpop.xlane.xlu1 %611 }
 0x239   : > { %v614_v51 = vmul.f32 %v612_v50, %v602_v38 }
 0x23b   : > { %v905_v52 = vpop.eup %904  ;;  %v616_v53 = vadd.f32 1e-05, %v614_v51 }
 0x23c   : > { %v618_v54 = vmul.f32 %v905_v52, %v615_v49  ;;  %vm624_vm1 = vweird.f32 %v905_v52 }
 0x23d   : > { %906 = vrsqrt.f32 %v616_v53  ;;  %vm625_vm3 = vmor %vm623_vm2, %vm624_vm1  ;;  %vm633_vm5 = vweird.f32 %v616_v53 }
 0x23e   : > { %v619_v55 = vmul.f32 %v905_v52, %v618_v54 }
 0x240   : > { %v620_v56 = vmul.f32 0.5, %v619_v55 }
 0x242   : > { %v621_v57 = vsub.f32 1.5, %v620_v56 }
 0x243   : > { %v907_v58 = vpop.eup %906 }
 0x244   : > { %v622_v59 = vmul.f32 %v905_v52, %v621_v57  ;;  %v628_v60 = vmul.f32 %v907_v58, %v616_v53  ;;  %vm634_vm4 = vweird.f32 %v907_v58 }
 0x245   : > { %vm635_vm6 = vmor %vm633_vm5, %vm634_vm4 }
 0x246   : > { %v629_v61 = vmul.f32 %v907_v58, %v628_v60  ;;  %v626_v62 = vsel %vm625_vm3, %v905_v52, %v622_v59 }
 0x247   : > { %v637_v2 = vmul.f32 %v626_v62, %v605_v41 }
 0x248   : > { %v630_v63 = vmul.f32 0.5, %v629_v61 }
 0x249   : > { %v642_v6 = vmul.f32 %v900_v1, %v637_v2 }
 0x24a   : > { %v631_v0 = vsub.f32 1.5, %v630_v63 }
 0x24b   : > { %v647_v9 = vadd.f32 %v901_v5, %v642_v6 }
 0x24c   : > { %v632_v3 = vmul.f32 %v907_v58, %v631_v0 }
 0x24e   : > { %v636_v4 = vsel %vm635_vm6, %v907_v58, %v632_v3 }
 0x24f   : > { %v638_v7 = vmul.f32 %v636_v4, %v606_v45 }
 0x251   : > { %v643_v8 = vmul.f32 %v900_v1, %v638_v7 }
 0x253   : > { %v648_v10 = vadd.f32 %v901_v5, %v643_v8 }
 0x255   : > { %v888_v11 = vpack.c.bf16 %v648_v10, %v647_v9 }
 0x257   : > { %889 = vst [vmem:[%s280_s10] sm:$0xff] %v888_v11  }
 0x258 PF: > { %s17_s24 = sadd.s32 1, %s914_s24  }
 0x259   : > { %p14_p4 = scmp.ge.s32.totalorder %s17_s24, 4  }
 0x25b   :  { %16 = sbr.rel (!%p14_p4) target bundleno = 1 (0x1), region = 78 }

// kernel: transformer_forward.37
= control target key start
LH: loop header
LB: loop body
LE: loop exit
PB: predicated region body
PF: predicated region fallthrough
CT: control target
= control target key end

     0   :  { %8 = vsyncpa [#allocation3], 0  ;;  %s769_s0 = inlined_call_operand.vmem [shape: bf16[32,128], index: 0, kind: input, shape index: {}]   ;;  %s770_s1 = inlined_call_operand.vmem [shape: bf16[128,128], index: 1, kind: input, shape index: {}]   ;;  %s771_s2 = inlined_call_operand.vmem [shape: f32[1,128], index: 2, kind: input, shape index: {}]   ;;  %s772_s3 = inlined_call_operand.hbm [shape: f32[32,128], index: 3, kind: output, shape index: {}]  }
   0x1   :  { %10 = vsyncpa [#allocation3 + $0x1], 0  ;;  %s646_s12 = smov 0   ;;  %s648_s13 = smov 0  }
   0x2   :  { %s650_s14 = smov 0   ;;  %s652_s15 = smov 0  }
   0x3   :  { %s654_s16 = smov 0   ;;  %s656_s17 = smov 0  }
   0x4 LB: > { %s425_s18 = sadd.s32 4294967295, %s622_s17   ;;  %s426_s19 = sadd.s32 4294967294, %s622_s17   ;;  %s622_s17 = sphi %s656_s17, %s16_s17   ;;  %s618_s16 = sphi %s654_s16, %s779_s16   ;;  %s614_s15 = sphi %s652_s15, %s778_s15   ;;  %s610_s14 = sphi %s650_s14, %s777_s14   ;;  %s606_s13 = sphi %s648_s13, %s776_s13   ;;  %s602_s12 = sphi %s646_s12, %s775_s12  }
   0x5   : > { %s28_s20 = sadd.s32 1, %s618_s16  ;;  %s115_s21 = sadd.s32 1, %s610_s14 }
   0x6   : > { %p30_p0 = scmp.ge.s32.totalorder %s28_s20, 2  ;;  %p125_p1 = scmp.ne.s32.totalorder %s610_s14, %s606_s13 }
   0x7   : > { %p126_p2 = scmp.eq.s32.totalorder %s425_s18, 1  ;;  %p131_p3 = scmp.ne.s32.totalorder %s606_s13, %s602_s12 }
   0x8   : > { %s781_s20 = smov (%p30_p0, %s28_s20), 0  ;;  %p132_p5 = scmp.eq.s32.totalorder %s426_s19, 1 }
   0x9   : > { %p686_p4 = por %p126_p2, %p125_p1  ;;  %s110_s23 = ssub.s32 %s618_s16, %s781_s20 }
   0xa   : > { %p431_p6 = scmp.ge.s32.totalorder %s622_s17, 1  ;;  %p113_p7 = scmp.eq.s32.totalorder %s110_s23, 0 }
   0xb   : > { %p693_p8 = por %p132_p5, %p131_p3  ;;  %p172_p9 = scmp.lt.s32.totalorder %s622_s17, 3 }
   0xc   : > { %s699_s25 = scalar_select %p113_p7, %s610_s14, %s115_s21  }
   0xd   : > { %p173_p10 = pnand %p431_p6, %p172_p9 }
   0xe   : > { %s433_s7 = sshll.u32 (!%p173_p10), %s614_s15, 1  ;;  %s200_s30 = sand.u32 (!%p173_p10), 1, %s606_s13  }
   0xf   : > { %176 = sbr.rel (%p173_p10) target bundleno = 192 (0xc0), region = 32  ;;  %p204_p11 = scmp.lt.s32.totalorder (!%p173_p10), %s433_s7, 3 }
  0x10   : > { %s432_s4 = sshll.u32 (!%p173_p10), %s200_s30, 4  ;;  %s485_s8 = sshll.u32 (!%p173_p10), %s614_s15, 4 }
  0x11   : > { %s322_s10 = scalar_lea.hbm (!%p173_p10), %s772_s3, %s485_s8  ;;  %s202_s11 = scalar_lea.vmem (!%p173_p10), [#allocation2], %s432_s4 }
  0x12   : > { %s323_s18 = sshll.u32 (!%p173_p10), %s202_s11, 4  ;;  %s325_s19 = sshll.u32 (!%p173_p10), %s322_s10, 4  ;;  %s324_s18 = int_to_ptr.vmem [resolvable:$true] %s323_s18  ;;  %s326_s19 = int_to_ptr.hbm [resolvable:$true] %s325_s19 }
  0x13   : > { %s558_s23 = sshra.s32 (!%p173_p10), %s326_s19, 4  ;;  %s564_s28 = scalar_lea.hbm (!%p173_p10), %s772_s3, 32  ;;  %s559_s23 = int_to_ptr.hbm [resolvable:$true] %s558_s23 }
  0x14   : > { %v484_v0 = vld [vmem:[%s770_s1 + $0x38] sm:$0xff]  ;;  %v483_v1 = vld [vmem:[%s770_s1 + $0x30] sm:$0xff]  ;;  %v482_v2 = vld [vmem:[%s770_s1 + $0x28] sm:$0xff]  ;;  %s783_s7 = smov (!%p204_p11, %s433_s7), 3  ;;  %s560_s15 = scalar_lea.hbm %s559_s23, 16 }
  0x15   : > { %293 = vmatpush.bf16.msra.mxu0 %v484_v0  ;;  %v481_v3 = vld [vmem:[%s770_s1 + $0x20] sm:$0xff]  ;;  %v480_v4 = vld [vmem:[%s770_s1 + $0x18] sm:$0xff]  ;;  %v479_v5 = vld [vmem:[%s770_s1 + $0x10] sm:$0xff]  ;;  %s434_s21 = sshll.u32 %s783_s7, 2  ;;  %p561_p12 = scmp.ne.s32.totalorder %s559_s23, %s560_s15 }
  0x16   : > { %v478_v6 = vld [vmem:[%s770_s1 + $0x8] sm:$0xff]  ;;  %v477_v7 = vld [vmem:[%s770_s1] sm:$0xff]  ;;  %s207_s29 = scalar_lea.vmem %s769_s0, %s434_s21  ;;  %s310_s21 = scalar_lea.sflag [#allocation3], %s200_s30 }
  0x17   : > { %v476_v8 = vld [vmem:[%s207_s29] sm:$0xff]  ;;  %p562_p13 = pnand %p561_p12, %p686_p4  ;;  %p565_p1 = scmp.lt.s32.totalorder %s559_s23, %s772_s3 }
  0x18   : > { %v543_v9 = vld [vmem:[%s771_s2] ss:$0 sm:$0xff]  ;;  %p566_p2 = scmp.lt.s32.totalorder %s564_s28, %s560_s15 }
  0x19   : > { %294 = vmatpush.bf16.msra.mxu0 %v483_v1  ;;  %p563_p0 = pneg %p562_p13 }
  0x1a   : > { %p567_p3 = por %p566_p2, %p565_p1 }
  0x1c   : > { %p568_p5 = pnand %p567_p3, %p563_p0 }
  0x1d   : > { %295 = vmatpush.bf16.msra.mxu0 %v482_v2 }
  0x21   : > { %296 = vmatpush.bf16.msra.mxu0 %v481_v3 }
  0x25   : > { %297 = vmatpush.bf16.msra.mxu0 %v480_v4 }
  0x29   : > { %298 = vmatpush.bf16.msra.mxu0 %v479_v5 }
  0x2d   : > { %299 = vmatpush.bf16.msra.mxu0 %v478_v6 }
  0x31   : > { %300 = vmatpush.bf16.msra.mxu0 %v477_v7 }
  0x34   : > { %301 = vmatmul.bf16.vlgmr.msra.gmra.mxu0 %v476_v8 }
  0xb1   : > { %v302_v10 = vpop.f32.mrf.mxu0 }
  0xb2   : > { %v303_v11 = vadd.f32 %v543_v9, %v302_v10 }
  0xb4   : > { %307 = vst [vmem:[%s202_s11] sm:$0xff] %v303_v11 }
  0xb9   : > { %v304_v12 = vpop.f32.mrf.mxu0 }
  0xba   : > { %v305_v13 = vadd.f32 %v543_v9, %v304_v12 }
  0xbc   : > { %308 = vst [vmem:[%s202_s11 + $0x8] sm:$0xff] %v305_v13 }
  0xbd   : > { %571 = shalt.err (!%p568_p5)
}
  0xbe   : > { %s624_s30 = smov 128   ;;  %s625_s5 = smov 8  }
  0xbf   : > { %486 = dma.vmem_to_hbm [thread:$0]  (%p686_p4), %s324_s18, 256, %s326_s19, %s310_s21, %s624_s30, %s624_s30, %s625_s5  }
  0xc0 PF: > { %p492_p6 = scmp.ge.s32.totalorder %s622_s17, 2  ;;  %s340_s6 = sand.u32 1, %s602_s12  }
  0xc1   : > { %s341_s8 = scalar_lea.sflag [#allocation3], %s340_s6 }
  0xc2   : > { %p489_p7 = pnand %p492_p6, %p693_p8 }
  0xc4   : > { %p490_p9 = pneg %p489_p7 }
  0xc6   : > { %597 = dma.done.wait (%p490_p9), %s341_s8, 256  }
  0xc7   : > { %599 = vsyncadd (%p490_p9), %s341_s8, 4294967040  ;;  %s16_s17 = sadd.s32 1, %s622_s17   ;;  %s775_s12 = smov %s606_s13 }
  0xc8   : > { %p13_p10 = scmp.ge.s32.totalorder %s16_s17, 4   ;;  %s776_s13 = smov %s610_s14 }
  0xc9   : > { %s777_s14 = smov %s699_s25  ;;  %s778_s15 = smov %s618_s16 }
  0xca   : > { %s779_s16 = smov %s781_s20  ;;  %15 = sbr.rel (!%p13_p10) target bundleno = 4 (0x4), region = 73 }
  0xcf   :  { %347 = vsyncpa [#allocation3], 1 }
  0xd0   :  { %349 = vsyncpa [#allocation3 + $0x1], 1 }

</bundles_post_ra>
